<compile_context>
chip_gen: v7x
topology: tpu7x:2x2x1
jax: 0.10.0
libtpu: 0.0.40
codegen_flags: <defaults>
</compile_context>

<pallas_src>
import math
from itertools import combinations

import jax
import jax.numpy as jnp
from jax.experimental import pallas as pl
from jax.experimental.pallas import tpu as pltpu


# ---------------------------------------------------------------------------
# Pallas kernel: the full cross-transformer forward on tuple features.
# ---------------------------------------------------------------------------
def _tct_kernel(x_ref, w_ref, bias_ref, g_ref, b_ref, clsw_ref,
                logits_ref, diff_ref):
    """
    x_ref    : ((kn+1)*T, Fp) bf16  [support tuples ; query tuples], PE added,
                                     lane-padded with zeros to Fp
    w_ref    : (Fp, 2*D)      bf16  fused [Wk | Wv], rows zero-padded
    bias_ref : (1, 2*D)       f32   fused [bk | bv]
    g_ref    : (1, D)         f32   LayerNorm gamma
    b_ref    : (1, D)         f32   LayerNorm beta
    clsw_ref : (C*kn,)        f32   SMEM, flat class-mean weights
    logits_ref : (1, C)       f32   negative scaled squared distances
    diff_ref   : (T, D)       f32   query_vs - best-class prototype
    """
    T, d_out = diff_ref.shape
    num_classes = logits_ref.shape[1]
    kn = x_ref.shape[0] // T - 1
    s_rows = kn * T

    # --- fused K/V projection: one bf16 MXU matmul, f32 accumulation -------
    kv = jnp.dot(x_ref[...], w_ref[...],
                 preferred_element_type=jnp.float32) + bias_ref[...]  # (M, 2D)
    keys = kv[:, :d_out]          # (M, D)  lane-aligned slice (D = 128)
    vals = kv[:, d_out:]          # (M, D)

    # --- LayerNorm on the keys only (f32) -----------------------------------
    mu = jnp.mean(keys, axis=-1, keepdims=True)
    xc = keys - mu
    var = jnp.mean(xc * xc, axis=-1, keepdims=True)
    keys = xc * jax.lax.rsqrt(var + 1e-5) * g_ref[...] + b_ref[...]

    # Query-side slices (row offset kn*T is a multiple of 8 -> cheap views).
    q_v = vals[s_rows:, :]                                    # (T, D) f32
    scale = 1.0 / math.sqrt(d_out)
    q_kb = (keys[s_rows:, :] * scale).astype(jnp.bfloat16)    # (T, D) bf16

    # --- per-support-clip attention over its T tuples (softmax dim=-1) ------
    protos = []
    for s_i in range(kn):                     # statically unrolled (few-shot)
        r0 = s_i * T
        sk_b = keys[r0:r0 + T, :].astype(jnp.bfloat16)        # (T, D)
        sv_b = vals[r0:r0 + T, :].astype(jnp.bfloat16)        # (T, D)
        scores = jax.lax.dot_general(                          # q . k^T (T, T)
            q_kb, sk_b, (((1,), (1,)), ((), ())),
            preferred_element_type=jnp.float32)
        m = jnp.max(scores, axis=-1, keepdims=True)
        e = jnp.exp(scores - m)
        p = e * pl.reciprocal(jnp.sum(e, axis=-1, keepdims=True), approx=True)
        protos.append(jnp.dot(p.astype(jnp.bfloat16), sv_b,
                              preferred_element_type=jnp.float32))  # (T, D)

    # --- per-class prototype means, distances and diffs (f32 epilogue) ------
    dists, diffs = [], []
    for c in range(num_classes):
        proto_c = clsw_ref[c * kn] * protos[0]
        for s_i in range(1, kn):
            proto_c = proto_c + clsw_ref[c * kn + s_i] * protos[s_i]  # (T, D)
        d_c = q_v - proto_c                                           # (T, D)
        sq = jnp.sum(d_c * d_c, axis=-1, keepdims=True)               # (T, 1)
        dists.append(-jnp.sum(sq, axis=0, keepdims=True) * (1.0 / T))  # (1,1)
        diffs.append(d_c)

    logits_ref[...] = jnp.concatenate(dists, axis=1).astype(logits_ref.dtype)

    # Explicit running argmax (first index wins, like torch.argmax), then
    # select the corresponding diff.
    best_val = dists[0]
    best_idx = jnp.zeros((1, 1), jnp.int32)
    for c in range(1, num_classes):
        better = dists[c] > best_val
        best_val = jnp.where(better, dists[c], best_val)
        best_idx = jnp.where(better, jnp.int32(c), best_idx)
    diff_best = diffs[0]
    for c in range(1, num_classes):
        diff_best = jnp.where(best_idx == c, diffs[c], diff_best)
    diff_ref[...] = diff_best.astype(diff_ref.dtype)


# ---------------------------------------------------------------------------
# Wrapper: PE + static tuple gather + operand fusion/padding, one pallas_call.
# ---------------------------------------------------------------------------
def positional_encoding_table(max_len, d_model, pe_scale_factor=0.1):
    position = jnp.arange(max_len, dtype=jnp.float32)[:, None]
    div_term = jnp.exp(jnp.arange(0, d_model, 2, dtype=jnp.float32)
                       * (-(math.log(10000.0) / d_model)))
    angles = position * div_term
    pe = jnp.zeros((max_len, d_model), jnp.float32)
    pe = pe.at[:, 0::2].set(jnp.sin(angles) * pe_scale_factor)
    pe = pe.at[:, 1::2].set(jnp.cos(angles) * pe_scale_factor)
    return pe


def temporal_cross_transformer_forward(support_set, support_labels, queries,
                                       params, *, num_classes,
                                       temporal_set_size=3):
    """support_set: (kn, seq, in_dim); support_labels: (kn,) int in [0, C);
    queries: (1, 1, seq, in_dim).  Returns {'logits': (1, C), 'diff': (1, T, D)}."""
    kn, seq_len, in_dim = support_set.shape
    d_out = params['wk'].shape[1]
    feat = in_dim * temporal_set_size
    feat_p = pl.cdiv(feat, 128) * 128            # lane-dense contraction dim

    # Positional encoding (dropout is identity at inference).
    pe = params['pe'][:seq_len]
    support_pe = support_set + pe[None]                     # (kn, seq, d)
    query_pe = (queries + pe)[0, 0]                         # (seq, d)

    # Static frame-tuple gather: all C(seq_len, temporal_set_size) combinations.
    tuples = jnp.asarray(list(combinations(range(seq_len), temporal_set_size)),
                         dtype=jnp.int32)                   # (T, tss)
    T = int(tuples.shape[0])
    s_tup = support_pe[:, tuples, :].reshape(kn * T, feat)  # (kn*T, 3*d)
    q_tup = query_pe[tuples, :].reshape(T, feat)            # (T, 3*d)

    # Stacked [support ; query] rows, zero-padded lanes, bf16 for the MXU.
    x = jnp.concatenate([s_tup, q_tup], axis=0)             # ((kn+1)*T, feat)
    x = jnp.pad(x, ((0, 0), (0, feat_p - feat))).astype(jnp.bfloat16)

    # Fused [Wk | Wv] with zero-padded rows (bf16); biases stay f32.
    w = jnp.concatenate([params['wk'], params['wv']], axis=1)     # (feat, 2D)
    w = jnp.pad(w, ((0, feat_p - feat), (0, 0))).astype(jnp.bfloat16)
    bias = jnp.concatenate([params['bk'], params['bv']]).reshape(1, 2 * d_out)

    g = params['ln_g'].reshape(1, d_out)
    b = params['ln_b'].reshape(1, d_out)

    # Class-mean weights (1/count for members, 0 else), flattened for 1-D SMEM.
    labels = support_labels.astype(jnp.int32)
    onehot = (labels[None, :] ==
              jnp.arange(num_classes, dtype=jnp.int32)[:, None]).astype(jnp.float32)
    counts = jnp.sum(onehot, axis=1, keepdims=True)
    cls_w = (onehot / jnp.maximum(counts, 1.0)).reshape(num_classes * kn)

    # Advisory cost estimate for XLA's scheduler (tiny custom call).
    flops = (2 * (kn + 1) * T * feat_p * (2 * d_out)      # fused K/V projection
             + kn * 2 * (2 * T * T * d_out)               # scores + P @ V
             + num_classes * kn * 2 * T * d_out)          # class-mean protos
    transcendentals = kn * T * T + (kn + 1) * T           # softmax exp + LN rsqrt
    bytes_accessed = (2 * x.size + 2 * w.size
                      + 4 * (bias.size + g.size + b.size + cls_w.size
                             + num_classes + T * d_out))

    vmem = pl.BlockSpec(memory_space=pltpu.MemorySpace.VMEM)
    smem = pl.BlockSpec(memory_space=pltpu.MemorySpace.SMEM)
    logits, diff = pl.pallas_call(
        _tct_kernel,
        out_shape=(jax.ShapeDtypeStruct((1, num_classes), jnp.float32),
                   jax.ShapeDtypeStruct((T, d_out), jnp.float32)),
        in_specs=[vmem, vmem, vmem, vmem, vmem, smem],
        out_specs=(vmem, vmem),
        cost_estimate=pl.CostEstimate(flops=flops,
                                      transcendentals=transcendentals,
                                      bytes_accessed=bytes_accessed),
    )(x, w, bias, g, b, cls_w)

    return {'logits': logits, 'diff': diff.reshape(1, T, d_out)}


# ---------------------------------------------------------------------------
# Parameters (mirrors nn.Linear / nn.LayerNorm shapes; weights pre-transposed).
# ---------------------------------------------------------------------------
def init_params(key, in_dim, out_dim, temporal_set_size, seq_len,
                pe_scale_factor=0.1):
    kf = in_dim * temporal_set_size
    kwk, kbk, kwv, kbv, kg, kb = jax.random.split(key, 6)
    bound = 1.0 / math.sqrt(kf)
    wk = jax.random.uniform(kwk, (kf, out_dim), jnp.float32, -bound, bound)
    bk = jax.random.uniform(kbk, (out_dim,), jnp.float32, -bound, bound)
    wv = jax.random.uniform(kwv, (kf, out_dim), jnp.float32, -bound, bound)
    bv = jax.random.uniform(kbv, (out_dim,), jnp.float32, -bound, bound)
    ln_g = 1.0 + 0.1 * jax.random.normal(kg, (out_dim,), jnp.float32)
    ln_b = 0.1 * jax.random.normal(kb, (out_dim,), jnp.float32)
    pe = positional_encoding_table(int(seq_len * 1.5), in_dim, pe_scale_factor)
    return dict(wk=wk, bk=bk, wv=wv, bv=bv, ln_g=ln_g, ln_b=ln_b, pe=pe)


# ---------------------------------------------------------------------------
# Pure-JAX f32 reference that mirrors the PyTorch forward (per-class loop).
# ---------------------------------------------------------------------------
def reference_forward(support_set, support_labels, queries, params, *,
                      num_classes, temporal_set_size=3):
    import numpy as np
    HIGH = jax.lax.Precision.HIGHEST
    kn, seq_len, in_dim = support_set.shape
    d_out = params['wk'].shape[1]

    pe = params['pe'][:seq_len]
    s = support_set + pe[None]
    q = (queries + pe)[0, 0]

    tuples = list(combinations(range(seq_len), temporal_set_size))
    T = len(tuples)
    tup = jnp.asarray(tuples, dtype=jnp.int32)
    s_t = s[:, tup, :].reshape(kn, T, temporal_set_size * in_dim)
    q_t = q[tup, :].reshape(1, T, temporal_set_size * in_dim)

    def linear(x, w, b):
        return jnp.matmul(x, w, precision=HIGH) + b

    s_k = linear(s_t, params['wk'], params['bk'])
    q_k = linear(q_t, params['wk'], params['bk'])
    s_v = linear(s_t, params['wv'], params['bv'])
    q_v = linear(q_t, params['wv'], params['bv'])

    def ln(x):
        mu = x.mean(-1, keepdims=True)
        var = ((x - mu) ** 2).mean(-1, keepdims=True)
        return (x - mu) / jnp.sqrt(var + 1e-5) * params['ln_g'] + params['ln_b']

    s_k = ln(s_k)
    q_k = ln(q_k)

    labels_np = np.asarray(support_labels)
    logits = np.zeros((1, num_classes), dtype=np.float32)
    protos = []
    for c in range(num_classes):
        sel = np.nonzero(labels_np == c)[0]
        class_k = s_k[sel]
        class_v = s_v[sel]
        scores = jnp.matmul(q_k[:, None], jnp.swapaxes(class_k, -2, -1),
                            precision=HIGH) / math.sqrt(d_out)
        scores = jax.nn.softmax(scores, axis=-1)
        proto = jnp.matmul(scores, class_v, precision=HIGH)   # (1, n_c, T, D)
        proto = jnp.mean(proto, axis=1)                       # (1, T, D)
        protos.append(proto)
        dcl = q_v - proto
        dist = -jnp.sum(dcl * dcl, axis=(-2, -1)) / T
        logits[:, c] = np.asarray(dist)
    logits = jnp.asarray(logits)
    protos = jnp.stack(protos, axis=1)                        # (1, C, T, D)
    best = int(jnp.argmax(logits, axis=-1)[0])
    diff = q_v - protos[:, best]
    return {'logits': logits, 'diff': diff}


if __name__ == "__main__":
    SEQ_LEN = 8          # args.seq_len
    IN_DIM = 64          # args.trans_linear_in_dim
    OUT_DIM = 128        # args.trans_linear_out_dim
    TSS = 3              # temporal_set_size
    NUM_CLASSES = 3
    SHOTS = 2
    KN = NUM_CLASSES * SHOTS

    key = jax.random.PRNGKey(0)
    k_s, k_q, k_p = jax.random.split(key, 3)

    support_set = jax.random.normal(k_s, (KN, SEQ_LEN, IN_DIM), jnp.float32)
    support_labels = jnp.array([0, 0, 1, 1, 2, 2], dtype=jnp.int32)
    # Query = noisy copy of a class-0 support clip -> unambiguous best class.
    queries = support_set[0][None, None] + 0.05 * jax.random.normal(
        k_q, (1, 1, SEQ_LEN, IN_DIM), jnp.float32)
    params = init_params(k_p, IN_DIM, OUT_DIM, TSS, SEQ_LEN)

    out = temporal_cross_transformer_forward(
        support_set, support_labels, queries, params,
        num_classes=NUM_CLASSES, temporal_set_size=TSS)
    out = jax.block_until_ready(out)

    ref = reference_forward(support_set, support_labels, queries, params,
                            num_classes=NUM_CLASSES, temporal_set_size=TSS)

    T = out['diff'].shape[1]
    assert out['logits'].shape == (1, NUM_CLASSES), out['logits'].shape
    assert out['diff'].shape == (1, T, OUT_DIM), out['diff'].shape

    # Tolerances account for bf16 MXU operands (f32 accumulation) + approx
    # reciprocal vs the f32 HIGHEST-precision reference.
    assert int(jnp.argmax(out['logits'])) == int(jnp.argmax(ref['logits'])), \
        (out['logits'], ref['logits'])
    assert jnp.allclose(out['logits'], ref['logits'], atol=2.5e-1, rtol=4e-2), \
        (out['logits'], ref['logits'])
    assert jnp.allclose(out['diff'], ref['diff'], atol=1e-1, rtol=5e-2)
    rel_fro = (jnp.linalg.norm(out['diff'] - ref['diff'])
               / jnp.linalg.norm(ref['diff']))
    assert rel_fro < 5e-2, rel_fro

    print("KERNEL_OK")
</pallas_src>

<mosaic_0001>
module attributes {stable_mosaic.version = 11 : i64} {
  func.func @_tct_kernel(%arg0: memref<392x256xbf16, #tpu.memory_space<vmem>>, %arg1: memref<256x256xbf16, #tpu.memory_space<vmem>>, %arg2: memref<1x256xf32, #tpu.memory_space<vmem>>, %arg3: memref<1x128xf32, #tpu.memory_space<vmem>>, %arg4: memref<1x128xf32, #tpu.memory_space<vmem>>, %arg5: memref<18xf32, #tpu.memory_space<smem>>, %arg6: memref<1x3xf32, #tpu.memory_space<vmem>>, %arg7: memref<56x128xf32, #tpu.memory_space<vmem>>) attributes {dimension_semantics = [], scalar_prefetch = 0 : i64, scratch_operands = 0 : i64, tpu.core_type = #tpu.core_type<tc>} {
    %c0 = arith.constant 0 : index
    %c0_0 = arith.constant 0 : index
    %0 = vector.load %arg0[%c0, %c0_0] : memref<392x256xbf16, #tpu.memory_space<vmem>>, vector<392x256xbf16>
    %c0_1 = arith.constant 0 : index
    %c0_2 = arith.constant 0 : index
    %1 = vector.load %arg1[%c0_1, %c0_2] : memref<256x256xbf16, #tpu.memory_space<vmem>>, vector<256x256xbf16>
    %cst = arith.constant dense<0.000000e+00> : vector<392x256xf32>
    %2 = tpu.matmul %0, %1, %cst {dimension_numbers = #tpu.dot_dimension_numbers<[1], [0], [0], [1], [0, 0, 1, 1], [], []>} : vector<392x256xbf16>, vector<256x256xbf16>, vector<392x256xf32> -> vector<392x256xf32>
    %c0_3 = arith.constant 0 : index
    %c0_4 = arith.constant 0 : index
    %3 = vector.load %arg2[%c0_3, %c0_4] : memref<1x256xf32, #tpu.memory_space<vmem>>, vector<1x256xf32>
    %4 = vector.broadcast %3 : vector<1x256xf32> to vector<392x256xf32>
    %5 = arith.addf %2, %4 : vector<392x256xf32>
    %6 = vector.extract_strided_slice %5 {offsets = [0, 0], sizes = [392, 128], strides = [1, 1]} : vector<392x256xf32> to vector<392x128xf32>
    %7 = vector.extract_strided_slice %5 {offsets = [0, 128], sizes = [392, 128], strides = [1, 1]} : vector<392x256xf32> to vector<392x128xf32>
    %cst_5 = arith.constant dense<0.000000e+00> : vector<392xf32>
    %8 = vector.multi_reduction <add>, %6, %cst_5 [1] : vector<392x128xf32> to vector<392xf32>
    %9 = vector.shape_cast %8 : vector<392xf32> to vector<392x1xf32>
    %cst_6 = arith.constant 1.280000e+02 : f32
    %10 = vector.broadcast %cst_6 : f32 to vector<392x1xf32>
    %11 = arith.divf %9, %10 : vector<392x1xf32>
    %12 = vector.broadcast %11 : vector<392x1xf32> to vector<392x128xf32>
    %13 = arith.subf %6, %12 : vector<392x128xf32>
    %14 = arith.mulf %13, %13 : vector<392x128xf32>
    %cst_7 = arith.constant dense<0.000000e+00> : vector<392xf32>
    %15 = vector.multi_reduction <add>, %14, %cst_7 [1] : vector<392x128xf32> to vector<392xf32>
    %16 = vector.shape_cast %15 : vector<392xf32> to vector<392x1xf32>
    %cst_8 = arith.constant 1.280000e+02 : f32
    %17 = vector.broadcast %cst_8 : f32 to vector<392x1xf32>
    %18 = arith.divf %16, %17 : vector<392x1xf32>
    %cst_9 = arith.constant 9.99999974E-6 : f32
    %19 = vector.broadcast %cst_9 : f32 to vector<392x1xf32>
    %20 = arith.addf %18, %19 : vector<392x1xf32>
    %21 = math.rsqrt %20 : vector<392x1xf32>
    %22 = vector.broadcast %21 : vector<392x1xf32> to vector<392x128xf32>
    %23 = arith.mulf %13, %22 : vector<392x128xf32>
    %c0_10 = arith.constant 0 : index
    %c0_11 = arith.constant 0 : index
    %24 = vector.load %arg3[%c0_10, %c0_11] : memref<1x128xf32, #tpu.memory_space<vmem>>, vector<1x128xf32>
    %25 = vector.broadcast %24 : vector<1x128xf32> to vector<392x128xf32>
    %26 = arith.mulf %23, %25 : vector<392x128xf32>
    %c0_12 = arith.constant 0 : index
    %c0_13 = arith.constant 0 : index
    %27 = vector.load %arg4[%c0_12, %c0_13] : memref<1x128xf32, #tpu.memory_space<vmem>>, vector<1x128xf32>
    %28 = vector.broadcast %27 : vector<1x128xf32> to vector<392x128xf32>
    %29 = arith.addf %26, %28 : vector<392x128xf32>
    %30 = vector.extract_strided_slice %7 {offsets = [336, 0], sizes = [56, 128], strides = [1, 1]} : vector<392x128xf32> to vector<56x128xf32>
    %31 = vector.extract_strided_slice %29 {offsets = [336, 0], sizes = [56, 128], strides = [1, 1]} : vector<392x128xf32> to vector<56x128xf32>
    %cst_14 = arith.constant 0.0883883461 : f32
    %32 = vector.broadcast %cst_14 : f32 to vector<56x128xf32>
    %33 = arith.mulf %31, %32 : vector<56x128xf32>
    %34 = arith.truncf %33 : vector<56x128xf32> to vector<56x128xbf16>
    %35 = vector.extract_strided_slice %29 {offsets = [0, 0], sizes = [56, 128], strides = [1, 1]} : vector<392x128xf32> to vector<56x128xf32>
    %36 = arith.truncf %35 : vector<56x128xf32> to vector<56x128xbf16>
    %37 = vector.extract_strided_slice %7 {offsets = [0, 0], sizes = [56, 128], strides = [1, 1]} : vector<392x128xf32> to vector<56x128xf32>
    %38 = arith.truncf %37 : vector<56x128xf32> to vector<56x128xbf16>
    %cst_15 = arith.constant dense<0.000000e+00> : vector<56x56xf32>
    %39 = tpu.matmul %34, %36, %cst_15 {dimension_numbers = #tpu.dot_dimension_numbers<[1], [1], [0], [0], [0, 0, 1, 0], [], []>} : vector<56x128xbf16>, vector<56x128xbf16>, vector<56x56xf32> -> vector<56x56xf32>
    %cst_16 = arith.constant dense<0xFF800000> : vector<56xf32>
    %40 = vector.multi_reduction <maximumf>, %39, %cst_16 [1] : vector<56x56xf32> to vector<56xf32>
    %41 = vector.shape_cast %40 : vector<56xf32> to vector<56x1xf32>
    %42 = vector.broadcast %41 : vector<56x1xf32> to vector<56x56xf32>
    %43 = arith.subf %39, %42 : vector<56x56xf32>
    %44 = math.exp %43 : vector<56x56xf32>
    %cst_17 = arith.constant dense<0.000000e+00> : vector<56xf32>
    %45 = vector.multi_reduction <add>, %44, %cst_17 [1] : vector<56x56xf32> to vector<56xf32>
    %46 = vector.shape_cast %45 : vector<56xf32> to vector<56x1xf32>
    %47 = tpu.reciprocal %46 {approx = true} : vector<56x1xf32> -> vector<56x1xf32>
    %48 = vector.broadcast %47 : vector<56x1xf32> to vector<56x56xf32>
    %49 = arith.mulf %44, %48 : vector<56x56xf32>
    %50 = arith.truncf %49 : vector<56x56xf32> to vector<56x56xbf16>
    %cst_18 = arith.constant dense<0.000000e+00> : vector<56x128xf32>
    %51 = tpu.matmul %50, %38, %cst_18 {dimension_numbers = #tpu.dot_dimension_numbers<[1], [0], [0], [1], [0, 0, 1, 1], [], []>} : vector<56x56xbf16>, vector<56x128xbf16>, vector<56x128xf32> -> vector<56x128xf32>
    %52 = vector.extract_strided_slice %29 {offsets = [56, 0], sizes = [56, 128], strides = [1, 1]} : vector<392x128xf32> to vector<56x128xf32>
    %53 = arith.truncf %52 : vector<56x128xf32> to vector<56x128xbf16>
    %54 = vector.extract_strided_slice %7 {offsets = [56, 0], sizes = [56, 128], strides = [1, 1]} : vector<392x128xf32> to vector<56x128xf32>
    %55 = arith.truncf %54 : vector<56x128xf32> to vector<56x128xbf16>
    %cst_19 = arith.constant dense<0.000000e+00> : vector<56x56xf32>
    %56 = tpu.matmul %34, %53, %cst_19 {dimension_numbers = #tpu.dot_dimension_numbers<[1], [1], [0], [0], [0, 0, 1, 0], [], []>} : vector<56x128xbf16>, vector<56x128xbf16>, vector<56x56xf32> -> vector<56x56xf32>
    %cst_20 = arith.constant dense<0xFF800000> : vector<56xf32>
    %57 = vector.multi_reduction <maximumf>, %56, %cst_20 [1] : vector<56x56xf32> to vector<56xf32>
    %58 = vector.shape_cast %57 : vector<56xf32> to vector<56x1xf32>
    %59 = vector.broadcast %58 : vector<56x1xf32> to vector<56x56xf32>
    %60 = arith.subf %56, %59 : vector<56x56xf32>
    %61 = math.exp %60 : vector<56x56xf32>
    %cst_21 = arith.constant dense<0.000000e+00> : vector<56xf32>
    %62 = vector.multi_reduction <add>, %61, %cst_21 [1] : vector<56x56xf32> to vector<56xf32>
    %63 = vector.shape_cast %62 : vector<56xf32> to vector<56x1xf32>
    %64 = tpu.reciprocal %63 {approx = true} : vector<56x1xf32> -> vector<56x1xf32>
    %65 = vector.broadcast %64 : vector<56x1xf32> to vector<56x56xf32>
    %66 = arith.mulf %61, %65 : vector<56x56xf32>
    %67 = arith.truncf %66 : vector<56x56xf32> to vector<56x56xbf16>
    %cst_22 = arith.constant dense<0.000000e+00> : vector<56x128xf32>
    %68 = tpu.matmul %67, %55, %cst_22 {dimension_numbers = #tpu.dot_dimension_numbers<[1], [0], [0], [1], [0, 0, 1, 1], [], []>} : vector<56x56xbf16>, vector<56x128xbf16>, vector<56x128xf32> -> vector<56x128xf32>
    %69 = vector.extract_strided_slice %29 {offsets = [112, 0], sizes = [56, 128], strides = [1, 1]} : vector<392x128xf32> to vector<56x128xf32>
    %70 = arith.truncf %69 : vector<56x128xf32> to vector<56x128xbf16>
    %71 = vector.extract_strided_slice %7 {offsets = [112, 0], sizes = [56, 128], strides = [1, 1]} : vector<392x128xf32> to vector<56x128xf32>
    %72 = arith.truncf %71 : vector<56x128xf32> to vector<56x128xbf16>
    %cst_23 = arith.constant dense<0.000000e+00> : vector<56x56xf32>
    %73 = tpu.matmul %34, %70, %cst_23 {dimension_numbers = #tpu.dot_dimension_numbers<[1], [1], [0], [0], [0, 0, 1, 0], [], []>} : vector<56x128xbf16>, vector<56x128xbf16>, vector<56x56xf32> -> vector<56x56xf32>
    %cst_24 = arith.constant dense<0xFF800000> : vector<56xf32>
    %74 = vector.multi_reduction <maximumf>, %73, %cst_24 [1] : vector<56x56xf32> to vector<56xf32>
    %75 = vector.shape_cast %74 : vector<56xf32> to vector<56x1xf32>
    %76 = vector.broadcast %75 : vector<56x1xf32> to vector<56x56xf32>
    %77 = arith.subf %73, %76 : vector<56x56xf32>
    %78 = math.exp %77 : vector<56x56xf32>
    %cst_25 = arith.constant dense<0.000000e+00> : vector<56xf32>
    %79 = vector.multi_reduction <add>, %78, %cst_25 [1] : vector<56x56xf32> to vector<56xf32>
    %80 = vector.shape_cast %79 : vector<56xf32> to vector<56x1xf32>
    %81 = tpu.reciprocal %80 {approx = true} : vector<56x1xf32> -> vector<56x1xf32>
    %82 = vector.broadcast %81 : vector<56x1xf32> to vector<56x56xf32>
    %83 = arith.mulf %78, %82 : vector<56x56xf32>
    %84 = arith.truncf %83 : vector<56x56xf32> to vector<56x56xbf16>
    %cst_26 = arith.constant dense<0.000000e+00> : vector<56x128xf32>
    %85 = tpu.matmul %84, %72, %cst_26 {dimension_numbers = #tpu.dot_dimension_numbers<[1], [0], [0], [1], [0, 0, 1, 1], [], []>} : vector<56x56xbf16>, vector<56x128xbf16>, vector<56x128xf32> -> vector<56x128xf32>
    %86 = vector.extract_strided_slice %29 {offsets = [168, 0], sizes = [56, 128], strides = [1, 1]} : vector<392x128xf32> to vector<56x128xf32>
    %87 = arith.truncf %86 : vector<56x128xf32> to vector<56x128xbf16>
    %88 = vector.extract_strided_slice %7 {offsets = [168, 0], sizes = [56, 128], strides = [1, 1]} : vector<392x128xf32> to vector<56x128xf32>
    %89 = arith.truncf %88 : vector<56x128xf32> to vector<56x128xbf16>
    %cst_27 = arith.constant dense<0.000000e+00> : vector<56x56xf32>
    %90 = tpu.matmul %34, %87, %cst_27 {dimension_numbers = #tpu.dot_dimension_numbers<[1], [1], [0], [0], [0, 0, 1, 0], [], []>} : vector<56x128xbf16>, vector<56x128xbf16>, vector<56x56xf32> -> vector<56x56xf32>
    %cst_28 = arith.constant dense<0xFF800000> : vector<56xf32>
    %91 = vector.multi_reduction <maximumf>, %90, %cst_28 [1] : vector<56x56xf32> to vector<56xf32>
    %92 = vector.shape_cast %91 : vector<56xf32> to vector<56x1xf32>
    %93 = vector.broadcast %92 : vector<56x1xf32> to vector<56x56xf32>
    %94 = arith.subf %90, %93 : vector<56x56xf32>
    %95 = math.exp %94 : vector<56x56xf32>
    %cst_29 = arith.constant dense<0.000000e+00> : vector<56xf32>
    %96 = vector.multi_reduction <add>, %95, %cst_29 [1] : vector<56x56xf32> to vector<56xf32>
    %97 = vector.shape_cast %96 : vector<56xf32> to vector<56x1xf32>
    %98 = tpu.reciprocal %97 {approx = true} : vector<56x1xf32> -> vector<56x1xf32>
    %99 = vector.broadcast %98 : vector<56x1xf32> to vector<56x56xf32>
    %100 = arith.mulf %95, %99 : vector<56x56xf32>
    %101 = arith.truncf %100 : vector<56x56xf32> to vector<56x56xbf16>
    %cst_30 = arith.constant dense<0.000000e+00> : vector<56x128xf32>
    %102 = tpu.matmul %101, %89, %cst_30 {dimension_numbers = #tpu.dot_dimension_numbers<[1], [0], [0], [1], [0, 0, 1, 1], [], []>} : vector<56x56xbf16>, vector<56x128xbf16>, vector<56x128xf32> -> vector<56x128xf32>
    %103 = vector.extract_strided_slice %29 {offsets = [224, 0], sizes = [56, 128], strides = [1, 1]} : vector<392x128xf32> to vector<56x128xf32>
    %104 = arith.truncf %103 : vector<56x128xf32> to vector<56x128xbf16>
    %105 = vector.extract_strided_slice %7 {offsets = [224, 0], sizes = [56, 128], strides = [1, 1]} : vector<392x128xf32> to vector<56x128xf32>
    %106 = arith.truncf %105 : vector<56x128xf32> to vector<56x128xbf16>
    %cst_31 = arith.constant dense<0.000000e+00> : vector<56x56xf32>
    %107 = tpu.matmul %34, %104, %cst_31 {dimension_numbers = #tpu.dot_dimension_numbers<[1], [1], [0], [0], [0, 0, 1, 0], [], []>} : vector<56x128xbf16>, vector<56x128xbf16>, vector<56x56xf32> -> vector<56x56xf32>
    %cst_32 = arith.constant dense<0xFF800000> : vector<56xf32>
    %108 = vector.multi_reduction <maximumf>, %107, %cst_32 [1] : vector<56x56xf32> to vector<56xf32>
    %109 = vector.shape_cast %108 : vector<56xf32> to vector<56x1xf32>
    %110 = vector.broadcast %109 : vector<56x1xf32> to vector<56x56xf32>
    %111 = arith.subf %107, %110 : vector<56x56xf32>
    %112 = math.exp %111 : vector<56x56xf32>
    %cst_33 = arith.constant dense<0.000000e+00> : vector<56xf32>
    %113 = vector.multi_reduction <add>, %112, %cst_33 [1] : vector<56x56xf32> to vector<56xf32>
    %114 = vector.shape_cast %113 : vector<56xf32> to vector<56x1xf32>
    %115 = tpu.reciprocal %114 {approx = true} : vector<56x1xf32> -> vector<56x1xf32>
    %116 = vector.broadcast %115 : vector<56x1xf32> to vector<56x56xf32>
    %117 = arith.mulf %112, %116 : vector<56x56xf32>
    %118 = arith.truncf %117 : vector<56x56xf32> to vector<56x56xbf16>
    %cst_34 = arith.constant dense<0.000000e+00> : vector<56x128xf32>
    %119 = tpu.matmul %118, %106, %cst_34 {dimension_numbers = #tpu.dot_dimension_numbers<[1], [0], [0], [1], [0, 0, 1, 1], [], []>} : vector<56x56xbf16>, vector<56x128xbf16>, vector<56x128xf32> -> vector<56x128xf32>
    %120 = vector.extract_strided_slice %29 {offsets = [280, 0], sizes = [56, 128], strides = [1, 1]} : vector<392x128xf32> to vector<56x128xf32>
    %121 = arith.truncf %120 : vector<56x128xf32> to vector<56x128xbf16>
    %122 = vector.extract_strided_slice %7 {offsets = [280, 0], sizes = [56, 128], strides = [1, 1]} : vector<392x128xf32> to vector<56x128xf32>
    %123 = arith.truncf %122 : vector<56x128xf32> to vector<56x128xbf16>
    %cst_35 = arith.constant dense<0.000000e+00> : vector<56x56xf32>
    %124 = tpu.matmul %34, %121, %cst_35 {dimension_numbers = #tpu.dot_dimension_numbers<[1], [1], [0], [0], [0, 0, 1, 0], [], []>} : vector<56x128xbf16>, vector<56x128xbf16>, vector<56x56xf32> -> vector<56x56xf32>
    %cst_36 = arith.constant dense<0xFF800000> : vector<56xf32>
    %125 = vector.multi_reduction <maximumf>, %124, %cst_36 [1] : vector<56x56xf32> to vector<56xf32>
    %126 = vector.shape_cast %125 : vector<56xf32> to vector<56x1xf32>
    %127 = vector.broadcast %126 : vector<56x1xf32> to vector<56x56xf32>
    %128 = arith.subf %124, %127 : vector<56x56xf32>
    %129 = math.exp %128 : vector<56x56xf32>
    %cst_37 = arith.constant dense<0.000000e+00> : vector<56xf32>
    %130 = vector.multi_reduction <add>, %129, %cst_37 [1] : vector<56x56xf32> to vector<56xf32>
    %131 = vector.shape_cast %130 : vector<56xf32> to vector<56x1xf32>
    %132 = tpu.reciprocal %131 {approx = true} : vector<56x1xf32> -> vector<56x1xf32>
    %133 = vector.broadcast %132 : vector<56x1xf32> to vector<56x56xf32>
    %134 = arith.mulf %129, %133 : vector<56x56xf32>
    %135 = arith.truncf %134 : vector<56x56xf32> to vector<56x56xbf16>
    %cst_38 = arith.constant dense<0.000000e+00> : vector<56x128xf32>
    %136 = tpu.matmul %135, %123, %cst_38 {dimension_numbers = #tpu.dot_dimension_numbers<[1], [0], [0], [1], [0, 0, 1, 1], [], []>} : vector<56x56xbf16>, vector<56x128xbf16>, vector<56x128xf32> -> vector<56x128xf32>
    %c0_39 = arith.constant 0 : index
    %137 = memref.load %arg5[%c0_39] : memref<18xf32, #tpu.memory_space<smem>>
    %138 = vector.broadcast %137 : f32 to vector<56x128xf32>
    %139 = arith.mulf %138, %51 : vector<56x128xf32>
    %c1 = arith.constant 1 : index
    %140 = memref.load %arg5[%c1] : memref<18xf32, #tpu.memory_space<smem>>
    %141 = vector.broadcast %140 : f32 to vector<56x128xf32>
    %142 = arith.mulf %141, %68 : vector<56x128xf32>
    %143 = arith.addf %139, %142 : vector<56x128xf32>
    %c2 = arith.constant 2 : index
    %144 = memref.load %arg5[%c2] : memref<18xf32, #tpu.memory_space<smem>>
    %145 = vector.broadcast %144 : f32 to vector<56x128xf32>
    %146 = arith.mulf %145, %85 : vector<56x128xf32>
    %147 = arith.addf %143, %146 : vector<56x128xf32>
    %c3 = arith.constant 3 : index
    %148 = memref.load %arg5[%c3] : memref<18xf32, #tpu.memory_space<smem>>
    %149 = vector.broadcast %148 : f32 to vector<56x128xf32>
    %150 = arith.mulf %149, %102 : vector<56x128xf32>
    %151 = arith.addf %147, %150 : vector<56x128xf32>
    %c4 = arith.constant 4 : index
    %152 = memref.load %arg5[%c4] : memref<18xf32, #tpu.memory_space<smem>>
    %153 = vector.broadcast %152 : f32 to vector<56x128xf32>
    %154 = arith.mulf %153, %119 : vector<56x128xf32>
    %155 = arith.addf %151, %154 : vector<56x128xf32>
    %c5 = arith.constant 5 : index
    %156 = memref.load %arg5[%c5] : memref<18xf32, #tpu.memory_space<smem>>
    %157 = vector.broadcast %156 : f32 to vector<56x128xf32>
    %158 = arith.mulf %157, %136 : vector<56x128xf32>
    %159 = arith.addf %155, %158 : vector<56x128xf32>
    %160 = arith.subf %30, %159 : vector<56x128xf32>
    %161 = arith.mulf %160, %160 : vector<56x128xf32>
    %cst_40 = arith.constant dense<0.000000e+00> : vector<56xf32>
    %162 = vector.multi_reduction <add>, %161, %cst_40 [1] : vector<56x128xf32> to vector<56xf32>
    %163 = vector.shape_cast %162 : vector<56xf32> to vector<56x1xf32>
    %cst_41 = arith.constant dense<0.000000e+00> : vector<1xf32>
    %164 = vector.multi_reduction <add>, %163, %cst_41 [0] : vector<56x1xf32> to vector<1xf32>
    %165 = vector.shape_cast %164 : vector<1xf32> to vector<1x1xf32>
    %cst_42 = arith.constant 0.000000e+00 : f32
    %166 = vector.broadcast %cst_42 : f32 to vector<1x1xf32>
    %167 = arith.subf %166, %165 : vector<1x1xf32>
    %cst_43 = arith.constant 0.0178571437 : f32
    %168 = vector.broadcast %cst_43 : f32 to vector<1x1xf32>
    %169 = arith.mulf %167, %168 : vector<1x1xf32>
    %c6 = arith.constant 6 : index
    %170 = memref.load %arg5[%c6] : memref<18xf32, #tpu.memory_space<smem>>
    %171 = vector.broadcast %170 : f32 to vector<56x128xf32>
    %172 = arith.mulf %171, %51 : vector<56x128xf32>
    %c7 = arith.constant 7 : index
    %173 = memref.load %arg5[%c7] : memref<18xf32, #tpu.memory_space<smem>>
    %174 = vector.broadcast %173 : f32 to vector<56x128xf32>
    %175 = arith.mulf %174, %68 : vector<56x128xf32>
    %176 = arith.addf %172, %175 : vector<56x128xf32>
    %c8 = arith.constant 8 : index
    %177 = memref.load %arg5[%c8] : memref<18xf32, #tpu.memory_space<smem>>
    %178 = vector.broadcast %177 : f32 to vector<56x128xf32>
    %179 = arith.mulf %178, %85 : vector<56x128xf32>
    %180 = arith.addf %176, %179 : vector<56x128xf32>
    %c9 = arith.constant 9 : index
    %181 = memref.load %arg5[%c9] : memref<18xf32, #tpu.memory_space<smem>>
    %182 = vector.broadcast %181 : f32 to vector<56x128xf32>
    %183 = arith.mulf %182, %102 : vector<56x128xf32>
    %184 = arith.addf %180, %183 : vector<56x128xf32>
    %c10 = arith.constant 10 : index
    %185 = memref.load %arg5[%c10] : memref<18xf32, #tpu.memory_space<smem>>
    %186 = vector.broadcast %185 : f32 to vector<56x128xf32>
    %187 = arith.mulf %186, %119 : vector<56x128xf32>
    %188 = arith.addf %184, %187 : vector<56x128xf32>
    %c11 = arith.constant 11 : index
    %189 = memref.load %arg5[%c11] : memref<18xf32, #tpu.memory_space<smem>>
    %190 = vector.broadcast %189 : f32 to vector<56x128xf32>
    %191 = arith.mulf %190, %136 : vector<56x128xf32>
    %192 = arith.addf %188, %191 : vector<56x128xf32>
    %193 = arith.subf %30, %192 : vector<56x128xf32>
    %194 = arith.mulf %193, %193 : vector<56x128xf32>
    %cst_44 = arith.constant dense<0.000000e+00> : vector<56xf32>
    %195 = vector.multi_reduction <add>, %194, %cst_44 [1] : vector<56x128xf32> to vector<56xf32>
    %196 = vector.shape_cast %195 : vector<56xf32> to vector<56x1xf32>
    %cst_45 = arith.constant dense<0.000000e+00> : vector<1xf32>
    %197 = vector.multi_reduction <add>, %196, %cst_45 [0] : vector<56x1xf32> to vector<1xf32>
    %198 = vector.shape_cast %197 : vector<1xf32> to vector<1x1xf32>
    %cst_46 = arith.constant 0.000000e+00 : f32
    %199 = vector.broadcast %cst_46 : f32 to vector<1x1xf32>
    %200 = arith.subf %199, %198 : vector<1x1xf32>
    %cst_47 = arith.constant 0.0178571437 : f32
    %201 = vector.broadcast %cst_47 : f32 to vector<1x1xf32>
    %202 = arith.mulf %200, %201 : vector<1x1xf32>
    %c12 = arith.constant 12 : index
    %203 = memref.load %arg5[%c12] : memref<18xf32, #tpu.memory_space<smem>>
    %204 = vector.broadcast %203 : f32 to vector<56x128xf32>
    %205 = arith.mulf %204, %51 : vector<56x128xf32>
    %c13 = arith.constant 13 : index
    %206 = memref.load %arg5[%c13] : memref<18xf32, #tpu.memory_space<smem>>
    %207 = vector.broadcast %206 : f32 to vector<56x128xf32>
    %208 = arith.mulf %207, %68 : vector<56x128xf32>
    %209 = arith.addf %205, %208 : vector<56x128xf32>
    %c14 = arith.constant 14 : index
    %210 = memref.load %arg5[%c14] : memref<18xf32, #tpu.memory_space<smem>>
    %211 = vector.broadcast %210 : f32 to vector<56x128xf32>
    %212 = arith.mulf %211, %85 : vector<56x128xf32>
    %213 = arith.addf %209, %212 : vector<56x128xf32>
    %c15 = arith.constant 15 : index
    %214 = memref.load %arg5[%c15] : memref<18xf32, #tpu.memory_space<smem>>
    %215 = vector.broadcast %214 : f32 to vector<56x128xf32>
    %216 = arith.mulf %215, %102 : vector<56x128xf32>
    %217 = arith.addf %213, %216 : vector<56x128xf32>
    %c16 = arith.constant 16 : index
    %218 = memref.load %arg5[%c16] : memref<18xf32, #tpu.memory_space<smem>>
    %219 = vector.broadcast %218 : f32 to vector<56x128xf32>
    %220 = arith.mulf %219, %119 : vector<56x128xf32>
    %221 = arith.addf %217, %220 : vector<56x128xf32>
    %c17 = arith.constant 17 : index
    %222 = memref.load %arg5[%c17] : memref<18xf32, #tpu.memory_space<smem>>
    %223 = vector.broadcast %222 : f32 to vector<56x128xf32>
    %224 = arith.mulf %223, %136 : vector<56x128xf32>
    %225 = arith.addf %221, %224 : vector<56x128xf32>
    %226 = arith.subf %30, %225 : vector<56x128xf32>
    %227 = arith.mulf %226, %226 : vector<56x128xf32>
    %cst_48 = arith.constant dense<0.000000e+00> : vector<56xf32>
    %228 = vector.multi_reduction <add>, %227, %cst_48 [1] : vector<56x128xf32> to vector<56xf32>
    %229 = vector.shape_cast %228 : vector<56xf32> to vector<56x1xf32>
    %cst_49 = arith.constant dense<0.000000e+00> : vector<1xf32>
    %230 = vector.multi_reduction <add>, %229, %cst_49 [0] : vector<56x1xf32> to vector<1xf32>
    %231 = vector.shape_cast %230 : vector<1xf32> to vector<1x1xf32>
    %cst_50 = arith.constant 0.000000e+00 : f32
    %232 = vector.broadcast %cst_50 : f32 to vector<1x1xf32>
    %233 = arith.subf %232, %231 : vector<1x1xf32>
    %cst_51 = arith.constant 0.0178571437 : f32
    %234 = vector.broadcast %cst_51 : f32 to vector<1x1xf32>
    %235 = arith.mulf %233, %234 : vector<1x1xf32>
    %236 = tpu.concatenate %169, %202, %235 in 1 : vector<1x1xf32>, vector<1x1xf32>, vector<1x1xf32> -> vector<1x3xf32>
    %c0_52 = arith.constant 0 : index
    %c0_53 = arith.constant 0 : index
    %237 = vector.load %arg6[%c0_52, %c0_53] : memref<1x3xf32, #tpu.memory_space<vmem>>, vector<1x3xf32>
    tpu.vector_store %arg6[%c0_52, %c0_53], %236 {strides = array<i32>} : memref<1x3xf32, #tpu.memory_space<vmem>>, vector<1x3xf32>,
    %c0_i32 = arith.constant 0 : i32
    %238 = vector.broadcast %c0_i32 : i32 to vector<1x1xi32>
    %239 = arith.cmpf ogt, %202, %169 : vector<1x1xf32>
    %240 = arith.select %239, %202, %169 : vector<1x1xi1>, vector<1x1xf32>
    %c1_i32 = arith.constant 1 : i32
    %241 = vector.broadcast %c1_i32 : i32 to vector<1x1xi32>
    %242 = arith.select %239, %241, %238 : vector<1x1xi1>, vector<1x1xi32>
    %243 = arith.cmpf ogt, %235, %240 : vector<1x1xf32>
    %c2_i32 = arith.constant 2 : i32
    %244 = vector.broadcast %c2_i32 : i32 to vector<1x1xi32>
    %245 = arith.select %243, %244, %242 : vector<1x1xi1>, vector<1x1xi32>
    %c1_i32_54 = arith.constant 1 : i32
    %246 = vector.broadcast %c1_i32_54 : i32 to vector<1x1xi32>
    %247 = arith.cmpi eq, %245, %246 : vector<1x1xi32>
    %248 = vector.shape_cast %247 : vector<1x1xi1> to vector<1x1xi1>
    %249 = vector.broadcast %248 : vector<1x1xi1> to vector<56x128xi1>
    %250 = arith.select %249, %193, %160 : vector<56x128xi1>, vector<56x128xf32>
    %c2_i32_55 = arith.constant 2 : i32
    %251 = vector.broadcast %c2_i32_55 : i32 to vector<1x1xi32>
    %252 = arith.cmpi eq, %245, %251 : vector<1x1xi32>
    %253 = vector.shape_cast %252 : vector<1x1xi1> to vector<1x1xi1>
    %254 = vector.broadcast %253 : vector<1x1xi1> to vector<56x128xi1>
    %255 = arith.select %254, %226, %250 : vector<56x128xi1>, vector<56x128xf32>
    %c0_56 = arith.constant 0 : index
    %c0_57 = arith.constant 0 : index
    %256 = vector.load %arg7[%c0_56, %c0_57] : memref<56x128xf32, #tpu.memory_space<vmem>>, vector<56x128xf32>
    tpu.vector_store %arg7[%c0_56, %c0_57], %255 {strides = array<i32>} : memref<56x128xf32, #tpu.memory_space<vmem>>, vector<56x128xf32>,
    return
  }
}

</mosaic_0001>

<bundles_post_ra>
// kernel: tpu_custom_call.1
= control target key start
LH: loop header
LB: loop body
LE: loop exit
PB: predicated region body
PF: predicated region fallthrough
CT: control target
= control target key end

     0   :  { %13 = vsyncpa [#allocation3], 0  ;;  %s6088_s0 = inlined_call_operand.hbm [shape: bf16[392,256], index: 0, kind: input, shape index: {}]   ;;  %s6089_s1 = inlined_call_operand.hbm [shape: bf16[256,256], index: 1, kind: input, shape index: {}]   ;;  %s6090_s2 = inlined_call_operand.vmem [shape: f32[1,256], index: 2, kind: input, shape index: {}]   ;;  %s6091_s3 = inlined_call_operand.vmem [shape: f32[1,128], index: 3, kind: input, shape index: {}]   ;;  %s6092_s4 = inlined_call_operand.vmem [shape: f32[1,128], index: 4, kind: input, shape index: {}]   ;;  %s6093_s5 = inlined_call_operand.vmem [shape: f32[18], index: 5, kind: input, shape index: {}]   ;;  %s6094_s6 = inlined_call_operand.hbm [shape: f32[1,3], index: 6, kind: output, shape index: {0}]   ;;  %s6095_s7 = inlined_call_operand.hbm [shape: f32[56,128], index: 7, kind: output, shape index: {1}]  }
   0x1   :  { %14 = vsyncpa [#allocation7], 0 }
   0x2   :  { %15 = vsyncpa [#allocation5], 0 }
   0x3   :  { %16 = vsyncpa [#allocation4], 0 }
   0x4   :  { %17 = vsyncpa [#allocation11], 0  ;;  %s4300_s24 = smov [#allocation2]   ;;  %s4190_s28 = scalar_lea.hbm %s6088_s0, 6272 }
   0x5   :  { %s23_s25 = sshll.u32 %s4300_s24, 4  ;;  %p4191_p0 = scmp.ne.s32.totalorder %s6088_s0, %s4190_s28  ;;  %s24_s25 = int_to_ptr.vmem [resolvable:$true] %s23_s25 }
   0x6   :  { %p4194_p1 = scmp.lt.u32.totalorder %s4190_s28, %s6088_s0 }
   0x8   :  { %p4196_p2 = pnand %p4194_p1, %p4191_p0 }
   0xa   :  { %4199 = shalt.err (!%p4196_p2)
}
   0xb   :  { %s4200_s10 = scalar_lea.vmem %s24_s25, 6272  ;;  %p4205_p4 = scmp.lt.s32.totalorder %s24_s25, %s24_s25 }
   0xc   :  { %p4201_p3 = scmp.ne.s32.totalorder %s24_s25, %s4200_s10  ;;  %p4206_p5 = scmp.lt.s32.totalorder %s4200_s10, %s4200_s10 }
   0xe   :  { %p4207_p6 = por %p4206_p5, %p4205_p4 }
  0x10   :  { %p4208_p7 = pnand %p4207_p6, %p4201_p3 }
  0x12   :  { %4211 = shalt.err (!%p4208_p7)
}
  0x13   :  { %s4301_s11 = smov 128   ;;  %s4302_s12 = smov 8  }
  0x14   :  { %29 = dma.hbm_to_vmem [thread:$0]  %s6088_s0, 6272, %s24_s25, [#allocation3], %s4301_s11, %s4301_s11, %s4302_s12  }
  0x15   :  { %s4303_s15 = smov [#allocation6]   ;;  %s54_s19 = sshll.u32 %s6093_s5, 4  ;;  %s55_s19 = int_to_ptr.vmem [resolvable:$true] %s54_s19 }
  0x16   :  { %s35_s16 = sshll.u32 %s4303_s15, 4  ;;  %s4212_s22 = scalar_lea.hbm %s6089_s1, 4096  ;;  %s36_s16 = int_to_ptr.vmem [resolvable:$true] %s35_s16 }
  0x17   :  { %p4213_p8 = scmp.ne.s32.totalorder %s6089_s1, %s4212_s22  ;;  %p4216_p9 = scmp.lt.u32.totalorder %s4212_s22, %s6089_s1 }
  0x19   :  { %p4218_p10 = pnand %p4216_p9, %p4213_p8 }
  0x1b   :  { %4221 = shalt.err (!%p4218_p10)
}
  0x1c   :  { %s4222_s0 = scalar_lea.vmem %s36_s16, 4096  ;;  %p4227_p12 = scmp.lt.s32.totalorder %s36_s16, %s36_s16 }
  0x1d   :  { %p4223_p11 = scmp.ne.s32.totalorder %s36_s16, %s4222_s0  ;;  %p4228_p13 = scmp.lt.s32.totalorder %s4222_s0, %s4222_s0 }
  0x1f   :  { %p4229_p0 = por %p4228_p13, %p4227_p12 }
  0x21   :  { %p4230_p1 = pnand %p4229_p0, %p4223_p11 }
  0x23   :  { %4233 = shalt.err (!%p4230_p1)
}
  0x24   :  { %41 = dma.hbm_to_vmem [thread:$0]  %s6089_s1, 4096, %s36_s16, [#allocation7], %s4301_s11, %s4301_s11, %s4302_s12  }
  0x25   :  { %s4234_s28 = scalar_lea.vmem %s55_s19, 16  ;;  %p4239_p3 = scmp.lt.s32.totalorder %s55_s19, %s55_s19 }
  0x26   :  { %p4235_p2 = scmp.ne.s32.totalorder %s55_s19, %s4234_s28  ;;  %p4240_p4 = scmp.lt.s32.totalorder %s4234_s28, %s4234_s28 }
  0x28   :  { %p4241_p5 = por %p4240_p4, %p4239_p3 }
  0x2a   :  { %p4242_p6 = pnand %p4241_p5, %p4235_p2 }
  0x2c   :  { %4245 = shalt.err (!%p4242_p6)
}
  0x2d   :  { %s4304_s29 = smov [#allocation8]  }
  0x2e   :  { %57 = dma.vmem_to_smem %s55_s19, 16, %s4304_s29, [#allocation5]  }
  0x2f   :  { %4290 = dma.done.wait [#allocation3], 6272  }
  0x30   :  { %4291 = vsyncadd [#allocation3], 4294961024 }
  0x31   :  { %4292 = dma.done.wait [#allocation7], 4096  }
  0x32   :  { %4293 = vsyncadd [#allocation7], 4294963200 }
  0x33   :  { %4294 = dma.done.wait [#allocation5], 16  }
  0x34   :  { %4295 = vsyncadd [#allocation5], 4294967280 }
  0x35   :  { %67 = sfence }
  0x36   :  { %v3798_v0 = vld [vmem:[#allocation6 + $0x4] ss:$8 sps:$4 sm:$0xff]   ;;  %v3800_v1 = vld [vmem:[#allocation6] ss:$8 sps:$4 sm:$0xff]   ;;  %v3801_v2 = vld [vmem:[#allocation6 + $0x14] ss:$8 sps:$4 sm:$0xff]   ;;  %v152_v53 = vlaneseq }
  0x37   :  { %569 = vmatprep.subr.bf16.mxu0 %v3798_v0  ;;  %v3803_v3 = vld [vmem:[#allocation6 + $0x10] ss:$8 sps:$4 sm:$0xff]   ;;  %v3804_v4 = vld [vmem:[#allocation6 + $0x24] ss:$8 sps:$4 sm:$0xff]   ;;  %v3806_v5 = vld [vmem:[#allocation6 + $0x20] ss:$8 sps:$4 sm:$0xff]  }
  0x38   :  { %570 = vmatpush1.bf16.msra.mxu0 %v3800_v1  ;;  %v3807_v6 = vld [vmem:[#allocation6 + $0x34] ss:$8 sps:$4 sm:$0xff]   ;;  %v3809_v7 = vld [vmem:[#allocation6 + $0x30] ss:$8 sps:$4 sm:$0xff]   ;;  %v3810_v8 = vld [vmem:[#allocation6 + $0x44] ss:$8 sps:$4 sm:$0xff]  }
  0x39   :  { %571 = vmatprep.subr.bf16.mxu0 %v3801_v2  ;;  %v3812_v9 = vld [vmem:[#allocation6 + $0x40] ss:$8 sps:$4 sm:$0xff]   ;;  %v3813_v10 = vld [vmem:[#allocation6 + $0x54] ss:$8 sps:$4 sm:$0xff]   ;;  %v3815_v11 = vld [vmem:[#allocation6 + $0x50] ss:$8 sps:$4 sm:$0xff]  }
  0x3a   :  { %v3816_v12 = vld [vmem:[#allocation6 + $0x64] ss:$8 sps:$4 sm:$0xff]   ;;  %v3818_v14 = vld [vmem:[#allocation6 + $0x60] ss:$8 sps:$4 sm:$0xff]   ;;  %v3819_v15 = vld [vmem:[#allocation6 + $0x74] ss:$8 sps:$4 sm:$0xff]  }
  0x3b   :  { %v3848_v13 = vld [vmem:[#allocation2 + $0x4] ss:$8 sps:$4 sm:$0xff]   ;;  %v3821_v16 = vld [vmem:[#allocation6 + $0x70] ss:$8 sps:$4 sm:$0xff]   ;;  %v3824_v18 = vld [vmem:[#allocation6 + $0x80] ss:$8 sps:$4 sm:$0xff]  }
  0x3c   :  { %572 = vmatpush1.bf16.msra.mxu0 %v3803_v3  ;;  %601 = vmatprep.mubr.bf16.mxu0 %v3848_v13  ;;  %v3822_v17 = vld [vmem:[#allocation6 + $0x84] ss:$8 sps:$4 sm:$0xff]   ;;  %v3825_v19 = vld [vmem:[#allocation6 + $0x94] ss:$8 sps:$4 sm:$0xff]   ;;  %v3827_v20 = vld [vmem:[#allocation6 + $0x90] ss:$8 sps:$4 sm:$0xff]  }
  0x3d   :  { %573 = vmatprep.subr.bf16.mxu0 %v3804_v4  ;;  %v3828_v21 = vld [vmem:[#allocation6 + $0xa4] ss:$8 sps:$4 sm:$0xff]   ;;  %v3830_v22 = vld [vmem:[#allocation6 + $0xa0] ss:$8 sps:$4 sm:$0xff]   ;;  %v3831_v23 = vld [vmem:[#allocation6 + $0xb4] ss:$8 sps:$4 sm:$0xff]  }
  0x3e   :  { %v3833_v24 = vld [vmem:[#allocation6 + $0xb0] ss:$8 sps:$4 sm:$0xff]   ;;  %v3834_v25 = vld [vmem:[#allocation6 + $0xc4] ss:$8 sps:$4 sm:$0xff]   ;;  %v3836_v26 = vld [vmem:[#allocation6 + $0xc0] ss:$8 sps:$4 sm:$0xff]  }
  0x3f   :  { %v3837_v27 = vld [vmem:[#allocation6 + $0xd4] ss:$8 sps:$4 sm:$0xff]   ;;  %v3839_v28 = vld [vmem:[#allocation6 + $0xd0] ss:$8 sps:$4 sm:$0xff]   ;;  %v3840_v29 = vld [vmem:[#allocation6 + $0xe4] ss:$8 sps:$4 sm:$0xff]  }
  0x40   :  { %574 = vmatpush1.bf16.msra.mxu0 %v3806_v5  ;;  %v3842_v30 = vld [vmem:[#allocation6 + $0xe0] ss:$8 sps:$4 sm:$0xff]   ;;  %v3843_v31 = vld [vmem:[#allocation6 + $0xf4] ss:$8 sps:$4 sm:$0xff]   ;;  %v3845_v32 = vld [vmem:[#allocation6 + $0xf0] ss:$8 sps:$4 sm:$0xff]  }
  0x41   :  { %575 = vmatprep.subr.bf16.mxu0 %v3807_v6  ;;  %v3846_v33 = vld [vmem:[#allocation2] ss:$8 sps:$4 sm:$0xff]   ;;  %v3849_v34 = vld [vmem:[#allocation2 + $0x14] ss:$8 sps:$4 sm:$0xff]   ;;  %v3851_v35 = vld [vmem:[#allocation2 + $0x10] ss:$8 sps:$4 sm:$0xff]  }
  0x42   :  { %v3852_v36 = vld [vmem:[#allocation2 + $0x24] ss:$8 sps:$4 sm:$0xff]   ;;  %v3854_v37 = vld [vmem:[#allocation2 + $0x20] ss:$8 sps:$4 sm:$0xff]   ;;  %v3855_v38 = vld [vmem:[#allocation2 + $0x34] ss:$8 sps:$4 sm:$0xff]  }
  0x43   :  { %v3857_v39 = vld [vmem:[#allocation2 + $0x30] ss:$8 sps:$4 sm:$0xff]   ;;  %v3858_v40 = vld [vmem:[#allocation2 + $0x44] ss:$8 sps:$4 sm:$0xff]   ;;  %v3860_v41 = vld [vmem:[#allocation2 + $0x40] ss:$8 sps:$4 sm:$0xff]  }
  0x44   :  { %576 = vmatpush1.bf16.msra.mxu0 %v3809_v7  ;;  %v3861_v42 = vld [vmem:[#allocation2 + $0x54] ss:$8 sps:$4 sm:$0xff]   ;;  %v3863_v43 = vld [vmem:[#allocation2 + $0x50] ss:$8 sps:$4 sm:$0xff]   ;;  %v3864_v44 = vld [vmem:[#allocation2 + $0x64] ss:$8 sps:$4 sm:$0xff]  }
  0x45   :  { %577 = vmatprep.subr.bf16.mxu0 %v3810_v8  ;;  %v3866_v45 = vld [vmem:[#allocation2 + $0x60] ss:$8 sps:$4 sm:$0xff]   ;;  %v3867_v46 = vld [vmem:[#allocation2 + $0x74] ss:$8 sps:$4 sm:$0xff]   ;;  %v3869_v47 = vld [vmem:[#allocation2 + $0x70] ss:$8 sps:$4 sm:$0xff]  }
  0x46   :  { %v3870_v48 = vld [vmem:[#allocation2 + $0x84] ss:$8 sps:$4 sm:$0xff]   ;;  %v3872_v49 = vld [vmem:[#allocation2 + $0x80] ss:$8 sps:$4 sm:$0xff]   ;;  %v3873_v50 = vld [vmem:[#allocation2 + $0x94] ss:$8 sps:$4 sm:$0xff]  }
  0x47   :  { %v3875_v51 = vld [vmem:[#allocation2 + $0x90] ss:$8 sps:$4 sm:$0xff]   ;;  %v3876_v52 = vld [vmem:[#allocation2 + $0xa4] ss:$8 sps:$4 sm:$0xff]   ;;  %v3878_v54 = vld [vmem:[#allocation2 + $0xa0] ss:$8 sps:$4 sm:$0xff]  }
  0x48   :  { %578 = vmatpush1.bf16.msra.mxu0 %v3812_v9  ;;  %v3879_v55 = vld [vmem:[#allocation2 + $0xb4] ss:$8 sps:$4 sm:$0xff]   ;;  %v4381_v56 = vshrl.u32 %v152_v53, 7  ;;  %v150_v57 = vld [vmem:[%s6090_s2] sm:$0x3]  ;;  %vm1679_vm0 = vcmask 1043456  }
  0x49   :  { %579 = vmatprep.subr.bf16.mxu0 %v3813_v10  ;;  %v3881_v60 = vld [vmem:[#allocation2 + $0xb0] ss:$8 sps:$4 sm:$0xff]   ;;  %v3882_v61 = vld [vmem:[#allocation2 + $0xc4] ss:$8 sps:$4 sm:$0xff]   ;;  %v3884_v62 = vld [vmem:[#allocation2 + $0xc0] ss:$8 sps:$4 sm:$0xff]  }
  0x4a   :  { %v158_v58 = vsub.s32 1, %v4381_v56  ;;  %v3885_v63 = vld [vmem:[#allocation2 + $0xd4] ss:$8 sps:$4 sm:$0xff]   ;;  %v3887_v0 = vld [vmem:[#allocation2 + $0xd0] ss:$8 sps:$4 sm:$0xff]   ;;  %vm1585_vm1 = vcmask 457728  }
  0x4b   :  { %v3888_v1 = vld [vmem:[#allocation2 + $0xe4] ss:$8 sps:$4 sm:$0xff]   ;;  %v3890_v2 = vld [vmem:[#allocation2 + $0xe0] ss:$8 sps:$4 sm:$0xff]   ;;  %v3891_v3 = vld [vmem:[#allocation2 + $0xf4] ss:$8 sps:$4 sm:$0xff]  }
  0x4c   :  { %580 = vmatpush1.bf16.msra.mxu0 %v3815_v11  ;;  %v4387_v59 = vrot.slane %v150_v57, %v158_v58  ;;  %v3893_v4 = vld [vmem:[#allocation2 + $0xf0] ss:$8 sps:$4 sm:$0xff]   ;;  %v3894_v5 = vld [vmem:[#allocation2 + $0x104] ss:$8 sps:$4 sm:$0xff]   ;;  %v3896_v6 = vld [vmem:[#allocation2 + $0x100] ss:$8 sps:$4 sm:$0xff]  }
  0x4d   :  { %581 = vmatprep.subr.bf16.mxu0 %v3816_v12  ;;  %v3897_v7 = vld [vmem:[#allocation2 + $0x114] ss:$8 sps:$4 sm:$0xff]   ;;  %v3899_v8 = vld [vmem:[#allocation2 + $0x110] ss:$8 sps:$4 sm:$0xff]   ;;  %v3900_v9 = vld [vmem:[#allocation2 + $0x124] ss:$8 sps:$4 sm:$0xff]  }
  0x4e   :  { %v3902_v10 = vld [vmem:[#allocation2 + $0x120] ss:$8 sps:$4 sm:$0xff]   ;;  %v3903_v11 = vld [vmem:[#allocation2 + $0x134] ss:$8 sps:$4 sm:$0xff]   ;;  %v3905_v12 = vld [vmem:[#allocation2 + $0x130] ss:$8 sps:$4 sm:$0xff]  }
  0x4f   :  { %v3906_v13 = vld [vmem:[#allocation2 + $0x144] ss:$8 sps:$4 sm:$0xff]   ;;  %s2907_s17 = sld [smem:[#allocation8]]  ;;  %s3484_s18 = sld [smem:[#allocation8 + $0x6]]  ;;  %vm3300_vm2 = vcmask 7168   ;;  %vm3302_vm3 = vcmask 15360  }
  0x50   :  { %582 = vmatpush1.bf16.msra.mxu0 %v3818_v14  ;;  %v3908_v14 = vld [vmem:[#allocation2 + $0x140] ss:$8 sps:$4 sm:$0xff]   ;;  %s3490_s19 = sld [smem:[#allocation8 + $0xc]]  ;;  %s3479_s20 = sld [smem:[#allocation8 + $0x1]]  ;;  %vm3304_vm4 = vcmask 16384  }
  0x51   :  { %583 = vmatprep.subr.bf16.mxu0 %v3819_v15  ;;  %v3909_v15 = vld [vmem:[#allocation2 + $0x154] ss:$8 sps:$4 sm:$0xff]   ;;  %s3485_s21 = sld [smem:[#allocation8 + $0x7]]  ;;  %s3491_s22 = sld [smem:[#allocation8 + $0xd]] }
  0x52   :  { %s3480_s23 = sld [smem:[#allocation8 + $0x2]]  ;;  %s3486_s24 = sld [smem:[#allocation8 + $0x8]] }
  0x53   :  { %s3492_s26 = sld [smem:[#allocation8 + $0xe]]  ;;  %s3487_s25 = sld [smem:[#allocation8 + $0x9]] }
  0x54   :  { %584 = vmatpush1.bf16.msra.mxu0 %v3821_v16  ;;  %v3911_v16 = vld [vmem:[#allocation2 + $0x150] ss:$8 sps:$4 sm:$0xff]   ;;  %s3493_s28 = sld [smem:[#allocation8 + $0xf]]  ;;  %s3482_s29 = sld [smem:[#allocation8 + $0x4]] }
  0x55   :  { %585 = vmatprep.subr.bf16.mxu0 %v3822_v17  ;;  %v3912_v17 = vld [vmem:[#allocation2 + $0x164] ss:$8 sps:$4 sm:$0xff]   ;;  %s3488_s1 = sld [smem:[#allocation8 + $0xa]]  ;;  %s3494_s30 = sld [smem:[#allocation8 + $0x10]] }
  0x56   :  { %s3483_s2 = sld [smem:[#allocation8 + $0x5]]  ;;  %s3489_s8 = sld [smem:[#allocation8 + $0xb]] }
  0x57   :  { %s3495_s9 = sld [smem:[#allocation8 + $0x11]]  ;;  %s4305_s10 = smov [#allocation9]  }
  0x58   :  { %586 = vmatpush1.bf16.msra.mxu0 %v3824_v18  ;;  %v3914_v18 = vld [vmem:[#allocation2 + $0x160] ss:$8 sps:$4 sm:$0xff]   ;;  %s3344_s13 = sshll.u32 %s4305_s10, 4  ;;  %s4307_s14 = smov [#allocation10]   ;;  %s3345_s13 = int_to_ptr.vmem [resolvable:$true] %s3344_s13 }
  0x59   :  { %587 = vmatprep.subr.bf16.mxu0 %v3825_v19  ;;  %v3915_v19 = vld [vmem:[#allocation2 + $0x174] ss:$8 sps:$4 sm:$0xff]   ;;  %s3353_s15 = sshll.u32 %s4307_s14, 4  ;;  %s4246_s16 = scalar_lea.vmem %s3345_s13, 16  ;;  %s3354_s15 = int_to_ptr.vmem [resolvable:$true] %s3353_s15 }
  0x5a   :  { %p4247_p7 = scmp.ne.s32.totalorder %s3345_s13, %s4246_s16  ;;  %p4251_p8 = scmp.lt.s32.totalorder %s3345_s13, %s3345_s13 }
  0x5c   :  { %588 = vmatpush1.bf16.msra.mxu0 %v3827_v20  ;;  %v117_v20 = vld [vmem:[#allocation2 + $0x180] sm:$0xff] }
  0x5d   :  { %589 = vmatprep.subr.bf16.mxu0 %v3828_v21  ;;  %v3917_v21 = vld [vmem:[#allocation2 + $0x170] ss:$8 sps:$4 sm:$0xff]  }
  0x60   :  { %590 = vmatpush1.bf16.msra.mxu0 %v3830_v22  ;;  %v3420_v22 = vcombine.high %v117_v20, %v117_v20 }
  0x61   :  { %591 = vmatprep.subr.bf16.mxu0 %v3831_v23  ;;  %v3419_v23 = vcombine.low %v117_v20, %v117_v20 }
  0x64   :  { %592 = vmatpush1.bf16.msra.mxu0 %v3833_v24  ;;  %v154_v24 = vsub.s32 0, %v4381_v56 }
  0x65   :  { %593 = vmatprep.subr.bf16.mxu0 %v3834_v25 }
  0x66   :  { %v4390_v25 = vrot.slane %v150_v57, %v154_v24 }
  0x68   :  { %594 = vmatpush1.bf16.msra.mxu0 %v3836_v26 }
  0x69   :  { %595 = vmatprep.subr.bf16.mxu0 %v3837_v27 }
  0x6c   :  { %596 = vmatpush1.bf16.msra.mxu0 %v3839_v28 }
  0x6d   :  { %597 = vmatprep.subr.bf16.mxu0 %v3840_v29 }
  0x70   :  { %598 = vmatpush1.bf16.msra.mxu0 %v3842_v30 }
  0x71   :  { %599 = vmatprep.subr.bf16.mxu0 %v3843_v31 }
  0x74   :  { %600 = vmatpush1.bf16.msra.mxu0 %v3845_v32 }
  0x77   :  { %602 = vmatmul.mubr.bf16.vlgmr.msra.gmra.mrb[0].mxu0 %v3846_v33 }
  0x78   :  { %611 = vmatprep.mubr.bf16.mxu0 %v3849_v34 }
  0x7f   :  { %612 = vmatmul.mubr.bf16.gmra.mrb[4].mxu0 %v3851_v35 }
  0x80   :  { %621 = vmatprep.mubr.bf16.mxu0 %v3852_v36 }
  0x87   :  { %622 = vmatmul.mubr.bf16.gmra.mrb[8].mxu0 %v3854_v37 }
  0x88   :  { %631 = vmatprep.mubr.bf16.mxu0 %v3855_v38 }
  0x8f   :  { %632 = vmatmul.mubr.bf16.gmra.mrb[12].mxu0 %v3857_v39 }
  0x90   :  { %641 = vmatprep.mubr.bf16.mxu0 %v3858_v40 }
  0x97   :  { %642 = vmatmul.mubr.bf16.gmra.mrb[16].mxu0 %v3860_v41 }
  0x98   :  { %651 = vmatprep.mubr.bf16.mxu0 %v3861_v42 }
  0x9f   :  { %652 = vmatmul.mubr.bf16.gmra.mrb[20].mxu0 %v3863_v43 }
  0xa0   :  { %661 = vmatprep.mubr.bf16.mxu0 %v3864_v44 }
  0xa7   :  { %662 = vmatmul.mubr.bf16.gmra.mrb[24].mxu0 %v3866_v45 }
  0xa8   :  { %671 = vmatprep.mubr.bf16.mxu0 %v3867_v46 }
  0xaf   :  { %672 = vmatmul.mubr.bf16.gmra.mrb[28].mxu0 %v3869_v47 }
  0xb0   :  { %681 = vmatprep.mubr.bf16.mxu0 %v3870_v48 }
  0xb7   :  { %682 = vmatmul.mubr.bf16.gmra.mrb[32].mxu0 %v3872_v49 }
  0xb8   :  { %691 = vmatprep.mubr.bf16.mxu0 %v3873_v50 }
  0xbf   :  { %692 = vmatmul.mubr.bf16.gmra.mrb[36].mxu0 %v3875_v51 }
  0xc0   :  { %701 = vmatprep.mubr.bf16.mxu0 %v3876_v52 }
  0xc7   :  { %702 = vmatmul.mubr.bf16.gmra.mrb[40].mxu0 %v3878_v54 }
  0xc8   :  { %711 = vmatprep.mubr.bf16.mxu0 %v3879_v55 }
  0xcf   :  { %712 = vmatmul.mubr.bf16.gmra.mrb[44].mxu0 %v3881_v60 }
  0xd0   :  { %721 = vmatprep.mubr.bf16.mxu0 %v3882_v61 }
  0xd7   :  { %722 = vmatmul.mubr.bf16.gmra.mrb[48].mxu0 %v3884_v62 }
  0xd8   :  { %731 = vmatprep.mubr.bf16.mxu0 %v3885_v63 }
  0xdf   :  { %732 = vmatmul.mubr.bf16.gmra.mrb[52].mxu0 %v3887_v0 }
  0xe0   :  { %741 = vmatprep.mubr.bf16.mxu0 %v3888_v1 }
  0xe7   :  { %742 = vmatmul.mubr.bf16.gmra.mrb[56].mxu0 %v3890_v2 }
  0xe8   :  { %751 = vmatprep.mubr.bf16.mxu0 %v3891_v3 }
  0xef   :  { %752 = vmatmul.mubr.bf16.gmra.mrb[60].mxu0 %v3893_v4 }
  0xf0   :  { %761 = vmatprep.mubr.bf16.mxu0 %v3894_v5 }
  0xf7   :  { %762 = vmatmul.mubr.bf16.gmra.mrb[64].mxu0 %v3896_v6 }
  0xf8   :  { %771 = vmatprep.mubr.bf16.mxu0 %v3897_v7 }
  0xff   :  { %772 = vmatmul.mubr.bf16.gmra.mrb[68].mxu0 %v3899_v8 }
 0x100   :  { %781 = vmatprep.mubr.bf16.mxu0 %v3900_v9 }
 0x107   :  { %782 = vmatmul.mubr.bf16.gmra.mrb[72].mxu0 %v3902_v10 }
 0x108   :  { %791 = vmatprep.mubr.bf16.mxu0 %v3903_v11 }
 0x10f   :  { %792 = vmatmul.mubr.bf16.gmra.mrb[76].mxu0 %v3905_v12 }
 0x110   :  { %801 = vmatprep.mubr.bf16.mxu0 %v3906_v13 }
 0x117   :  { %802 = vmatmul.mubr.bf16.gmra.mrb[80].mxu0 %v3908_v14 }
 0x118   :  { %811 = vmatprep.mubr.bf16.mxu0 %v3909_v15 }
 0x11f   :  { %812 = vmatmul.mubr.bf16.gmra.mrb[84].mxu0 %v3911_v16 }
 0x120   :  { %821 = vmatprep.mubr.bf16.mxu0 %v3912_v17 }
 0x127   :  { %822 = vmatmul.mubr.bf16.gmra.mrb[88].mxu0 %v3914_v18 }
 0x128   :  { %831 = vmatprep.mubr.bf16.mxu0 %v3915_v19 }
 0x12f   :  { %832 = vmatmul.mubr.bf16.gmra.mrb[92].mxu0 %v3917_v21 }
 0x130   :  { %841 = vmatprep.mubr.bf16.mxu0 %v3420_v22 }
 0x137   :  { %842 = vmatmul.mubr.bf16.gmra.mrb[96].mxu0 %v3419_v23 }
 0x14a   :  { %v603_v26 = vpop.f32.mrb[0].mxu0 }
 0x14b   :  { %v4393_v27 = vadd.f32 %v603_v26, %v4390_v25  ;;  %v605_v28 = vpop.f32.mrb[1].mxu0 }
 0x14c   :  { %v607_v29 = vpop.f32.mrb[2].mxu0  ;;  %v606_v31 = vadd.f32 %v605_v28, %v4387_v59 }
 0x14d   :  { %v609_v30 = vpop.f32.mrb[3].mxu0  ;;  %850 = vadd.xlane.f32.xlu0 %v4393_v27  ;;  %v4399_v33 = vadd.f32 %v607_v29, %v4390_v25 }
 0x14e   :  { %v610_v32 = vadd.f32 %v609_v30, %v4387_v59 }
 0x150   :  { %v4401_v34 = vpack.c.bf16 %v610_v32, %v606_v31 }
 0x151   :  { %852 = vadd.xlane.f32.xlu0 %v4399_v33 }
 0x152   :  { %v613_v35 = vpop.f32.mrb[4].mxu0 }
 0x153   :  { %v4405_v36 = vadd.f32 %v613_v35, %v4390_v25  ;;  %v615_v37 = vpop.f32.mrb[5].mxu0 }
 0x154   :  { %v617_v38 = vpop.f32.mrb[6].mxu0  ;;  %v616_v40 = vadd.f32 %v615_v37, %v4387_v59 }
 0x155   :  { %v619_v39 = vpop.f32.mrb[7].mxu0  ;;  %854 = vadd.xlane.f32.xlu1 %v4405_v36  ;;  %v4411_v42 = vadd.f32 %v617_v38, %v4390_v25 }
 0x156   :  { %v620_v41 = vadd.f32 %v619_v39, %v4387_v59 }
 0x158   :  { %v4413_v43 = vpack.c.bf16 %v620_v41, %v616_v40 }
 0x159   :  { %856 = vadd.xlane.f32.xlu1 %v4411_v42 }
 0x15a   :  { %v623_v44 = vpop.f32.mrb[8].mxu0 }
 0x15b   :  { %v4417_v45 = vadd.f32 %v623_v44, %v4390_v25  ;;  %v625_v46 = vpop.f32.mrb[9].mxu0 }
 0x15c   :  { %v627_v47 = vpop.f32.mrb[10].mxu0  ;;  %v626_v50 = vadd.f32 %v625_v46, %v4387_v59 }
 0x15d   :  { %v4420_v48 = vadd.f32 %v627_v47, %v4390_v25  ;;  %v629_v49 = vpop.f32.mrb[11].mxu0  ;;  %858 = vadd.xlane.f32.xlu0 %v4417_v45 }
 0x15e   :  { %v630_v51 = vadd.f32 %v629_v49, %v4387_v59 }
 0x15f   :  { %860 = vadd.xlane.f32.xlu1 %v4420_v48 }
 0x160   :  { %v4426_v52 = vpack.c.bf16 %v630_v51, %v626_v50 }
 0x162   :  { %v633_v53 = vpop.f32.mrb[12].mxu0 }
 0x163   :  { %v4429_v54 = vadd.f32 %v633_v53, %v4390_v25  ;;  %v4431_v55 = vpop.f32.mrb[13].mxu0 }
 0x164   :  { %v4433_v56 = vpop.f32.mrb[14].mxu0 }
 0x165   :  { %v639_v57 = vpop.f32.mrb[15].mxu0  ;;  %862 = vadd.xlane.f32.xlu0 %v4429_v54 }
 0x166   :  { %v640_v61 = vadd.f32 %v639_v57, %v4387_v59 }
 0x16a   :  { %v4436_v58 = vpop.f32.mrb[16].mxu0 }
 0x16b   :  { %v645_v60 = vpop.f32.mrb[17].mxu0 }
 0x16c   :  { %v646_v62 = vadd.f32 %v645_v60, %v4387_v59  ;;  %v4440_v63 = vpop.f32.mrb[18].mxu0 }
 0x16d   :  { %v649_v0 = vpop.f32.mrb[19].mxu0 }
 0x16e   :  { %v4442_v1 = vpack.c.bf16 %v646_v62, %v640_v61  ;;  %v650_v4 = vadd.f32 %v649_v0, %v4387_v59 }
 0x172   :  { %v4444_v2 = vpop.f32.mrb[20].mxu0 }
 0x173   :  { %v655_v3 = vpop.f32.mrb[21].mxu0 }
 0x174   :  { %v656_v5 = vadd.f32 %v655_v3, %v4387_v59  ;;  %v4448_v6 = vpop.f32.mrb[22].mxu0 }
 0x175   :  { %v659_v7 = vpop.f32.mrb[23].mxu0 }
 0x176   :  { %v4450_v8 = vpack.c.bf16 %v656_v5, %v650_v4  ;;  %v660_v11 = vadd.f32 %v659_v7, %v4387_v59 }
 0x17a   :  { %v4452_v9 = vpop.f32.mrb[24].mxu0 }
 0x17b   :  { %v665_v10 = vpop.f32.mrb[25].mxu0 }
 0x17c   :  { %v666_v12 = vadd.f32 %v665_v10, %v4387_v59  ;;  %v4456_v13 = vpop.f32.mrb[26].mxu0 }
 0x17d   :  { %v4458_v14 = vpop.f32.mrb[27].mxu0 }
 0x17e   :  { %v4460_v15 = vpack.c.bf16 %v666_v12, %v660_v11 }
 0x182   :  { %v4462_v16 = vpop.f32.mrb[28].mxu0 }
 0x183   :  { %v675_v17 = vpop.f32.mrb[29].mxu0 }
 0x184   :  { %v4464_v18 = vpop.f32.mrb[30].mxu0  ;;  %v676_v20 = vadd.f32 %v675_v17, %v4387_v59 }
 0x185   :  { %v679_v19 = vpop.f32.mrb[31].mxu0 }
 0x186   :  { %v680_v21 = vadd.f32 %v679_v19, %v4387_v59 }
 0x188   :  { %v4468_v22 = vpack.c.bf16 %v680_v21, %v676_v20 }
 0x18a   :  { %v4470_v23 = vpop.f32.mrb[32].mxu0 }
 0x18b   :  { %v685_v24 = vpop.f32.mrb[33].mxu0 }
 0x18c   :  { %v4472_v26 = vpop.f32.mrb[34].mxu0  ;;  %v686_v29 = vadd.f32 %v685_v24, %v4387_v59 }
 0x18d   :  { %v689_v28 = vpop.f32.mrb[35].mxu0 }
 0x18e   :  { %v690_v30 = vadd.f32 %v689_v28, %v4387_v59 }
 0x190   :  { %v4476_v31 = vpack.c.bf16 %v690_v30, %v686_v29 }
 0x192   :  { %v4478_v32 = vpop.f32.mrb[36].mxu0 }
 0x193   :  { %v695_v35 = vpop.f32.mrb[37].mxu0 }
 0x194   :  { %v4480_v37 = vpop.f32.mrb[38].mxu0  ;;  %v696_v39 = vadd.f32 %v695_v35, %v4387_v59 }
 0x195   :  { %v699_v38 = vpop.f32.mrb[39].mxu0 }
 0x196   :  { %v700_v40 = vadd.f32 %v699_v38, %v4387_v59 }
 0x198   :  { %v4484_v41 = vpack.c.bf16 %v700_v40, %v696_v39 }
 0x19a   :  { %v4486_v44 = vpop.f32.mrb[40].mxu0 }
 0x19b   :  { %v4488_v46 = vpop.f32.mrb[41].mxu0 }
 0x19c   :  { %v4490_v47 = vpop.f32.mrb[42].mxu0 }
 0x19d   :  { %v709_v49 = vpop.f32.mrb[43].mxu0 }
 0x19e   :  { %v710_v53 = vadd.f32 %v709_v49, %v4387_v59 }
 0x1a2   :  { %v4492_v50 = vpop.f32.mrb[44].mxu0 }
 0x1a3   :  { %v715_v51 = vpop.f32.mrb[45].mxu0 }
 0x1a4   :  { %v716_v57 = vadd.f32 %v715_v51, %v4387_v59  ;;  %v4496_v60 = vpop.f32.mrb[46].mxu0 }
 0x1a5   :  { %v719_v61 = vpop.f32.mrb[47].mxu0 }
 0x1a6   :  { %v4498_v62 = vpack.c.bf16 %v716_v57, %v710_v53  ;;  %v720_v4 = vadd.f32 %v719_v61, %v4387_v59 }
 0x1a8   :  { %6105 = vst [vmem:[#allocation17_spill] sm:$0xff] %v4498_v62 }
 0x1aa   :  { %v4500_v0 = vpop.f32.mrb[48].mxu0 }
 0x1ab   :  { %v725_v3 = vpop.f32.mrb[49].mxu0 }
 0x1ac   :  { %v726_v5 = vadd.f32 %v725_v3, %v4387_v59  ;;  %v4504_v7 = vpop.f32.mrb[50].mxu0 }
 0x1ad   :  { %6106 = vst [vmem:[#allocation18_spill] sm:$0xff] %v4504_v7  ;;  %v729_v10 = vpop.f32.mrb[51].mxu0 }
 0x1ae   :  { %v4506_v11 = vpack.c.bf16 %v726_v5, %v720_v4  ;;  %v730_v19 = vadd.f32 %v729_v10, %v4387_v59 }
 0x1b0   :  { %6107 = vst [vmem:[#allocation19_spill] sm:$0xff] %v4506_v11 }
 0x1b2   :  { %v4508_v12 = vpop.f32.mrb[52].mxu0 }
 0x1b3   :  { %6108 = vst [vmem:[#allocation20_spill] sm:$0xff] %v4508_v12  ;;  %v735_v17 = vpop.f32.mrb[53].mxu0 }
 0x1b4   :  { %v736_v20 = vadd.f32 %v735_v17, %v4387_v59  ;;  %v4512_v21 = vpop.f32.mrb[54].mxu0 }
 0x1b5   :  { %6109 = vst [vmem:[#allocation21_spill] sm:$0xff] %v4512_v21  ;;  %v4514_v24 = vpop.f32.mrb[55].mxu0 }
 0x1b6   :  { %6110 = vst [vmem:[#allocation22_spill] sm:$0xff] %v4514_v24  ;;  %v4516_v28 = vpack.c.bf16 %v736_v20, %v730_v19 }
 0x1b8   :  { %6111 = vst [vmem:[#allocation23_spill] sm:$0xff] %v4516_v28 }
 0x1ba   :  { %v4518_v29 = vpop.f32.mrb[56].mxu0 }
 0x1bb   :  { %6112 = vst [vmem:[#allocation24_spill] sm:$0xff] %v4518_v29  ;;  %v745_v30 = vpop.f32.mrb[57].mxu0 }
 0x1bc   :  { %v4520_v35 = vpop.f32.mrb[58].mxu0  ;;  %v746_v39 = vadd.f32 %v745_v30, %v4387_v59 }
 0x1bd   :  { %6113 = vst [vmem:[#allocation25_spill] sm:$0xff] %v4520_v35  ;;  %v749_v38 = vpop.f32.mrb[59].mxu0 }
 0x1be   :  { %v750_v40 = vadd.f32 %v749_v38, %v4387_v59 }
 0x1c0   :  { %v4524_v49 = vpack.c.bf16 %v750_v40, %v746_v39 }
 0x1c2   :  { %6114 = vst [vmem:[#allocation26_spill] sm:$0xff] %v4524_v49  ;;  %v4526_v51 = vpop.f32.mrb[60].mxu0 }
 0x1c3   :  { %6115 = vst [vmem:[#allocation27_spill] sm:$0xff] %v4526_v51  ;;  %v755_v53 = vpop.f32.mrb[61].mxu0 }
 0x1c4   :  { %v4528_v57 = vpop.f32.mrb[62].mxu0  ;;  %v756_v3 = vadd.f32 %v755_v53, %v4387_v59 }
 0x1c5   :  { %6116 = vst [vmem:[#allocation28_spill] sm:$0xff] %v4528_v57  ;;  %v759_v61 = vpop.f32.mrb[63].mxu0 }
 0x1c6   :  { %v760_v4 = vadd.f32 %v759_v61, %v4387_v59 }
 0x1c8   :  { %v4532_v5 = vpack.c.bf16 %v760_v4, %v756_v3 }
 0x1ca   :  { %6117 = vst [vmem:[#allocation29_spill] sm:$0xff] %v4532_v5  ;;  %v4534_v10 = vpop.f32.mrb[64].mxu0 }
 0x1cb   :  { %6118 = vst [vmem:[#allocation30_spill] sm:$0xff] %v4534_v10  ;;  %v765_v17 = vpop.f32.mrb[65].mxu0 }
 0x1cc   :  { %v4536_v19 = vpop.f32.mrb[66].mxu0  ;;  %v766_v30 = vadd.f32 %v765_v17, %v4387_v59 }
 0x1cd   :  { %6119 = vst [vmem:[#allocation31_spill] sm:$0xff] %v4536_v19  ;;  %v769_v20 = vpop.f32.mrb[67].mxu0 }
 0x1ce   :  { %v770_v38 = vadd.f32 %v769_v20, %v4387_v59 }
 0x1d0   :  { %v4540_v39 = vpack.c.bf16 %v770_v38, %v766_v30 }
 0x1d2   :  { %6120 = vst [vmem:[#allocation32_spill] sm:$0xff] %v4540_v39  ;;  %v4542_v40 = vpop.f32.mrb[68].mxu0 }
 0x1d3   :  { %6121 = vst [vmem:[#allocation33_spill] sm:$0xff] %v4542_v40  ;;  %v4544_v49 = vpop.f32.mrb[69].mxu0 }
 0x1d4   :  { %6122 = vst [vmem:[#allocation34_spill] sm:$0xff] %v4544_v49  ;;  %v4546_v53 = vpop.f32.mrb[70].mxu0 }
 0x1d5   :  { %6123 = vst [vmem:[#allocation35_spill] sm:$0xff] %v4546_v53  ;;  %v779_v61 = vpop.f32.mrb[71].mxu0 }
 0x1d6   :  { %v780_v5 = vadd.f32 %v779_v61, %v4387_v59 }
 0x1da   :  { %v4548_v3 = vpop.f32.mrb[72].mxu0 }
 0x1db   :  { %6124 = vst [vmem:[#allocation36_spill] sm:$0xff] %v4548_v3  ;;  %v785_v4 = vpop.f32.mrb[73].mxu0 }
 0x1dc   :  { %v786_v19 = vadd.f32 %v785_v4, %v4387_v59  ;;  %v4552_v10 = vpop.f32.mrb[74].mxu0 }
 0x1dd   :  { %6125 = vst [vmem:[#allocation37_spill] sm:$0xff] %v4552_v10  ;;  %v789_v17 = vpop.f32.mrb[75].mxu0 }
 0x1de   :  { %v4554_v20 = vpack.c.bf16 %v786_v19, %v780_v5  ;;  %v790_v39 = vadd.f32 %v789_v17, %v4387_v59 }
 0x1e0   :  { %6126 = vst [vmem:[#allocation38_spill] sm:$0xff] %v4554_v20 }
 0x1e2   :  { %v4556_v30 = vpop.f32.mrb[76].mxu0 }
 0x1e3   :  { %6127 = vst [vmem:[#allocation39_spill] sm:$0xff] %v4556_v30  ;;  %v795_v38 = vpop.f32.mrb[77].mxu0 }
 0x1e4   :  { %v796_v49 = vadd.f32 %v795_v38, %v4387_v59  ;;  %v4560_v40 = vpop.f32.mrb[78].mxu0 }
 0x1e5   :  { %6128 = vst [vmem:[#allocation40_spill] sm:$0xff] %v4560_v40  ;;  %v799_v3 = vpop.f32.mrb[79].mxu0 }
 0x1e6   :  { %v4562_v53 = vpack.c.bf16 %v796_v49, %v790_v39  ;;  %v800_v10 = vadd.f32 %v799_v3, %v4387_v59 }
 0x1e8   :  { %6129 = vst [vmem:[#allocation41_spill] sm:$0xff] %v4562_v53 }
 0x1ea   :  { %v4564_v61 = vpop.f32.mrb[80].mxu0 }
 0x1eb   :  { %6130 = vst [vmem:[#allocation42_spill] sm:$0xff] %v4564_v61  ;;  %v805_v4 = vpop.f32.mrb[81].mxu0 }
 0x1ec   :  { %v806_v5 = vadd.f32 %v805_v4, %v4387_v59  ;;  %v4568_v19 = vpop.f32.mrb[82].mxu0  ;;  %v851_v4 = vpop.xlane.xlu0 %850 }
 0x1ed   :  { %6131 = vst [vmem:[#allocation43_spill] sm:$0xff] %v4568_v19  ;;  %v4570_v20 = vpop.f32.mrb[83].mxu0 }
 0x1ee   :  { %6132 = vst [vmem:[#allocation44_spill] sm:$0xff] %v4570_v20  ;;  %v4572_v30 = vpack.c.bf16 %v806_v5, %v800_v10  ;;  %v855_v20 = vpop.xlane.xlu1 %854 }
 0x1ef   :  { %v951_v57 = vmul.f32 0.0078125, %v855_v20 }
 0x1f0   :  { %6133 = vst [vmem:[#allocation45_spill] sm:$0xff] %v4572_v30 }
 0x1f1   :  { %v4616_v20 = vsub.f32 %v4405_v36, %v951_v57 }
 0x1f2   :  { %v813_v17 = vpop.f32.mrb[84].mxu0 }
 0x1f3   :  { %v4575_v38 = vadd.f32 %v813_v17, %v4390_v25  ;;  %v4577_v40 = vpop.f32.mrb[85].mxu0  ;;  %v1049_v36 = vmul.f32 %v4616_v20, %v4616_v20 }
 0x1f4   :  { %6134 = vst [vmem:[#allocation46_spill] sm:$0xff] %v4577_v40  ;;  %v817_v49 = vpop.f32.mrb[86].mxu0 }
 0x1f5   :  { %v4580_v39 = vadd.f32 %v817_v49, %v4390_v25  ;;  %v4582_v53 = vpop.f32.mrb[87].mxu0  ;;  %934 = vadd.xlane.f32.xlu1 %v4575_v38  ;;  %v949_v49 = vmul.f32 0.0078125, %v851_v4 }
 0x1f6   :  { %6135 = vst [vmem:[#allocation47_spill] sm:$0xff] %v4582_v53  ;;  %v853_v53 = vpop.xlane.xlu0 %852 }
 0x1f7   :  { %936 = vadd.xlane.f32.xlu0 %v4580_v39  ;;  %v4610_v51 = vsub.f32 %v4393_v27, %v949_v49  ;;  %v950_v35 = vmul.f32 0.0078125, %v853_v53 }
 0x1f9   :  { %v4622_v27 = vsub.f32 %v4399_v33, %v950_v35 }
 0x1fa   :  { %v823_v3 = vpop.f32.mrb[88].mxu0  ;;  %v859_v4 = vpop.xlane.xlu0 %858 }
 0x1fb   :  { %v4587_v10 = vadd.f32 %v823_v3, %v4390_v25  ;;  %v4589_v5 = vpop.f32.mrb[89].mxu0  ;;  %v953_v29 = vmul.f32 0.0078125, %v859_v4  ;;  %v1048_v33 = vmul.f32 %v4622_v27, %v4622_v27 }
 0x1fc   :  { %6136 = vst [vmem:[#allocation48_spill] sm:$0xff] %v4589_v5  ;;  %v827_v17 = vpop.f32.mrb[90].mxu0 }
 0x1fd   :  { %v4592_v40 = vadd.f32 %v827_v17, %v4390_v25  ;;  %v4594_v30 = vpop.f32.mrb[91].mxu0  ;;  %938 = vadd.xlane.f32.xlu1 %v4587_v10  ;;  %v4630_v57 = vsub.f32 %v4417_v45, %v953_v29 }
 0x1fe   :  { %6137 = vst [vmem:[#allocation49_spill] sm:$0xff] %v4594_v30 }
 0x1ff   :  { %940 = vadd.xlane.f32.xlu0 %v4592_v40 }
 0x202   :  { %v833_v19 = vpop.f32.mrb[92].mxu0 }
 0x203   :  { %v4599_v61 = vadd.f32 %v833_v19, %v4390_v25  ;;  %v4601_v3 = vpop.f32.mrb[93].mxu0  ;;  %v857_v19 = vpop.xlane.xlu1 %856 }
 0x204   :  { %6138 = vst [vmem:[#allocation50_spill] sm:$0xff] %v4601_v3  ;;  %v837_v5 = vpop.f32.mrb[94].mxu0  ;;  %v1047_v3 = vmul.f32 %v4610_v51, %v4610_v51  ;;  %v952_v24 = vmul.f32 0.0078125, %v857_v19 }
 0x205   :  { %v4604_v17 = vadd.f32 %v837_v5, %v4390_v25  ;;  %942 = vadd.xlane.f32.xlu1 %v4599_v61  ;;  %v4607_v30 = vpop.f32.mrb[95].mxu0  ;;  %v863_v5 = vpop.xlane.xlu0 %862 }
 0x206   :  { %6139 = vst [vmem:[#allocation51_spill] sm:$0xff] %v4607_v30  ;;  %v955_v11 = vmul.f32 0.0078125, %v863_v5  ;;  %v4635_v35 = vsub.f32 %v4411_v42, %v952_v24 }
 0x207   :  { %944 = vadd.xlane.f32.xlu0 %v4604_v17  ;;  %v861_v49 = vpop.xlane.xlu1 %860 }
 0x208   :  { %v4640_v5 = vsub.f32 %v4429_v54, %v955_v11  ;;  %v1050_v45 = vmul.f32 %v4635_v35, %v4635_v35 }
 0x20a   :  { %v843_v28 = vpop.f32.mrb[96].mxu0 }
 0x20b   :  { %v4619_v30 = vadd.f32 %v843_v28, %v4390_v25  ;;  %1096 = vadd.xlane.f32.xlu0 %v1047_v3  ;;  %v4624_v53 = vpop.f32.mrb[97].mxu0  ;;  %v954_v28 = vmul.f32 0.0078125, %v861_v49  ;;  %v1051_v3 = vmul.f32 %v4630_v57, %v4630_v57  ;;  %v1053_v49 = vmul.f32 %v4640_v5, %v4640_v5 }
 0x20c   :  { %6140 = vst [vmem:[#allocation52_spill] sm:$0xff] %v4624_v53  ;;  %v847_v4 = vpop.f32.mrb[98].mxu0 }
 0x20d   :  { %946 = vadd.xlane.f32.xlu1 %v4619_v30  ;;  %v848_v19 = vpop.f32.mrb[99].mxu0  ;;  %v4645_v29 = vsub.f32 %v4420_v48, %v954_v28 }
 0x20f   :  { %1100 = vadd.xlane.f32.xlu0 %v1049_v36  ;;  %v1052_v42 = vmul.f32 %v4645_v29, %v4645_v29 }
 0x211   :  { %1098 = vadd.xlane.f32.xlu1 %v1048_v33 }
 0x213   :  { %1104 = vadd.xlane.f32.xlu0 %v1051_v3 }
 0x215   :  { %1102 = vadd.xlane.f32.xlu1 %v1050_v45 }
 0x217   :  { %1108 = vadd.xlane.f32.xlu0 %v1053_v49 }
 0x219   :  { %1106 = vadd.xlane.f32.xlu1 %v1052_v42 }
 0x282   :  { %v935_v24 = vpop.xlane.xlu1 %934 }
 0x283   :  { %v991_v4 = vmul.f32 0.0078125, %v935_v24 }
 0x284   :  { %v937_v54 = vpop.xlane.xlu0 %936 }
 0x285   :  { %v992_v11 = vmul.f32 0.0078125, %v937_v54  ;;  %v4652_v36 = vsub.f32 %v4575_v38, %v991_v4 }
 0x287   :  { %v1089_v48 = vmul.f32 %v4652_v36, %v4652_v36  ;;  %v4657_v19 = vsub.f32 %v4580_v39, %v992_v11 }
 0x289   :  { %1180 = vadd.xlane.f32.xlu1 %v1089_v48  ;;  %v1090_v28 = vmul.f32 %v4657_v19, %v4657_v19 }
 0x28a   :  { %v939_v33 = vpop.xlane.xlu1 %938 }
 0x28b   :  { %v993_v3 = vmul.f32 0.0078125, %v939_v33  ;;  %1182 = vadd.xlane.f32.xlu0 %v1090_v28 }
 0x28c   :  { %v941_v45 = vpop.xlane.xlu0 %940 }
 0x28d   :  { %v994_v49 = vmul.f32 0.0078125, %v941_v45  ;;  %v4662_v42 = vsub.f32 %v4587_v10, %v993_v3 }
 0x28f   :  { %v1091_v38 = vmul.f32 %v4662_v42, %v4662_v42  ;;  %v4667_v24 = vsub.f32 %v4592_v40, %v994_v49 }
 0x291   :  { %1184 = vadd.xlane.f32.xlu1 %v1091_v38  ;;  %v1092_v39 = vmul.f32 %v4667_v24, %v4667_v24 }
 0x292   :  { %v943_v4 = vpop.xlane.xlu1 %942 }
 0x293   :  { %v995_v54 = vmul.f32 0.0078125, %v943_v4  ;;  %1186 = vadd.xlane.f32.xlu0 %v1092_v39 }
 0x294   :  { %v945_v11 = vpop.xlane.xlu0 %944 }
 0x295   :  { %v996_v48 = vmul.f32 0.0078125, %v945_v11  ;;  %v4672_v28 = vsub.f32 %v4599_v61, %v995_v54 }
 0x297   :  { %v1093_v10 = vmul.f32 %v4672_v28, %v4672_v28  ;;  %v4677_v33 = vsub.f32 %v4604_v17, %v996_v48 }
 0x298   :  { %v1097_v40 = vpop.xlane.xlu0 %1096 }
 0x299   :  { %v1194_v3 = vmul.f32 0.0078125, %v1097_v40  ;;  %1188 = vadd.xlane.f32.xlu1 %v1093_v10  ;;  %v1094_v45 = vmul.f32 %v4677_v33, %v4677_v33 }
 0x29a   :  { %v947_v49 = vpop.xlane.xlu1 %946 }
 0x29b   :  { %v1243_v38 = vadd.f32 1e-05, %v1194_v3  ;;  %v997_v39 = vmul.f32 0.0078125, %v947_v49  ;;  %1190 = vadd.xlane.f32.xlu0 %v1094_v45 }
 0x29c   :  { %v1101_v4 = vpop.xlane.xlu0 %1100 }
 0x29d   :  { %3920 = vrsqrt.f32 %v1243_v38  ;;  %v1196_v61 = vmul.f32 0.0078125, %v1101_v4  ;;  %v4682_v54 = vsub.f32 %v4619_v30, %v997_v39 }
 0x29e   :  { %v1099_v11 = vpop.xlane.xlu1 %1098 }
 0x29f   :  { %v1245_v53 = vadd.f32 1e-05, %v1196_v61  ;;  %v1195_v17 = vmul.f32 0.0078125, %v1099_v11  ;;  %v1095_v48 = vmul.f32 %v4682_v54, %v4682_v54 }
 0x2a0   :  { %v1105_v10 = vpop.xlane.xlu0 %1104 }
 0x2a1   :  { %3922 = vrsqrt.f32 %v1245_v53  ;;  %v1244_v40 = vadd.f32 1e-05, %v1195_v17  ;;  %v1198_v62 = vmul.f32 0.0078125, %v1105_v10  ;;  %1192 = vadd.xlane.f32.xlu1 %v1095_v48  ;;  %v4690_v17 = vld [vmem:[%s6091_s3] ss:$0 sm:$0xff] }
 0x2a2   :  { %v1103_v3 = vpop.xlane.xlu1 %1102 }
 0x2a3   :  { %3924 = vrsqrt.f32 %v1244_v40  ;;  %v1247_v45 = vadd.f32 1e-05, %v1198_v62  ;;  %v1197_v49 = vmul.f32 0.0078125, %v1103_v3 }
 0x2a4   :  { %v1109_v38 = vpop.xlane.xlu0 %1108 }
 0x2a5   :  { %v1246_v4 = vadd.f32 1e-05, %v1197_v49  ;;  %v1200_v21 = vmul.f32 0.0078125, %v1109_v38  ;;  %3926 = vrsqrt.f32 %v1247_v45 }
 0x2a6   :  { %v1107_v30 = vpop.xlane.xlu1 %1106 }
 0x2a7   :  { %v3921_v39 = vpop.eup %3920  ;;  %3928 = vrsqrt.f32 %v1246_v4  ;;  %v1199_v61 = vmul.f32 0.0078125, %v1107_v30  ;;  %v1249_v11 = vadd.f32 1e-05, %v1200_v21  ;;  %v4698_v21 = vld [vmem:[%s6092_s4] ss:$0 sm:$0xff] }
 0x2a8   :  { %v1341_v7 = vmul.f32 %v3921_v39, %v4610_v51 }
 0x2a9   :  { %v1248_v12 = vadd.f32 1e-05, %v1199_v61 }
 0x2aa   :  { %v1397_v10 = vmul.f32 %v4690_v17, %v1341_v7 }
 0x2ab   :  { %v3923_v53 = vpop.eup %3922  ;;  %3930 = vrsqrt.f32 %v1248_v12 }
 0x2ac   :  { %3932 = vrsqrt.f32 %v1249_v11  ;;  %v1343_v40 = vmul.f32 %v3923_v53, %v4616_v20  ;;  %v1453_v45 = vadd.f32 %v4698_v21, %v1397_v10 }
 0x2ad   :  { %v3925_v62 = vpop.eup %3924 }
 0x2ae   :  { %v1342_v48 = vmul.f32 %v3925_v62, %v4622_v27  ;;  %v1399_v27 = vmul.f32 %v4690_v17, %v1343_v40 }
 0x2af   :  { %v3927_v51 = vpop.eup %3926 }
 0x2b0   :  { %v1398_v12 = vmul.f32 %v4690_v17, %v1342_v48  ;;  %v1345_v4 = vmul.f32 %v3927_v51, %v4630_v57  ;;  %v1455_v39 = vadd.f32 %v4698_v21, %v1399_v27 }
 0x2b1   :  { %v3929_v3 = vpop.eup %3928 }
 0x2b2   :  { %v1454_v49 = vadd.f32 %v4698_v21, %v1398_v12  ;;  %v1344_v38 = vmul.f32 %v3929_v3, %v4635_v35  ;;  %v1401_v35 = vmul.f32 %v4690_v17, %v1345_v4 }
 0x2b4   :  { %v1513_v7 = vpack.c.bf16 %v1454_v49, %v1453_v45  ;;  %v1400_v20 = vmul.f32 %v4690_v17, %v1344_v38  ;;  %v1457_v40 = vadd.f32 %v4698_v21, %v1401_v35 }
 0x2b5   :  { %v3931_v30 = vpop.eup %3930 }
 0x2b6   :  { %3592 = vmatprep.subr.bf16.mxu1 %v1513_v7  ;;  %v1456_v61 = vadd.f32 %v4698_v21, %v1400_v20  ;;  %v1346_v11 = vmul.f32 %v3931_v30, %v4645_v29  ;;  %v3933_v53 = vpop.eup %3932 }
 0x2b7   :  { %3593 = vmatpush3.bf16.xpose.msra.mxu1 %v1513_v7  ;;  %v1347_v57 = vmul.f32 %v3933_v53, %v4640_v5 }
 0x2b8   :  { %v1514_v62 = vpack.c.bf16 %v1456_v61, %v1455_v39  ;;  %v1402_v48 = vmul.f32 %v4690_v17, %v1346_v11 }
 0x2b9   :  { %v1403_v12 = vmul.f32 %v4690_v17, %v1347_v57 }
 0x2ba   :  { %3594 = vmatprep.subr.bf16.mxu1 %v1514_v62  ;;  %v1458_v10 = vadd.f32 %v4698_v21, %v1402_v48 }
 0x2bb   :  { %v1459_v29 = vadd.f32 %v4698_v21, %v1403_v12 }
 0x2bc   :  { %v1515_v51 = vpack.c.bf16 %v1458_v10, %v1457_v40 }
 0x2bd   :  { %v1516_v3 = vpack.c.bf16 %v1459_v29, %v1459_v29 }
 0x2bf   :  { %3595 = vmatpush3.bf16.xpose.msra.mxu1 %v1514_v62 }
 0x2c0   :  { %3596 = vmatprep.subr.bf16.mxu1 %v1515_v51 }
 0x2c7   :  { %3597 = vmatpush3.bf16.xpose.msra.mxu1 %v1515_v51 }
 0x2c8   :  { %3598 = vmatprep.subr.bf16.mxu1 %v1516_v3 }
 0x2cf   :  { %3599 = vmatpush3.bf16.xpose.msra.mxu1 %v1516_v3 }
 0x2d0   :  { %3608 = vmatprep.subr.bf16.mxu1 %v4401_v34 }
 0x316   :  { %v1181_v45 = vpop.xlane.xlu1 %1180 }
 0x317   :  { %v1236_v49 = vmul.f32 0.0078125, %v1181_v45 }
 0x318   :  { %v1183_v38 = vpop.xlane.xlu0 %1182 }
 0x319   :  { %v1285_v27 = vadd.f32 1e-05, %v1236_v49  ;;  %v1237_v5 = vmul.f32 0.0078125, %v1183_v38 }
 0x31b   :  { %3934 = vrsqrt.f32 %v1285_v27  ;;  %v1286_v7 = vadd.f32 1e-05, %v1237_v5 }
 0x31d   :  { %3936 = vrsqrt.f32 %v1286_v7 }
 0x31e   :  { %v1185_v20 = vpop.xlane.xlu1 %1184 }
 0x31f   :  { %v1238_v4 = vmul.f32 0.0078125, %v1185_v20 }
 0x320   :  { %v1187_v30 = vpop.xlane.xlu0 %1186 }
 0x321   :  { %v1287_v39 = vadd.f32 1e-05, %v1238_v4  ;;  %v1239_v61 = vmul.f32 0.0078125, %v1187_v30 }
 0x323   :  { %3938 = vrsqrt.f32 %v1287_v39  ;;  %v1288_v11 = vadd.f32 1e-05, %v1239_v61 }
 0x325   :  { %v3935_v53 = vpop.eup %3934  ;;  %3940 = vrsqrt.f32 %v1288_v11 }
 0x326   :  { %v1383_v62 = vmul.f32 %v3935_v53, %v4652_v36  ;;  %v1189_v35 = vpop.xlane.xlu1 %1188 }
 0x327   :  { %v3937_v48 = vpop.eup %3936  ;;  %v1240_v10 = vmul.f32 0.0078125, %v1189_v35 }
 0x328   :  { %v1439_v57 = vmul.f32 %v4690_v17, %v1383_v62  ;;  %v1384_v40 = vmul.f32 %v3937_v48, %v4657_v19  ;;  %v1191_v51 = vpop.xlane.xlu0 %1190 }
 0x329   :  { %v1289_v12 = vadd.f32 1e-05, %v1240_v10  ;;  %v1241_v29 = vmul.f32 0.0078125, %v1191_v51 }
 0x32a   :  { %v1495_v3 = vadd.f32 %v4698_v21, %v1439_v57  ;;  %v1440_v45 = vmul.f32 %v4690_v17, %v1384_v40 }
 0x32b   :  { %3942 = vrsqrt.f32 %v1289_v12  ;;  %v1290_v49 = vadd.f32 1e-05, %v1241_v29 }
 0x32c   :  { %v1496_v38 = vadd.f32 %v4698_v21, %v1440_v45  ;;  %v1502_v36 = vmul.f32 0.088388346, %v1495_v3 }
 0x32d   :  { %v3939_v27 = vpop.eup %3938  ;;  %3944 = vrsqrt.f32 %v1290_v49  ;;  %v636_v49 = vadd.f32 %v4431_v55, %v4387_v59 }
 0x32e   :  { %v1503_v5 = vmul.f32 0.088388346, %v1496_v38  ;;  %v1385_v7 = vmul.f32 %v3939_v27, %v4662_v42  ;;  %v1193_v20 = vpop.xlane.xlu1 %1192 }
 0x32f   :  { %v3941_v4 = vpop.eup %3940  ;;  %v1242_v19 = vmul.f32 0.0078125, %v1193_v20 }
 0x330   :  { %v1441_v30 = vmul.f32 %v4690_v17, %v1385_v7  ;;  %v1386_v39 = vmul.f32 %v3941_v4, %v4667_v24  ;;  %v4727_v61 = vpack.c.bf16 %v1503_v5, %v1502_v36 }
 0x331   :  { %v1291_v11 = vadd.f32 1e-05, %v1242_v19 }
 0x332   :  { %v1497_v53 = vadd.f32 %v4698_v21, %v1441_v30  ;;  %v1442_v62 = vmul.f32 %v4690_v17, %v1386_v39  ;;  %3600 = vmatprep.mubr.bf16.mxu1 %v4727_v61  ;;  %3760 = vmatprep.mubr.bf16.mxu0 %v4727_v61 }
 0x333   :  { %3946 = vrsqrt.f32 %v1291_v11 }
 0x334   :  { %v1498_v42 = vadd.f32 %v4698_v21, %v1442_v62  ;;  %v1504_v48 = vmul.f32 0.088388346, %v1497_v53  ;;  %v638_v62 = vadd.f32 %v4433_v56, %v4390_v25  ;;  %v4779_v56 = vadd.f32 %v4448_v6, %v4390_v25 }
 0x335   :  { %v3943_v35 = vpop.eup %3942 }
 0x336   :  { %v1505_v10 = vmul.f32 0.088388346, %v1498_v42  ;;  %v1387_v57 = vmul.f32 %v3943_v35, %v4672_v28  ;;  %v644_v42 = vadd.f32 %v4436_v58, %v4390_v25  ;;  %v648_v35 = vadd.f32 %v4440_v63, %v4390_v25 }
 0x337   :  { %v3945_v24 = vpop.eup %3944  ;;  %v4785_v63 = vadd.f32 %v4452_v9, %v4390_v25 }
 0x338   :  { %v1443_v40 = vmul.f32 %v4690_v17, %v1387_v57  ;;  %v1388_v51 = vmul.f32 %v3945_v24, %v4677_v33  ;;  %v4737_v12 = vpack.c.bf16 %v1505_v10, %v1504_v48  ;;  %v654_v48 = vadd.f32 %v4444_v2, %v4390_v25 }
 0x33a   :  { %v1499_v29 = vadd.f32 %v4698_v21, %v1443_v40  ;;  %v1444_v3 = vmul.f32 %v4690_v17, %v1388_v51  ;;  %3601 = vmatmul.mubr.bf16.vlgmr.msra.gmra.mrb[0].mxu1 %v4737_v12  ;;  %v4797_v51 = vadd.f32 %v4456_v13, %v4390_v25 }
 0x33b   :  { %3609 = vmatpush3.bf16.msra.mxu1 %v4401_v34  ;;  %v1520_v34 = vpack.c.bf16 %v636_v49, %v636_v49 }
 0x33c   :  { %v1500_v45 = vadd.f32 %v4698_v21, %v1444_v3  ;;  %3610 = vmatprep.subr.bf16.mxu1 %v4413_v43  ;;  %v1506_v38 = vmul.f32 0.088388346, %v1499_v29 }
 0x33d   :  { %v3947_v28 = vpop.eup %3946 }
 0x33e   :  { %v1507_v33 = vmul.f32 0.088388346, %v1500_v45  ;;  %v1389_v27 = vmul.f32 %v3947_v28, %v4682_v54  ;;  %v1681_v54 = vsel %vm1679_vm0, %v1520_v34, 0 }
 0x33f   :  { %3611 = vmatpush3.bf16.msra.mxu1 %v4413_v43 }
 0x340   :  { %v1445_v36 = vmul.f32 %v4690_v17, %v1389_v27  ;;  %3612 = vmatprep.subr.bf16.mxu1 %v4426_v52  ;;  %v4751_v5 = vpack.c.bf16 %v1507_v33, %v1506_v38 }
 0x342   :  { %v1501_v7 = vadd.f32 %v4698_v21, %v1445_v36  ;;  %3604 = vmatprep.mubr.bf16.mxu1 %v4751_v5 }
 0x343   :  { %3613 = vmatpush3.bf16.msra.mxu1 %v4426_v52 }
 0x344   :  { %3784 = vmatprep.subr.msk.bf16.mxu1 %vm1679_vm0, %v1520_v34  ;;  %v1508_v55 = vmul.f32 0.088388346, %v1501_v7 }
 0x346   :  { %v4758_v43 = vpack.c.bf16 %v1508_v55, %v1508_v55 }
 0x347   :  { %3615 = vmatpush3.bf16.msra.mxu1 %v1681_v54 }
 0x348   :  { %3605 = vmatmul.mubr.bf16.gmra.mrb[4].mxu1 %v4758_v43 }
 0x40d   :  { %v3602_v20 = vpop.f32.mrb[0].mxu1 }
 0x40e   :  { %v1555_v4 = vpop.f32.mrb[1].mxu1  ;;  %v1592_v19 = vsel %vm1585_vm1, %v3602_v20, -inf }
 0x40f   :  { %1593 = vmax.xlane.f32.xlu0 %v1592_v19  ;;  %v3603_v30 = vpop.f32.mrb[2].mxu1  ;;  %v1586_v11 = vsel %vm1585_vm1, %v1555_v4, -inf }
 0x410   :  { %v1558_v39 = vpop.f32.mrb[3].mxu1  ;;  %v1595_v52 = vsel %vm1585_vm1, %v3603_v30, -inf }
 0x411   :  { %1596 = vmax.xlane.f32.xlu1 %v1595_v52  ;;  %v1589_v53 = vsel %vm1585_vm1, %v1558_v39, -inf }
 0x413   :  { %1587 = vmax.xlane.f32.xlu0 %v1586_v11 }
 0x415   :  { %1590 = vmax.xlane.f32.xlu1 %v1589_v53 }
 0x417   :  { %864 = vadd.xlane.f32.xlu0 %v638_v62 }
 0x419   :  { %866 = vadd.xlane.f32.xlu1 %v644_v42 }
 0x41b   :  { %868 = vadd.xlane.f32.xlu0 %v648_v35  ;;  %v4773_v10 = vpop.f32.mrb[4].mxu1 }
 0x41c   :  { %v4775_v57 = vpop.f32.mrb[5].mxu1  ;;  %v1604_v40 = vsel %vm1585_vm1, %v4773_v10, -inf }
 0x41d   :  { %870 = vadd.xlane.f32.xlu1 %v654_v48  ;;  %v3607_v24 = vpop.f32.mrb[6].mxu1  ;;  %v1598_v2 = vsel %vm1585_vm1, %v4775_v57, -inf }
 0x41e   :  { %v4781_v58 = vpop.f32.mrb[7].mxu1 }
 0x41f   :  { %872 = vadd.xlane.f32.xlu0 %v4779_v56  ;;  %v1601_v6 = vsel %vm1585_vm1, %v4781_v58, -inf }
 0x421   :  { %874 = vadd.xlane.f32.xlu1 %v4785_v63 }
 0x423   :  { %1599 = vmax.xlane.f32.xlu0 %v1598_v2 }
 0x425   :  { %1602 = vmax.xlane.f32.xlu1 %v1601_v6 }
 0x427   :  { %1605 = vmax.xlane.f32.xlu0 %v1604_v40 }
 0x429   :  { %876 = vadd.xlane.f32.xlu1 %v4797_v51 }
 0x49c   :  { %v1594_v9 = vpop.xlane.xlu0 %1593 }
 0x49d   :  { %v1609_v45 = vsub.f32 %v3602_v20, %v1594_v9 }
 0x49e   :  { %v1597_v29 = vpop.xlane.xlu1 %1596 }
 0x49f   :  { %v1610_v38 = vsub.f32 %v3603_v30, %v1597_v29  ;;  %v1618_v34 = vmul.f32 1.442695, %v1609_v45 }
 0x4a0   :  { %v1588_v3 = vpop.xlane.xlu0 %1587 }
 0x4a1   :  { %v1607_v28 = vsub.f32 %v1555_v4, %v1588_v3  ;;  %v1620_v13 = vmul.f32 1.442695, %v1610_v38 }
 0x4a2   :  { %v1591_v49 = vpop.xlane.xlu1 %1590 }
 0x4a3   :  { %v1614_v33 = vmul.f32 1.442695, %v1607_v28  ;;  %v1608_v27 = vsub.f32 %v1558_v39, %v1591_v49 }
 0x4a4   :  { %v865_v36 = vpop.xlane.xlu0 %864 }
 0x4a5   :  { %3948 = vpow2.f32 %v1614_v33  ;;  %v1616_v7 = vmul.f32 1.442695, %v1608_v27  ;;  %v956_v55 = vmul.f32 0.0078125, %v865_v36 }
 0x4a6   :  { %v867_v54 = vpop.xlane.xlu1 %866 }
 0x4a7   :  { %3950 = vpow2.f32 %v1616_v7  ;;  %v957_v19 = vmul.f32 0.0078125, %v867_v54  ;;  %v4800_v52 = vsub.f32 %v638_v62, %v956_v55 }
 0x4a8   :  { %v869_v11 = vpop.xlane.xlu0 %868  ;;  %3952 = vpow2.f32 %v1618_v34 }
 0x4a9   :  { %v958_v53 = vmul.f32 0.0078125, %v869_v11  ;;  %v1054_v20 = vmul.f32 %v4800_v52, %v4800_v52  ;;  %v4804_v4 = vsub.f32 %v644_v42, %v957_v19  ;;  %3954 = vpow2.f32 %v1620_v13 }
 0x4aa   :  { %v871_v30 = vpop.xlane.xlu1 %870 }
 0x4ab   :  { %v959_v39 = vmul.f32 0.0078125, %v871_v30  ;;  %1110 = vadd.xlane.f32.xlu0 %v1054_v20  ;;  %v1055_v24 = vmul.f32 %v4804_v4, %v4804_v4  ;;  %v4808_v2 = vsub.f32 %v648_v35, %v958_v53 }
 0x4ac   :  { %v873_v6 = vpop.xlane.xlu0 %872 }
 0x4ad   :  { %1112 = vadd.xlane.f32.xlu1 %v1055_v24  ;;  %v1056_v62 = vmul.f32 %v4808_v2, %v4808_v2  ;;  %v4812_v40 = vsub.f32 %v654_v48, %v959_v39  ;;  %v960_v28 = vmul.f32 0.0078125, %v873_v6 }
 0x4ae   :  { %v875_v9 = vpop.xlane.xlu1 %874 }
 0x4af   :  { %v4814_v29 = vpop.eup %3948  ;;  %1114 = vadd.xlane.f32.xlu0 %v1056_v62  ;;  %v1057_v42 = vmul.f32 %v4812_v40, %v4812_v40  ;;  %v961_v33 = vmul.f32 0.0078125, %v875_v9  ;;  %v4832_v13 = vsub.f32 %v4779_v56, %v960_v28 }
 0x4b0   :  { %v1600_v3 = vpop.xlane.xlu0 %1599  ;;  %v1628_v38 = vsel %vm1585_vm1, %v4814_v29, 0.0 }
 0x4b1   :  { %v4818_v45 = vpop.eup %3950  ;;  %v1611_v35 = vsub.f32 %v4775_v57, %v1600_v3  ;;  %1116 = vadd.xlane.f32.xlu1 %v1057_v42  ;;  %v4837_v20 = vsub.f32 %v4785_v63, %v961_v33 }
 0x4b2   :  { %v1603_v49 = vpop.xlane.xlu1 %1602  ;;  %v4823_v48 = vpop.eup %3952  ;;  %v1631_v7 = vsel %vm1585_vm1, %v4818_v45, 0.0 }
 0x4b3   :  { %v1622_v27 = vmul.f32 1.442695, %v1611_v35  ;;  %v1612_v36 = vsub.f32 %v4781_v58, %v1603_v49  ;;  %1629 = vadd.xlane.f32.xlu0 %v1628_v38  ;;  %v4828_v55 = vpop.eup %3954  ;;  %v1634_v11 = vsel %vm1585_vm1, %v4823_v48, 0.0  ;;  %v1059_v39 = vmul.f32 %v4837_v20, %v4837_v20 }
 0x4b4   :  { %v1606_v34 = vpop.xlane.xlu0 %1605  ;;  %v1637_v30 = vsel %vm1585_vm1, %v4828_v55, 0.0 }
 0x4b5   :  { %3956 = vpow2.f32 %v1622_v27  ;;  %v1624_v57 = vmul.f32 1.442695, %v1612_v36  ;;  %v1613_v54 = vsub.f32 %v4773_v10, %v1606_v34  ;;  %1632 = vadd.xlane.f32.xlu1 %v1631_v7  ;;  %v1058_v10 = vmul.f32 %v4832_v13, %v4832_v13 }
 0x4b6   :  { %v877_v19 = vpop.xlane.xlu1 %876 }
 0x4b7   :  { %3958 = vpow2.f32 %v1624_v57  ;;  %v1626_v58 = vmul.f32 1.442695, %v1613_v54  ;;  %v962_v53 = vmul.f32 0.0078125, %v877_v19  ;;  %1635 = vadd.xlane.f32.xlu0 %v1634_v11 }
 0x4b9   :  { %3960 = vpow2.f32 %v1626_v58  ;;  %1638 = vadd.xlane.f32.xlu1 %v1637_v30  ;;  %v4844_v56 = vsub.f32 %v4797_v51, %v962_v53 }
 0x4bb   :  { %1118 = vadd.xlane.f32.xlu0 %v1058_v10  ;;  %v1060_v63 = vmul.f32 %v4844_v56, %v4844_v56 }
 0x4bd   :  { %1120 = vadd.xlane.f32.xlu1 %v1059_v39 }
 0x4bf   :  { %v4850_v24 = vpop.eup %3956  ;;  %1122 = vadd.xlane.f32.xlu0 %v1060_v63 }
 0x4c0   :  { %v1640_v6 = vsel %vm1585_vm1, %v4850_v24, 0.0 }
 0x4c1   :  { %v4854_v62 = vpop.eup %3958  ;;  %1641 = vadd.xlane.f32.xlu1 %v1640_v6 }
 0x4c2   :  { %v1643_v51 = vsel %vm1585_vm1, %v4854_v62, 0.0 }
 0x4c3   :  { %v4858_v9 = vpop.eup %3960  ;;  %1644 = vadd.xlane.f32.xlu0 %v1643_v51 }
 0x4c4   :  { %v1646_v42 = vsel %vm1585_vm1, %v4858_v9, 0.0 }
 0x4c5   :  { %1647 = vadd.xlane.f32.xlu1 %v1646_v42 }
 0x538   :  { %v1111_v3 = vpop.xlane.xlu0 %1110 }
 0x539   :  { %v1201_v28 = vmul.f32 0.0078125, %v1111_v3 }
 0x53a   :  { %v1113_v35 = vpop.xlane.xlu1 %1112 }
 0x53b   :  { %v1250_v49 = vadd.f32 1e-05, %v1201_v28  ;;  %v1202_v38 = vmul.f32 0.0078125, %v1113_v35 }
 0x53c   :  { %v1115_v33 = vpop.xlane.xlu0 %1114 }
 0x53d   :  { %3962 = vrsqrt.f32 %v1250_v49  ;;  %v1251_v27 = vadd.f32 1e-05, %v1202_v38  ;;  %v1203_v36 = vmul.f32 0.0078125, %v1115_v33 }
 0x53e   :  { %v1117_v34 = vpop.xlane.xlu1 %1116 }
 0x53f   :  { %3964 = vrsqrt.f32 %v1251_v27  ;;  %v1252_v7 = vadd.f32 1e-05, %v1203_v36  ;;  %v1204_v57 = vmul.f32 0.0078125, %v1117_v34 }
 0x540   :  { %v1630_v54 = vpop.xlane.xlu0 %1629 }
 0x541   :  { %3966 = vrsqrt.f32 %v1252_v7  ;;  %v1253_v19 = vadd.f32 1e-05, %v1204_v57 }
 0x542   :  { %3968 = vrcp.f32 %v1630_v54  ;;  %v1633_v11 = vpop.xlane.xlu1 %1632 }
 0x543   :  { %3970 = vrsqrt.f32 %v1253_v19 }
 0x544   :  { %3972 = vrcp.f32 %v1633_v11  ;;  %v1636_v58 = vpop.xlane.xlu0 %1635 }
 0x545   :  { %3974 = vrcp.f32 %v1636_v58 }
 0x546   :  { %v1639_v53 = vpop.xlane.xlu1 %1638 }
 0x547   :  { %v3963_v30 = vpop.eup %3962  ;;  %3976 = vrcp.f32 %v1639_v53 }
 0x548   :  { %v1119_v10 = vpop.xlane.xlu0 %1118  ;;  %v1348_v39 = vmul.f32 %v3963_v30, %v4800_v52 }
 0x549   :  { %v3965_v63 = vpop.eup %3964  ;;  %v1205_v6 = vmul.f32 0.0078125, %v1119_v10 }
 0x54a   :  { %v1121_v51 = vpop.xlane.xlu1 %1120  ;;  %v1349_v42 = vmul.f32 %v3965_v63, %v4804_v4  ;;  %v1404_v3 = vmul.f32 %v4690_v17, %v1348_v39 }
 0x54b   :  { %v3967_v28 = vpop.eup %3966  ;;  %v1254_v35 = vadd.f32 1e-05, %v1205_v6  ;;  %v1206_v49 = vmul.f32 0.0078125, %v1121_v51 }
 0x54c   :  { %v3969_v38 = vpop.eup %3968  ;;  %v1123_v33 = vpop.xlane.xlu0 %1122  ;;  %v1405_v27 = vmul.f32 %v4690_v17, %v1349_v42  ;;  %v1350_v36 = vmul.f32 %v3967_v28, %v4808_v2  ;;  %v1460_v19 = vadd.f32 %v4698_v21, %v1404_v3 }
 0x54d   :  { %v3971_v34 = vpop.eup %3970  ;;  %3978 = vrsqrt.f32 %v1254_v35  ;;  %v1255_v7 = vadd.f32 1e-05, %v1206_v49  ;;  %v1207_v52 = vmul.f32 0.0078125, %v1123_v33  ;;  %v1656_v10 = vmul.f32 %v3969_v38, %v4814_v29 }
 0x54e   :  { %v3973_v57 = vpop.eup %3972  ;;  %v1642_v54 = vpop.xlane.xlu1 %1641  ;;  %v1461_v4 = vadd.f32 %v4698_v21, %v1405_v27  ;;  %v1351_v11 = vmul.f32 %v3971_v34, %v4812_v40  ;;  %v1406_v58 = vmul.f32 %v4690_v17, %v1350_v36 }
 0x54f   :  { %v3975_v53 = vpop.eup %3974  ;;  %3980 = vrsqrt.f32 %v1255_v7  ;;  %v1256_v30 = vadd.f32 1e-05, %v1207_v52  ;;  %v1657_v2 = vmul.f32 %v3973_v57, %v4818_v45 }
 0x550   :  { %3982 = vrcp.f32 %v1642_v54  ;;  %v1645_v39 = vpop.xlane.xlu0 %1644  ;;  %v1747_v63 = vpack.c.bf16 %v1461_v4, %v1460_v19  ;;  %v1407_v6 = vmul.f32 %v4690_v17, %v1351_v11  ;;  %v1658_v42 = vmul.f32 %v3975_v53, %v4823_v48 }
 0x551   :  { %v3977_v51 = vpop.eup %3976  ;;  %3984 = vrsqrt.f32 %v1256_v30  ;;  %v1663_v3 = vpack.c.bf16 %v1657_v2, %v1656_v10  ;;  %v1462_v35 = vadd.f32 %v4698_v21, %v1406_v58 }
 0x552   :  { %v1659_v40 = vmul.f32 %v3977_v51, %v4828_v55  ;;  %3986 = vrcp.f32 %v1645_v39  ;;  %v1648_v28 = vpop.xlane.xlu1 %1647  ;;  %3624 = vmatprep.subr.bf16.mxu1 %v1747_v63  ;;  %v1463_v29 = vadd.f32 %v4698_v21, %v1407_v6 }
 0x553   :  { %3988 = vrcp.f32 %v1648_v28  ;;  %3616 = vmatprep.mubr.msk.bf16.mxu1 %vm1585_vm1, %v1663_v3 }
 0x554   :  { %v1664_v45 = vpack.c.bf16 %v1659_v40, %v1658_v42  ;;  %v1748_v49 = vpack.c.bf16 %v1463_v29, %v1462_v35 }
 0x556   :  { %3617 = vmatmul.mubr.msk.bf16.vlgmr.msra.gmra.mrb[8].mxu1 %vm1585_vm1, %v1664_v45  ;;  %v674_v45 = vadd.f32 %v4462_v16, %v4390_v25  ;;  %v4942_v16 = vadd.f32 %v4478_v32, %v4390_v25 }
 0x557   :  { %v3979_v38 = vpop.eup %3978  ;;  %3625 = vmatpush3.bf16.xpose.msra.mxu1 %v1747_v63 }
 0x558   :  { %3626 = vmatprep.subr.bf16.mxu1 %v1748_v49  ;;  %v1352_v48 = vmul.f32 %v3979_v38, %v4832_v13 }
 0x559   :  { %v3981_v55 = vpop.eup %3980 }
 0x55a   :  { %v3983_v33 = vpop.eup %3982  ;;  %v1353_v27 = vmul.f32 %v3981_v55, %v4837_v20  ;;  %v1408_v36 = vmul.f32 %v4690_v17, %v1352_v48  ;;  %v678_v48 = vadd.f32 %v4464_v18, %v4390_v25  ;;  %v4946_v18 = vadd.f32 %v4480_v37, %v4390_v25 }
 0x55b   :  { %v3985_v34 = vpop.eup %3984  ;;  %v1660_v19 = vmul.f32 %v3983_v33, %v4850_v24 }
 0x55c   :  { %v3987_v7 = vpop.eup %3986  ;;  %v1409_v52 = vmul.f32 %v4690_v17, %v1353_v27  ;;  %v1354_v57 = vmul.f32 %v3985_v34, %v4844_v56  ;;  %v1464_v13 = vadd.f32 %v4698_v21, %v1408_v36  ;;  %v684_v27 = vadd.f32 %v4470_v23, %v4390_v25 }
 0x55d   :  { %v3989_v54 = vpop.eup %3988  ;;  %v1661_v4 = vmul.f32 %v3987_v7, %v4854_v62  ;;  %v688_v36 = vadd.f32 %v4472_v26, %v4390_v25  ;;  %v4958_v34 = vadd.f32 %v4486_v44, %v4390_v25 }
 0x55e   :  { %v1662_v11 = vmul.f32 %v3989_v54, %v4858_v9  ;;  %v1465_v58 = vadd.f32 %v4698_v21, %v1409_v52  ;;  %v1410_v20 = vmul.f32 %v4690_v17, %v1354_v57  ;;  %v670_v17 = vadd.f32 %v4458_v14, %v4387_v59 }
 0x55f   :  { %3627 = vmatpush3.bf16.xpose.msra.mxu1 %v1748_v49  ;;  %v1665_v53 = vpack.c.bf16 %v1661_v4, %v1660_v19 }
 0x560   :  { %v1666_v30 = vpack.c.bf16 %v1662_v11, %v1662_v11  ;;  %v1749_v10 = vpack.c.bf16 %v1465_v58, %v1464_v13  ;;  %v1466_v56 = vadd.f32 %v4698_v21, %v1410_v20  ;;  %v1754_v21 = vpack.c.bf16 %v670_v17, %v670_v17 }
 0x561   :  { %3620 = vmatprep.mubr.msk.bf16.mxu1 %vm1585_vm1, %v1665_v53 }
 0x562   :  { %3621 = vmatmul.mubr.msk.bf16.gmra.mrb[12].mxu1 %vm1585_vm1, %v1666_v30  ;;  %3628 = vmatprep.subr.bf16.mxu1 %v1749_v10  ;;  %v1750_v24 = vpack.c.bf16 %v1466_v56, %v1466_v56  ;;  %v1913_v62 = vsel %vm1679_vm0, %v1754_v21, 0 }
 0x563   :  { %3632 = vmatprep.mubr.bf16.mxu1 %v4727_v61 }
 0x567   :  { %3629 = vmatpush3.bf16.xpose.msra.mxu1 %v1749_v10 }
 0x568   :  { %3630 = vmatprep.subr.bf16.mxu1 %v1750_v24 }
 0x56f   :  { %3631 = vmatpush3.bf16.xpose.msra.mxu1 %v1750_v24 }
 0x570   :  { %3640 = vmatprep.subr.bf16.mxu1 %v4442_v1 }
 0x576   :  { %3633 = vmatmul.mubr.bf16.vlgmr.msra.gmra.mrb[16].mxu1 %v4737_v12 }
 0x577   :  { %3636 = vmatprep.mubr.bf16.mxu1 %v4751_v5  ;;  %3641 = vmatpush3.bf16.msra.mxu1 %v4442_v1 }
 0x578   :  { %3642 = vmatprep.subr.bf16.mxu1 %v4450_v8 }
 0x57b   :  { %3643 = vmatpush3.bf16.msra.mxu1 %v4450_v8 }
 0x57c   :  { %3644 = vmatprep.subr.bf16.mxu1 %v4460_v15 }
 0x57e   :  { %3637 = vmatmul.mubr.bf16.gmra.mrb[20].mxu1 %v4758_v43 }
 0x57f   :  { %3645 = vmatpush3.bf16.msra.mxu1 %v4460_v15 }
 0x580   :  { %3785 = vmatprep.subr.msk.bf16.mxu1 %vm1679_vm0, %v1754_v21 }
 0x583   :  { %3647 = vmatpush3.bf16.msra.mxu1 %v1913_v62 }
 0x629   :  { %v4908_v1 = vpop.f32.mrb[8].mxu1 }
 0x62a   :  { %v4910_v9 = vpop.f32.mrb[9].mxu1 }
 0x62b   :  { %v4912_v2 = vpop.f32.mrb[10].mxu1 }
 0x62c   :  { %v4914_v14 = vpop.f32.mrb[11].mxu1 }
 0x635   :  { %v4916_v8 = vpop.f32.mrb[12].mxu1 }
 0x636   :  { %v4918_v39 = vpop.f32.mrb[13].mxu1 }
 0x637   :  { %v3623_v63 = vpop.f32.mrb[14].mxu1 }
 0x638   :  { %v4920_v6 = vpop.f32.mrb[15].mxu1 }
 0x649   :  { %v3634_v15 = vpop.f32.mrb[16].mxu1 }
 0x64a   :  { %v1789_v51 = vpop.f32.mrb[17].mxu1  ;;  %v1825_v42 = vsel %vm1585_vm1, %v3634_v15, -inf }
 0x64b   :  { %1826 = vmax.xlane.f32.xlu0 %v1825_v42  ;;  %v3635_v3 = vpop.f32.mrb[18].mxu1  ;;  %v1819_v35 = vsel %vm1585_vm1, %v1789_v51, -inf }
 0x64c   :  { %v1792_v40 = vpop.f32.mrb[19].mxu1  ;;  %v1828_v28 = vsel %vm1585_vm1, %v3635_v3, -inf }
 0x64d   :  { %1829 = vmax.xlane.f32.xlu1 %v1828_v28  ;;  %v1822_v29 = vsel %vm1585_vm1, %v1792_v40, -inf }
 0x64f   :  { %1820 = vmax.xlane.f32.xlu0 %v1819_v35 }
 0x651   :  { %1823 = vmax.xlane.f32.xlu1 %v1822_v29  ;;  %v4928_v49 = vpop.f32.mrb[20].mxu1 }
 0x652   :  { %v4930_v38 = vpop.f32.mrb[21].mxu1  ;;  %v1837_v32 = vsel %vm1585_vm1, %v4928_v49, -inf }
 0x653   :  { %878 = vadd.xlane.f32.xlu0 %v674_v45  ;;  %v3639_v55 = vpop.f32.mrb[22].mxu1  ;;  %v1831_v23 = vsel %vm1585_vm1, %v4930_v38, -inf }
 0x654   :  { %v4934_v33 = vpop.f32.mrb[23].mxu1 }
 0x655   :  { %880 = vadd.xlane.f32.xlu1 %v678_v48  ;;  %v1834_v26 = vsel %vm1585_vm1, %v4934_v33, -inf }
 0x657   :  { %882 = vadd.xlane.f32.xlu0 %v684_v27 }
 0x659   :  { %884 = vadd.xlane.f32.xlu1 %v688_v36 }
 0x65b   :  { %886 = vadd.xlane.f32.xlu0 %v4942_v16 }
 0x65d   :  { %888 = vadd.xlane.f32.xlu1 %v4946_v18 }
 0x65f   :  { %1832 = vmax.xlane.f32.xlu0 %v1831_v23 }
 0x661   :  { %1835 = vmax.xlane.f32.xlu1 %v1834_v26 }
 0x663   :  { %1838 = vmax.xlane.f32.xlu0 %v1837_v32 }
 0x665   :  { %890 = vadd.xlane.f32.xlu1 %v4958_v34 }
 0x6d8   :  { %v1827_v37 = vpop.xlane.xlu0 %1826 }
 0x6d9   :  { %v1842_v57 = vsub.f32 %v3634_v15, %v1827_v37 }
 0x6da   :  { %v1830_v7 = vpop.xlane.xlu1 %1829 }
 0x6db   :  { %v1843_v4 = vsub.f32 %v3635_v3, %v1830_v7  ;;  %v1851_v20 = vmul.f32 1.442695, %v1842_v57 }
 0x6dc   :  { %v1821_v52 = vpop.xlane.xlu0 %1820 }
 0x6dd   :  { %v1840_v54 = vsub.f32 %v1789_v51, %v1821_v52  ;;  %v1853_v44 = vmul.f32 1.442695, %v1843_v4 }
 0x6de   :  { %v1824_v19 = vpop.xlane.xlu1 %1823 }
 0x6df   :  { %v1847_v11 = vmul.f32 1.442695, %v1840_v54  ;;  %v1841_v13 = vsub.f32 %v1792_v40, %v1824_v19 }
 0x6e0   :  { %v879_v58 = vpop.xlane.xlu0 %878 }
 0x6e1   :  { %3990 = vpow2.f32 %v1847_v11  ;;  %v1849_v53 = vmul.f32 1.442695, %v1841_v13  ;;  %v963_v30 = vmul.f32 0.0078125, %v879_v58 }
 0x6e2   :  { %v881_v10 = vpop.xlane.xlu1 %880 }
 0x6e3   :  { %3992 = vpow2.f32 %v1849_v53  ;;  %v964_v56 = vmul.f32 0.0078125, %v881_v10  ;;  %v4961_v24 = vsub.f32 %v674_v45, %v963_v30 }
 0x6e4   :  { %v883_v17 = vpop.xlane.xlu0 %882  ;;  %3994 = vpow2.f32 %v1851_v20 }
 0x6e5   :  { %v965_v21 = vmul.f32 0.0078125, %v883_v17  ;;  %v1061_v62 = vmul.f32 %v4961_v24, %v4961_v24  ;;  %v4965_v63 = vsub.f32 %v678_v48, %v964_v56  ;;  %3996 = vpow2.f32 %v1853_v44 }
 0x6e6   :  { %v885_v15 = vpop.xlane.xlu1 %884 }
 0x6e7   :  { %v966_v51 = vmul.f32 0.0078125, %v885_v15  ;;  %1124 = vadd.xlane.f32.xlu0 %v1061_v62  ;;  %v1062_v42 = vmul.f32 %v4965_v63, %v4965_v63  ;;  %v4969_v3 = vsub.f32 %v684_v27, %v965_v21 }
 0x6e8   :  { %v887_v40 = vpop.xlane.xlu0 %886 }
 0x6e9   :  { %1126 = vadd.xlane.f32.xlu1 %v1062_v42  ;;  %v1063_v28 = vmul.f32 %v4969_v3, %v4969_v3  ;;  %v4973_v35 = vsub.f32 %v688_v36, %v966_v51  ;;  %v967_v26 = vmul.f32 0.0078125, %v887_v40 }
 0x6ea   :  { %v889_v29 = vpop.xlane.xlu1 %888 }
 0x6eb   :  { %v4975_v45 = vpop.eup %3990  ;;  %1128 = vadd.xlane.f32.xlu0 %v1063_v28  ;;  %v1064_v48 = vmul.f32 %v4973_v35, %v4973_v35  ;;  %v968_v7 = vmul.f32 0.0078125, %v889_v29  ;;  %v4993_v13 = vsub.f32 %v4942_v16, %v967_v26 }
 0x6ec   :  { %v1833_v55 = vpop.xlane.xlu0 %1832  ;;  %v1861_v37 = vsel %vm1585_vm1, %v4975_v45, 0.0 }
 0x6ed   :  { %v4979_v23 = vpop.eup %3992  ;;  %v1844_v27 = vsub.f32 %v4930_v38, %v1833_v55  ;;  %1130 = vadd.xlane.f32.xlu1 %v1064_v48  ;;  %v4998_v30 = vsub.f32 %v4946_v18, %v968_v7 }
 0x6ee   :  { %v1836_v32 = vpop.xlane.xlu1 %1835  ;;  %v4984_v36 = vpop.eup %3994  ;;  %v1864_v19 = vsel %vm1585_vm1, %v4979_v23, 0.0 }
 0x6ef   :  { %v1855_v52 = vmul.f32 1.442695, %v1844_v27  ;;  %v1845_v57 = vsub.f32 %v4934_v33, %v1836_v32  ;;  %1862 = vadd.xlane.f32.xlu0 %v1861_v37  ;;  %v4989_v4 = vpop.eup %3996  ;;  %v1867_v20 = vsel %vm1585_vm1, %v4984_v36, 0.0  ;;  %v1066_v44 = vmul.f32 %v4998_v30, %v4998_v30 }
 0x6f0   :  { %v1839_v54 = vpop.xlane.xlu0 %1838  ;;  %v1870_v10 = vsel %vm1585_vm1, %v4989_v4, 0.0 }
 0x6f1   :  { %3998 = vpow2.f32 %v1855_v52  ;;  %v1857_v38 = vmul.f32 1.442695, %v1845_v57  ;;  %v1846_v11 = vsub.f32 %v4928_v49, %v1839_v54  ;;  %1865 = vadd.xlane.f32.xlu1 %v1864_v19  ;;  %v1065_v49 = vmul.f32 %v4993_v13, %v4993_v13 }
 0x6f2   :  { %v891_v58 = vpop.xlane.xlu1 %890 }
 0x6f3   :  { %4000 = vpow2.f32 %v1857_v38  ;;  %v1859_v33 = vmul.f32 1.442695, %v1846_v11  ;;  %v969_v53 = vmul.f32 0.0078125, %v891_v58  ;;  %1868 = vadd.xlane.f32.xlu0 %v1867_v20 }
 0x6f5   :  { %4002 = vpow2.f32 %v1859_v33  ;;  %1871 = vadd.xlane.f32.xlu1 %v1870_v10  ;;  %v5005_v16 = vsub.f32 %v4958_v34, %v969_v53 }
 0x6f7   :  { %1132 = vadd.xlane.f32.xlu0 %v1065_v49  ;;  %v1067_v18 = vmul.f32 %v5005_v16, %v5005_v16  ;;  %v5028_v49 = vld [vmem:[%s6091_s3] ss:$0 sm:$0xff] }
 0x6f9   :  { %1134 = vadd.xlane.f32.xlu1 %v1066_v44 }
 0x6fb   :  { %v5011_v56 = vpop.eup %3998  ;;  %1136 = vadd.xlane.f32.xlu0 %v1067_v18 }
 0x6fc   :  { %v1873_v17 = vsel %vm1585_vm1, %v5011_v56, 0.0 }
 0x6fd   :  { %v5015_v21 = vpop.eup %4000  ;;  %1874 = vadd.xlane.f32.xlu1 %v1873_v17 }
 0x6fe   :  { %v1876_v34 = vsel %vm1585_vm1, %v5015_v21, 0.0 }
 0x6ff   :  { %v5019_v62 = vpop.eup %4002  ;;  %1877 = vadd.xlane.f32.xlu0 %v1876_v34 }
 0x700   :  { %v1879_v15 = vsel %vm1585_vm1, %v5019_v62, 0.0 }
 0x701   :  { %1880 = vadd.xlane.f32.xlu1 %v1879_v15 }
 0x774   :  { %v1125_v51 = vpop.xlane.xlu0 %1124 }
 0x775   :  { %v1208_v42 = vmul.f32 0.0078125, %v1125_v51 }
 0x776   :  { %v1127_v40 = vpop.xlane.xlu1 %1126 }
 0x777   :  { %v1257_v28 = vadd.f32 1e-05, %v1208_v42  ;;  %v1209_v29 = vmul.f32 0.0078125, %v1127_v40 }
 0x778   :  { %v1129_v48 = vpop.xlane.xlu0 %1128 }
 0x779   :  { %4004 = vrsqrt.f32 %v1257_v28  ;;  %v1258_v55 = vadd.f32 1e-05, %v1209_v29  ;;  %v1210_v26 = vmul.f32 0.0078125, %v1129_v48 }
 0x77a   :  { %v1131_v27 = vpop.xlane.xlu1 %1130 }
 0x77b   :  { %4006 = vrsqrt.f32 %v1258_v55  ;;  %v1259_v32 = vadd.f32 1e-05, %v1210_v26  ;;  %v1211_v37 = vmul.f32 0.0078125, %v1131_v27  ;;  %v5036_v55 = vld [vmem:[%s6092_s4] ss:$0 sm:$0xff] }
 0x77c   :  { %v1863_v7 = vpop.xlane.xlu0 %1862 }
 0x77d   :  { %4008 = vrsqrt.f32 %v1259_v32  ;;  %v1260_v52 = vadd.f32 1e-05, %v1211_v37 }
 0x77e   :  { %4010 = vrcp.f32 %v1863_v7  ;;  %v1866_v57 = vpop.xlane.xlu1 %1865 }
 0x77f   :  { %4012 = vrsqrt.f32 %v1260_v52 }
 0x780   :  { %4014 = vrcp.f32 %v1866_v57  ;;  %v1869_v54 = vpop.xlane.xlu0 %1868 }
 0x781   :  { %4016 = vrcp.f32 %v1869_v54 }
 0x782   :  { %v1872_v19 = vpop.xlane.xlu1 %1871 }
 0x783   :  { %v4005_v38 = vpop.eup %4004  ;;  %4018 = vrcp.f32 %v1872_v19 }
 0x784   :  { %v1133_v11 = vpop.xlane.xlu0 %1132  ;;  %v1355_v58 = vmul.f32 %v4005_v38, %v4961_v24 }
 0x785   :  { %v4007_v20 = vpop.eup %4006  ;;  %v1212_v33 = vmul.f32 0.0078125, %v1133_v11 }
 0x786   :  { %v1135_v53 = vpop.xlane.xlu1 %1134  ;;  %v1356_v10 = vmul.f32 %v4007_v20, %v4965_v63  ;;  %v1411_v44 = vmul.f32 %v5028_v49, %v1355_v58 }
 0x787   :  { %v4009_v18 = vpop.eup %4008  ;;  %v1261_v17 = vadd.f32 1e-05, %v1212_v33  ;;  %v1213_v34 = vmul.f32 0.0078125, %v1135_v53 }
 0x788   :  { %v4011_v15 = vpop.eup %4010  ;;  %v1137_v51 = vpop.xlane.xlu0 %1136  ;;  %v1412_v42 = vmul.f32 %v5028_v49, %v1356_v10  ;;  %v1357_v24 = vmul.f32 %v4009_v18, %v4969_v3  ;;  %v1467_v26 = vadd.f32 %v5036_v55, %v1411_v44 }
 0x789   :  { %v4013_v40 = vpop.eup %4012  ;;  %4020 = vrsqrt.f32 %v1261_v17  ;;  %v1262_v28 = vadd.f32 1e-05, %v1213_v34  ;;  %v1214_v63 = vmul.f32 0.0078125, %v1137_v51  ;;  %v1889_v52 = vmul.f32 %v4011_v15, %v4975_v45 }
 0x78a   :  { %v4015_v29 = vpop.eup %4014  ;;  %v1875_v48 = vpop.xlane.xlu1 %1874  ;;  %v1468_v27 = vadd.f32 %v5036_v55, %v1412_v42  ;;  %v1358_v32 = vmul.f32 %v4013_v40, %v4973_v35  ;;  %v1413_v37 = vmul.f32 %v5028_v49, %v1357_v24 }
 0x78b   :  { %v4017_v3 = vpop.eup %4016  ;;  %4022 = vrsqrt.f32 %v1262_v28  ;;  %v1263_v7 = vadd.f32 1e-05, %v1214_v63  ;;  %v1890_v57 = vmul.f32 %v4015_v29, %v4979_v23 }
 0x78c   :  { %4024 = vrcp.f32 %v1875_v48  ;;  %v1878_v54 = vpop.xlane.xlu0 %1877  ;;  %v1979_v19 = vpack.c.bf16 %v1468_v27, %v1467_v26  ;;  %v1414_v38 = vmul.f32 %v5028_v49, %v1358_v32  ;;  %v1891_v58 = vmul.f32 %v4017_v3, %v4984_v36 }
 0x78d   :  { %v4019_v11 = vpop.eup %4018  ;;  %4026 = vrsqrt.f32 %v1263_v7  ;;  %v1896_v20 = vpack.c.bf16 %v1890_v57, %v1889_v52  ;;  %v1469_v53 = vadd.f32 %v5036_v55, %v1413_v37  ;;  %v5084_v7 = vstv %s3479_s20 }
 0x78e   :  { %v1892_v35 = vmul.f32 %v4019_v11, %v4989_v4  ;;  %4028 = vrcp.f32 %v1878_v54  ;;  %3656 = vmatprep.subr.bf16.mxu1 %v1979_v19  ;;  %v1881_v33 = vpop.xlane.xlu1 %1880  ;;  %v1470_v45 = vadd.f32 %v5036_v55, %v1414_v38  ;;  %v5088_v52 = vstv %s3491_s22 }
 0x78f   :  { %3648 = vmatprep.mubr.msk.bf16.mxu1 %vm1585_vm1, %v1896_v20  ;;  %4030 = vrcp.f32 %v1881_v33 }
 0x790   :  { %v1897_v23 = vpack.c.bf16 %v1892_v35, %v1891_v58  ;;  %v1980_v10 = vpack.c.bf16 %v1470_v45, %v1469_v53 }
 0x792   :  { %3649 = vmatmul.mubr.msk.bf16.vlgmr.msra.gmra.mrb[24].mxu1 %vm1585_vm1, %v1897_v23 }
 0x793   :  { %v4021_v44 = vpop.eup %4020  ;;  %3657 = vmatpush3.bf16.xpose.msra.mxu1 %v1979_v19 }
 0x794   :  { %3658 = vmatprep.subr.bf16.mxu1 %v1980_v10  ;;  %v1359_v36 = vmul.f32 %v4021_v44, %v4993_v13 }
 0x795   :  { %v4023_v4 = vpop.eup %4022 }
 0x796   :  { %v4025_v18 = vpop.eup %4024  ;;  %v1360_v17 = vmul.f32 %v4023_v4, %v4998_v30  ;;  %v1415_v34 = vmul.f32 %v5028_v49, %v1359_v36 }
 0x797   :  { %v4027_v15 = vpop.eup %4026  ;;  %v1893_v28 = vmul.f32 %v4025_v18, %v5011_v56 }
 0x798   :  { %v4029_v51 = vpop.eup %4028  ;;  %v1416_v42 = vmul.f32 %v5028_v49, %v1360_v17  ;;  %v1361_v24 = vmul.f32 %v4027_v15, %v5005_v16  ;;  %v1471_v13 = vadd.f32 %v5036_v55, %v1415_v34 }
 0x799   :  { %v4031_v40 = vpop.eup %4030  ;;  %v1894_v63 = vmul.f32 %v4029_v51, %v5015_v21  ;;  %v706_v21 = vadd.f32 %v4488_v46, %v4387_v59  ;;  %v5081_v46 = vstv %s3490_s19 }
 0x79a   :  { %v1895_v29 = vmul.f32 %v4031_v40, %v5019_v62  ;;  %v1472_v48 = vadd.f32 %v5036_v55, %v1416_v42  ;;  %v1417_v30 = vmul.f32 %v5028_v49, %v1361_v24  ;;  %v3173_v54 = vmul.f32 %v4908_v1, %v5081_v46 }
 0x79b   :  { %3659 = vmatpush3.bf16.xpose.msra.mxu1 %v1980_v10  ;;  %v1898_v26 = vpack.c.bf16 %v1894_v63, %v1893_v28  ;;  %v1986_v62 = vpack.c.bf16 %v706_v21, %v706_v21  ;;  %v3171_v11 = vmul.f32 %v5081_v46, %v4910_v9  ;;  %v3174_v35 = vmul.f32 %v4912_v2, %v5081_v46 }
 0x79c   :  { %v1899_v27 = vpack.c.bf16 %v1895_v29, %v1895_v29  ;;  %v1981_v32 = vpack.c.bf16 %v1472_v48, %v1471_v13  ;;  %v1473_v16 = vadd.f32 %v5036_v55, %v1417_v30  ;;  %v3172_v30 = vmul.f32 %v5081_v46, %v4914_v14 }
 0x79d   :  { %3652 = vmatprep.mubr.msk.bf16.mxu1 %vm1585_vm1, %v1898_v26  ;;  %v2145_v37 = vsel %vm1679_vm0, %v1986_v62, 0 }
 0x79e   :  { %3653 = vmatmul.mubr.msk.bf16.gmra.mrb[28].mxu1 %vm1585_vm1, %v1899_v27  ;;  %3660 = vmatprep.subr.bf16.mxu1 %v1981_v32  ;;  %v1982_v56 = vpack.c.bf16 %v1473_v16, %v1473_v16 }
 0x79f   :  { %3664 = vmatprep.mubr.bf16.mxu1 %v4727_v61 }
 0x7a3   :  { %3661 = vmatpush3.bf16.xpose.msra.mxu1 %v1981_v32 }
 0x7a4   :  { %3662 = vmatprep.subr.bf16.mxu1 %v1982_v56 }
 0x7ab   :  { %3663 = vmatpush3.bf16.xpose.msra.mxu1 %v1982_v56 }
 0x7ac   :  { %3672 = vmatprep.subr.bf16.mxu1 %v4468_v22 }
 0x7b2   :  { %3665 = vmatmul.mubr.bf16.vlgmr.msra.gmra.mrb[32].mxu1 %v4737_v12 }
 0x7b3   :  { %3668 = vmatprep.mubr.bf16.mxu1 %v4751_v5  ;;  %3673 = vmatpush3.bf16.msra.mxu1 %v4468_v22  ;;  %v2908_v22 = vstv %s2907_s17  ;;  %s4250_s17 = scalar_lea.vmem %s3345_s13, 32 }
 0x7b4   :  { %3674 = vmatprep.subr.bf16.mxu1 %v4476_v31  ;;  %v2911_v3 = vmul.f32 %v4908_v1, %v2908_v22  ;;  %v2909_v19 = vmul.f32 %v2908_v22, %v4910_v9  ;;  %v2912_v58 = vmul.f32 %v4912_v2, %v2908_v22  ;;  %v2910_v53 = vmul.f32 %v2908_v22, %v4914_v14  ;;  %p4252_p9 = scmp.lt.s32.totalorder %s4250_s17, %s4246_s16 }
 0x7b6   :  { %p4253_p10 = por %p4252_p9, %p4251_p8 }
 0x7b7   :  { %3675 = vmatpush3.bf16.msra.mxu1 %v4476_v31  ;;  %v5079_v31 = vstv %s3484_s18 }
 0x7b8   :  { %3676 = vmatprep.subr.bf16.mxu1 %v4484_v41  ;;  %v3042_v57 = vmul.f32 %v4908_v1, %v5079_v31  ;;  %v3040_v38 = vmul.f32 %v5079_v31, %v4910_v9  ;;  %v3043_v20 = vmul.f32 %v4912_v2, %v5079_v31  ;;  %v3041_v9 = vmul.f32 %v5079_v31, %v4914_v14  ;;  %p4254_p11 = pnand %p4253_p10, %p4247_p7 }
 0x7b9   :  { %v3177_v14 = vmul.f32 %v4916_v8, %v5081_v46 }
 0x7ba   :  { %3669 = vmatmul.mubr.bf16.gmra.mrb[36].mxu1 %v4758_v43 }
 0x7bb   :  { %3677 = vmatpush3.bf16.msra.mxu1 %v4484_v41  ;;  %v5086_v41 = vstv %s3485_s21 }
 0x7bc   :  { %3786 = vmatprep.subr.msk.bf16.mxu1 %vm1679_vm0, %v1986_v62  ;;  %v2915_v62 = vmul.f32 %v4916_v8, %v2908_v22 }
 0x7bf   :  { %3679 = vmatpush3.bf16.msra.mxu1 %v2145_v37  ;;  %v3046_v37 = vmul.f32 %v4916_v8, %v5079_v31 }
 0x865   :  { %v3650_v33 = vpop.f32.mrb[24].mxu1 }
 0x866   :  { %v2920_v1 = vmul.f32 %v3650_v33, %v5084_v7  ;;  %v3051_v45 = vmul.f32 %v3650_v33, %v5086_v41  ;;  %v3182_v23 = vmul.f32 %v3650_v33, %v5088_v52  ;;  %v1949_v10 = vpop.f32.mrb[25].mxu1 }
 0x867   :  { %v2918_v44 = vmul.f32 %v5084_v7, %v1949_v10  ;;  %v3049_v36 = vmul.f32 %v5086_v41, %v1949_v10  ;;  %v3180_v4 = vmul.f32 %v5088_v52, %v1949_v10  ;;  %v3651_v2 = vpop.f32.mrb[26].mxu1 }
 0x868   :  { %v5113_v18 = vadd.f32 %v2920_v1, %v2911_v3  ;;  %v5115_v17 = vadd.f32 %v3051_v45, %v3042_v57  ;;  %v5117_v34 = vadd.f32 %v3182_v23, %v3173_v54  ;;  %v2921_v15 = vmul.f32 %v3651_v2, %v5084_v7  ;;  %v1952_v51 = vpop.f32.mrb[27].mxu1 }
 0x869   :  { %v5120_v42 = vadd.f32 %v2918_v44, %v2909_v19  ;;  %v5122_v24 = vadd.f32 %v3049_v36, %v3040_v38  ;;  %v5124_v40 = vadd.f32 %v3180_v4, %v3171_v11  ;;  %v3052_v28 = vmul.f32 %v3651_v2, %v5086_v41 }
 0x86a   :  { %v5127_v63 = vadd.f32 %v2921_v15, %v2912_v58  ;;  %v3183_v29 = vmul.f32 %v3651_v2, %v5088_v52  ;;  %v2919_v13 = vmul.f32 %v5084_v7, %v1952_v51  ;;  %v3050_v48 = vmul.f32 %v5086_v41, %v1952_v51 }
 0x86b   :  { %v5134_v26 = vadd.f32 %v3052_v28, %v3043_v20  ;;  %v3181_v27 = vmul.f32 %v5088_v52, %v1952_v51  ;;  %v2913_v3 = vmul.f32 %v2908_v22, %v4918_v39  ;;  %v3044_v54 = vmul.f32 %v5079_v31, %v4918_v39 }
 0x86c   :  { %v5137_v32 = vadd.f32 %v3183_v29, %v3174_v35  ;;  %v5139_v16 = vadd.f32 %v2919_v13, %v2910_v53  ;;  %v5141_v56 = vadd.f32 %v3050_v48, %v3041_v9  ;;  %v3175_v20 = vmul.f32 %v5081_v46, %v4918_v39 }
 0x86d   :  { %v5143_v21 = vadd.f32 %v3181_v27, %v3172_v30  ;;  %v2914_v1 = vmul.f32 %v2908_v22, %v4920_v6  ;;  %v3045_v2 = vmul.f32 %v5079_v31, %v4920_v6  ;;  %v3176_v22 = vmul.f32 %v5081_v46, %v4920_v6 }
 0x871   :  { %v3654_v57 = vpop.f32.mrb[28].mxu1 }
 0x872   :  { %v2924_v19 = vmul.f32 %v3654_v57, %v5084_v7  ;;  %v3055_v38 = vmul.f32 %v3654_v57, %v5086_v41  ;;  %v3186_v11 = vmul.f32 %v3654_v57, %v5088_v52  ;;  %v1965_v58 = vpop.f32.mrb[29].mxu1 }
 0x873   :  { %v2922_v35 = vmul.f32 %v5084_v7, %v1965_v58  ;;  %v3053_v8 = vmul.f32 %v5086_v41, %v1965_v58  ;;  %v3184_v33 = vmul.f32 %v5088_v52, %v1965_v58  ;;  %v3655_v53 = vpop.f32.mrb[30].mxu1 }
 0x874   :  { %v5162_v45 = vadd.f32 %v2924_v19, %v2915_v62  ;;  %v5164_v23 = vadd.f32 %v3055_v38, %v3046_v37  ;;  %v5166_v10 = vadd.f32 %v3186_v11, %v3177_v14  ;;  %v1968_v9 = vpop.f32.mrb[31].mxu1  ;;  %v714_v14 = vadd.f32 %v4492_v50, %v4390_v25  ;;  %v6142_v11 = vld [vmem:[#allocation20_spill] sm:$0xff] }
 0x875   :  { %v5168_v44 = vadd.f32 %v2922_v35, %v2913_v3  ;;  %v5170_v36 = vadd.f32 %v3053_v8, %v3044_v54  ;;  %v5172_v39 = vadd.f32 %v3184_v33, %v3175_v20  ;;  %v2923_v4 = vmul.f32 %v5084_v7, %v1968_v9  ;;  %v6143_v20 = vld [vmem:[#allocation21_spill] sm:$0xff] }
 0x876   :  { %v3054_v15 = vmul.f32 %v5086_v41, %v1968_v9  ;;  %v3185_v51 = vmul.f32 %v5088_v52, %v1968_v9  ;;  %v708_v41 = vadd.f32 %v4490_v47, %v4390_v25  ;;  %v718_v54 = vadd.f32 %v4496_v60, %v4390_v25  ;;  %v6141_v47 = vld [vmem:[#allocation18_spill] sm:$0xff] }
 0x877   :  { %v5181_v28 = vadd.f32 %v2923_v4, %v2914_v1  ;;  %v724_v19 = vadd.f32 %v4500_v0, %v4390_v25  ;;  %v5207_v38 = vadd.f32 %v6141_v47, %v4390_v25  ;;  %v5211_v50 = vadd.f32 %v6142_v11, %v4390_v25 }
 0x878   :  { %v5183_v29 = vadd.f32 %v3054_v15, %v3045_v2  ;;  %v5185_v13 = vadd.f32 %v3185_v51, %v3176_v22  ;;  %v5223_v35 = vadd.f32 %v6143_v20, %v4390_v25 }
 0x885   :  { %v3666_v48 = vpop.f32.mrb[32].mxu1 }
 0x886   :  { %v2021_v30 = vpop.f32.mrb[33].mxu1  ;;  %v2057_v7 = vsel %vm1585_vm1, %v3666_v48, -inf }
 0x887   :  { %2058 = vmax.xlane.f32.xlu0 %v2057_v7  ;;  %v3667_v27 = vpop.f32.mrb[34].mxu1  ;;  %v2051_v6 = vsel %vm1585_vm1, %v2021_v30, -inf }
 0x888   :  { %v2024_v31 = vpop.f32.mrb[35].mxu1  ;;  %v2060_v62 = vsel %vm1585_vm1, %v3667_v27, -inf }
 0x889   :  { %2061 = vmax.xlane.f32.xlu1 %v2060_v62  ;;  %v2054_v46 = vsel %vm1585_vm1, %v2024_v31, -inf }
 0x88b   :  { %2052 = vmax.xlane.f32.xlu0 %v2051_v6 }
 0x88d   :  { %2055 = vmax.xlane.f32.xlu1 %v2054_v46  ;;  %v5193_v52 = vpop.f32.mrb[36].mxu1 }
 0x88e   :  { %v5195_v37 = vpop.f32.mrb[37].mxu1  ;;  %v2069_v58 = vsel %vm1585_vm1, %v5193_v52, -inf }
 0x88f   :  { %892 = vadd.xlane.f32.xlu0 %v708_v41  ;;  %v3671_v3 = vpop.f32.mrb[38].mxu1  ;;  %v2063_v60 = vsel %vm1585_vm1, %v5195_v37, -inf }
 0x890   :  { %v5199_v57 = vpop.f32.mrb[39].mxu1 }
 0x891   :  { %894 = vadd.xlane.f32.xlu1 %v714_v14  ;;  %v2066_v0 = vsel %vm1585_vm1, %v5199_v57, -inf }
 0x893   :  { %896 = vadd.xlane.f32.xlu0 %v718_v54 }
 0x895   :  { %898 = vadd.xlane.f32.xlu1 %v724_v19 }
 0x897   :  { %900 = vadd.xlane.f32.xlu0 %v5207_v38 }
 0x899   :  { %902 = vadd.xlane.f32.xlu1 %v5211_v50 }
 0x89b   :  { %2064 = vmax.xlane.f32.xlu0 %v2063_v60 }
 0x89d   :  { %2067 = vmax.xlane.f32.xlu1 %v2066_v0 }
 0x89f   :  { %2070 = vmax.xlane.f32.xlu0 %v2069_v58 }
 0x8a1   :  { %904 = vadd.xlane.f32.xlu1 %v5223_v35 }
 0x914   :  { %v2059_v8 = vpop.xlane.xlu0 %2058 }
 0x915   :  { %v2074_v1 = vsub.f32 %v3666_v48, %v2059_v8 }
 0x916   :  { %v2062_v33 = vpop.xlane.xlu1 %2061 }
 0x917   :  { %v2075_v2 = vsub.f32 %v3667_v27, %v2062_v33  ;;  %v2083_v7 = vmul.f32 1.442695, %v2074_v1 }
 0x918   :  { %v2053_v53 = vpop.xlane.xlu0 %2052 }
 0x919   :  { %v2072_v9 = vsub.f32 %v2021_v30, %v2053_v53  ;;  %v2085_v3 = vmul.f32 1.442695, %v2075_v2 }
 0x91a   :  { %v2056_v4 = vpop.xlane.xlu1 %2055 }
 0x91b   :  { %v2079_v22 = vmul.f32 1.442695, %v2072_v9  ;;  %v2073_v15 = vsub.f32 %v2024_v31, %v2056_v4 }
 0x91c   :  { %v893_v51 = vpop.xlane.xlu0 %892 }
 0x91d   :  { %4032 = vpow2.f32 %v2079_v22  ;;  %v2081_v62 = vmul.f32 1.442695, %v2073_v15  ;;  %v970_v6 = vmul.f32 0.0078125, %v893_v51 }
 0x91e   :  { %v895_v46 = vpop.xlane.xlu1 %894 }
 0x91f   :  { %4034 = vpow2.f32 %v2081_v62  ;;  %v5226_v47 = vsub.f32 %v708_v41, %v970_v6  ;;  %v971_v11 = vmul.f32 0.0078125, %v895_v46 }
 0x920   :  { %v897_v60 = vpop.xlane.xlu0 %896  ;;  %4036 = vpow2.f32 %v2083_v7 }
 0x921   :  { %v5228_v0 = vsub.f32 %v714_v14, %v971_v11  ;;  %v972_v48 = vmul.f32 0.0078125, %v897_v60  ;;  %v1068_v30 = vmul.f32 %v5226_v47, %v5226_v47  ;;  %4038 = vpow2.f32 %v2085_v3 }
 0x922   :  { %v899_v27 = vpop.xlane.xlu1 %898 }
 0x923   :  { %v5232_v31 = vsub.f32 %v718_v54, %v972_v48  ;;  %v973_v58 = vmul.f32 0.0078125, %v899_v27  ;;  %1138 = vadd.xlane.f32.xlu0 %v1068_v30  ;;  %v1069_v20 = vmul.f32 %v5228_v0, %v5228_v0 }
 0x924   :  { %v901_v41 = vpop.xlane.xlu0 %900 }
 0x925   :  { %v5236_v8 = vsub.f32 %v724_v19, %v973_v58  ;;  %1140 = vadd.xlane.f32.xlu1 %v1069_v20  ;;  %v1070_v14 = vmul.f32 %v5232_v31, %v5232_v31  ;;  %v974_v4 = vmul.f32 0.0078125, %v901_v41 }
 0x926   :  { %v903_v33 = vpop.xlane.xlu1 %902 }
 0x927   :  { %v5240_v53 = vpop.eup %4032  ;;  %1142 = vadd.xlane.f32.xlu0 %v1070_v14  ;;  %v1071_v54 = vmul.f32 %v5236_v8, %v5236_v8  ;;  %v975_v51 = vmul.f32 0.0078125, %v903_v33 }
 0x928   :  { %v2065_v1 = vpop.xlane.xlu0 %2064  ;;  %v2093_v22 = vsel %vm1585_vm1, %v5240_v53, 0.0 }
 0x929   :  { %v5244_v9 = vpop.eup %4034  ;;  %v2076_v2 = vsub.f32 %v5195_v37, %v2065_v1  ;;  %1144 = vadd.xlane.f32.xlu1 %v1071_v54  ;;  %v5257_v37 = vsub.f32 %v5207_v38, %v974_v4 }
 0x92a   :  { %v2068_v19 = vpop.xlane.xlu1 %2067  ;;  %v5249_v15 = vpop.eup %4036  ;;  %v2096_v46 = vsel %vm1585_vm1, %v5244_v9, 0.0 }
 0x92b   :  { %v2087_v7 = vmul.f32 1.442695, %v2076_v2  ;;  %v2077_v62 = vsub.f32 %v5199_v57, %v2068_v19  ;;  %2094 = vadd.xlane.f32.xlu0 %v2093_v22  ;;  %v5254_v3 = vpop.eup %4038  ;;  %v2099_v30 = vsel %vm1585_vm1, %v5249_v15, 0.0  ;;  %v5263_v57 = vsub.f32 %v5211_v50, %v975_v51 }
 0x92c   :  { %v2071_v6 = vpop.xlane.xlu0 %2070  ;;  %v2102_v38 = vsel %vm1585_vm1, %v5254_v3, 0.0 }
 0x92d   :  { %4040 = vpow2.f32 %v2087_v7  ;;  %v2089_v11 = vmul.f32 1.442695, %v2077_v62  ;;  %v2078_v60 = vsub.f32 %v5193_v52, %v2071_v6  ;;  %2097 = vadd.xlane.f32.xlu1 %v2096_v46  ;;  %v1072_v52 = vmul.f32 %v5257_v37, %v5257_v37 }
 0x92e   :  { %v905_v48 = vpop.xlane.xlu1 %904  ;;  %v1073_v50 = vmul.f32 %v5263_v57, %v5263_v57 }
 0x92f   :  { %4042 = vpow2.f32 %v2089_v11  ;;  %v2091_v27 = vmul.f32 1.442695, %v2078_v60  ;;  %v976_v58 = vmul.f32 0.0078125, %v905_v48  ;;  %2100 = vadd.xlane.f32.xlu0 %v2099_v30 }
 0x931   :  { %4044 = vpow2.f32 %v2091_v27  ;;  %v5268_v20 = vsub.f32 %v5223_v35, %v976_v58  ;;  %2103 = vadd.xlane.f32.xlu1 %v2102_v38 }
 0x933   :  { %1146 = vadd.xlane.f32.xlu0 %v1072_v52  ;;  %v1074_v41 = vmul.f32 %v5268_v20, %v5268_v20 }
 0x935   :  { %1148 = vadd.xlane.f32.xlu1 %v1073_v50 }
 0x937   :  { %v5276_v14 = vpop.eup %4040  ;;  %1150 = vadd.xlane.f32.xlu0 %v1074_v41 }
 0x938   :  { %v2105_v33 = vsel %vm1585_vm1, %v5276_v14, 0.0 }
 0x939   :  { %v5280_v35 = vpop.eup %4042  ;;  %2106 = vadd.xlane.f32.xlu1 %v2105_v33 }
 0x93a   :  { %v2108_v54 = vsel %vm1585_vm1, %v5280_v35, 0.0 }
 0x93b   :  { %v5284_v1 = vpop.eup %4044  ;;  %2109 = vadd.xlane.f32.xlu0 %v2108_v54 }
 0x93c   :  { %v2111_v4 = vsel %vm1585_vm1, %v5284_v1, 0.0 }
 0x93d   :  { %2112 = vadd.xlane.f32.xlu1 %v2111_v4 }
 0x9b0   :  { %v1139_v2 = vpop.xlane.xlu0 %1138 }
 0x9b1   :  { %v1215_v19 = vmul.f32 0.0078125, %v1139_v2 }
 0x9b2   :  { %v1141_v22 = vpop.xlane.xlu1 %1140 }
 0x9b3   :  { %v1264_v51 = vadd.f32 1e-05, %v1215_v19  ;;  %v1216_v7 = vmul.f32 0.0078125, %v1141_v22 }
 0x9b4   :  { %v1143_v62 = vpop.xlane.xlu0 %1142 }
 0x9b5   :  { %4046 = vrsqrt.f32 %v1264_v51  ;;  %v1265_v6 = vadd.f32 1e-05, %v1216_v7  ;;  %v1217_v46 = vmul.f32 0.0078125, %v1143_v62 }
 0x9b6   :  { %v1145_v11 = vpop.xlane.xlu1 %1144 }
 0x9b7   :  { %4048 = vrsqrt.f32 %v1265_v6  ;;  %v1266_v60 = vadd.f32 1e-05, %v1217_v46  ;;  %v1218_v48 = vmul.f32 0.0078125, %v1145_v11 }
 0x9b8   :  { %v2095_v30 = vpop.xlane.xlu0 %2094 }
 0x9b9   :  { %4050 = vrsqrt.f32 %v1266_v60  ;;  %v1267_v27 = vadd.f32 1e-05, %v1218_v48 }
 0x9ba   :  { %4052 = vrcp.f32 %v2095_v30  ;;  %v2098_v58 = vpop.xlane.xlu1 %2097 }
 0x9bb   :  { %4054 = vrsqrt.f32 %v1267_v27 }
 0x9bc   :  { %4056 = vrcp.f32 %v2098_v58  ;;  %v2101_v38 = vpop.xlane.xlu0 %2100 }
 0x9bd   :  { %4058 = vrcp.f32 %v2101_v38 }
 0x9be   :  { %v2104_v52 = vpop.xlane.xlu1 %2103 }
 0x9bf   :  { %v4047_v50 = vpop.eup %4046  ;;  %4060 = vrcp.f32 %v2104_v52 }
 0x9c0   :  { %v1147_v41 = vpop.xlane.xlu0 %1146  ;;  %v1362_v33 = vmul.f32 %v4047_v50, %v5226_v47 }
 0x9c1   :  { %v4049_v54 = vpop.eup %4048  ;;  %v1219_v4 = vmul.f32 0.0078125, %v1147_v41 }
 0x9c2   :  { %v1149_v2 = vpop.xlane.xlu1 %1148  ;;  %v1363_v19 = vmul.f32 %v4049_v54, %v5228_v0  ;;  %v1418_v22 = vmul.f32 %v5028_v49, %v1362_v33 }
 0x9c3   :  { %v4051_v51 = vpop.eup %4050  ;;  %v1268_v7 = vadd.f32 1e-05, %v1219_v4  ;;  %v1220_v62 = vmul.f32 0.0078125, %v1149_v2 }
 0x9c4   :  { %v4053_v6 = vpop.eup %4052  ;;  %v1151_v46 = vpop.xlane.xlu0 %1150  ;;  %v1419_v11 = vmul.f32 %v5028_v49, %v1363_v19  ;;  %v1364_v60 = vmul.f32 %v4051_v51, %v5232_v31  ;;  %v1474_v38 = vadd.f32 %v5036_v55, %v1418_v22 }
 0x9c5   :  { %v4055_v48 = vpop.eup %4054  ;;  %4062 = vrsqrt.f32 %v1268_v7  ;;  %v1269_v30 = vadd.f32 1e-05, %v1220_v62  ;;  %v1221_v47 = vmul.f32 0.0078125, %v1151_v46  ;;  %v2121_v54 = vmul.f32 %v4053_v6, %v5240_v53 }
 0x9c6   :  { %v4057_v27 = vpop.eup %4056  ;;  %v2107_v58 = vpop.xlane.xlu1 %2106  ;;  %v1475_v0 = vadd.f32 %v5036_v55, %v1419_v11  ;;  %v1365_v52 = vmul.f32 %v4055_v48, %v5236_v8  ;;  %v1420_v50 = vmul.f32 %v5028_v49, %v1364_v60 }
 0x9c7   :  { %v4059_v41 = vpop.eup %4058  ;;  %4064 = vrsqrt.f32 %v1269_v30  ;;  %v1270_v33 = vadd.f32 1e-05, %v1221_v47  ;;  %v2122_v31 = vmul.f32 %v4057_v27, %v5244_v9 }
 0x9c8   :  { %4066 = vrcp.f32 %v2107_v58  ;;  %v2110_v4 = vpop.xlane.xlu0 %2109  ;;  %v2211_v2 = vpack.c.bf16 %v1475_v0, %v1474_v38  ;;  %v1421_v19 = vmul.f32 %v5028_v49, %v1365_v52  ;;  %v2123_v22 = vmul.f32 %v4059_v41, %v5249_v15 }
 0x9c9   :  { %v4061_v51 = vpop.eup %4060  ;;  %4068 = vrsqrt.f32 %v1270_v33  ;;  %v2128_v7 = vpack.c.bf16 %v2122_v31, %v2121_v54  ;;  %v1476_v46 = vadd.f32 %v5036_v55, %v1420_v50 }
 0x9ca   :  { %v2124_v8 = vmul.f32 %v4061_v51, %v5254_v3  ;;  %4070 = vrcp.f32 %v2110_v4  ;;  %3688 = vmatprep.subr.bf16.mxu1 %v2211_v2  ;;  %v2113_v62 = vpop.xlane.xlu1 %2112  ;;  %v1477_v53 = vadd.f32 %v5036_v55, %v1421_v19 }
 0x9cb   :  { %3680 = vmatprep.mubr.msk.bf16.mxu1 %vm1585_vm1, %v2128_v7  ;;  %4072 = vrcp.f32 %v2113_v62  ;;  %v3064_v7 = vstv %s3486_s24 }
 0x9cc   :  { %v2129_v9 = vpack.c.bf16 %v2124_v8, %v2123_v22  ;;  %v2212_v6 = vpack.c.bf16 %v1477_v53, %v1476_v46  ;;  %v2933_v22 = vstv %s3480_s23  ;;  %v3195_v8 = vstv %s3492_s26 }
 0x9ce   :  { %3681 = vmatmul.mubr.msk.bf16.vlgmr.msra.gmra.mrb[40].mxu1 %vm1585_vm1, %v2129_v9 }
 0x9cf   :  { %v4063_v11 = vpop.eup %4062  ;;  %3689 = vmatpush3.bf16.xpose.msra.mxu1 %v2211_v2 }
 0x9d0   :  { %3690 = vmatprep.subr.bf16.mxu1 %v2212_v6  ;;  %v1366_v15 = vmul.f32 %v4063_v11, %v5257_v37 }
 0x9d1   :  { %v4065_v3 = vpop.eup %4064 }
 0x9d2   :  { %v4067_v60 = vpop.eup %4066  ;;  %v1367_v48 = vmul.f32 %v4065_v3, %v5263_v57  ;;  %v1422_v30 = vmul.f32 %v5028_v49, %v1366_v15 }
 0x9d3   :  { %v4069_v47 = vpop.eup %4068  ;;  %v2125_v52 = vmul.f32 %v4067_v60, %v5276_v14 }
 0x9d4   :  { %v4071_v27 = vpop.eup %4070  ;;  %v1423_v58 = vmul.f32 %v5028_v49, %v1367_v48  ;;  %v1368_v38 = vmul.f32 %v4069_v47, %v5268_v20  ;;  %v1478_v37 = vadd.f32 %v5036_v55, %v1422_v30 }
 0x9d5   :  { %v4073_v0 = vpop.eup %4072  ;;  %v2126_v50 = vmul.f32 %v4071_v27, %v5280_v35  ;;  %v6144_v35 = vld [vmem:[#allocation17_spill] sm:$0xff] }
 0x9d6   :  { %v2127_v41 = vmul.f32 %v4073_v0, %v5284_v1  ;;  %v1479_v33 = vadd.f32 %v5036_v55, %v1423_v58  ;;  %v1424_v57 = vmul.f32 %v5028_v49, %v1368_v38  ;;  %v6145_v49 = vld [vmem:[#allocation19_spill] sm:$0xff]  ;;  %v6146_v1 = vld [vmem:[#allocation22_spill] sm:$0xff] }
 0x9d7   :  { %3691 = vmatpush3.bf16.xpose.msra.mxu1 %v2212_v6  ;;  %v2130_v54 = vpack.c.bf16 %v2126_v50, %v2125_v52  ;;  %v740_v2 = vadd.f32 %v6146_v1, %v4387_v59 }
 0x9d8   :  { %v2131_v31 = vpack.c.bf16 %v2127_v41, %v2127_v41  ;;  %v2213_v4 = vpack.c.bf16 %v1479_v33, %v1478_v37  ;;  %v1480_v20 = vadd.f32 %v5036_v55, %v1424_v57  ;;  %v6147_v55 = vld [vmem:[#allocation23_spill] sm:$0xff] }
 0x9d9   :  { %3684 = vmatprep.mubr.msk.bf16.mxu1 %vm1585_vm1, %v2130_v54  ;;  %v2218_v19 = vpack.c.bf16 %v740_v2, %v740_v2 }
 0x9da   :  { %3685 = vmatmul.mubr.msk.bf16.gmra.mrb[44].mxu1 %vm1585_vm1, %v2131_v31  ;;  %3692 = vmatprep.subr.bf16.mxu1 %v2213_v4  ;;  %v2214_v14 = vpack.c.bf16 %v1480_v20, %v1480_v20 }
 0x9db   :  { %3696 = vmatprep.mubr.bf16.mxu1 %v4727_v61  ;;  %v2377_v51 = vsel %vm1679_vm0, %v2218_v19, 0 }
 0x9df   :  { %3693 = vmatpush3.bf16.xpose.msra.mxu1 %v2213_v4 }
 0x9e0   :  { %3694 = vmatprep.subr.bf16.mxu1 %v2214_v14 }
 0x9e7   :  { %3695 = vmatpush3.bf16.xpose.msra.mxu1 %v2214_v14 }
 0x9e8   :  { %3704 = vmatprep.subr.bf16.mxu1 %v6144_v35 }
 0x9ee   :  { %3697 = vmatmul.mubr.bf16.vlgmr.msra.gmra.mrb[48].mxu1 %v4737_v12 }
 0x9ef   :  { %3700 = vmatprep.mubr.bf16.mxu1 %v4751_v5  ;;  %3705 = vmatpush3.bf16.msra.mxu1 %v6144_v35 }
 0x9f0   :  { %3706 = vmatprep.subr.bf16.mxu1 %v6145_v49 }
 0x9f3   :  { %3707 = vmatpush3.bf16.msra.mxu1 %v6145_v49 }
 0x9f4   :  { %3708 = vmatprep.subr.bf16.mxu1 %v6147_v55 }
 0x9f6   :  { %3701 = vmatmul.mubr.bf16.gmra.mrb[52].mxu1 %v4758_v43 }
 0x9f7   :  { %3709 = vmatpush3.bf16.msra.mxu1 %v6147_v55 }
 0x9f8   :  { %3787 = vmatprep.subr.msk.bf16.mxu1 %vm1679_vm0, %v2218_v19 }
 0x9fb   :  { %3711 = vmatpush3.bf16.msra.mxu1 %v2377_v51 }
 0xaa1   :  { %v3682_v62 = vpop.f32.mrb[40].mxu1 }
 0xaa2   :  { %v2936_v46 = vmul.f32 %v3682_v62, %v2933_v22  ;;  %v3067_v53 = vmul.f32 %v3682_v62, %v3064_v7  ;;  %v3198_v9 = vmul.f32 %v3682_v62, %v3195_v8  ;;  %v2181_v6 = vpop.f32.mrb[41].mxu1 }
 0xaa3   :  { %v2934_v11 = vmul.f32 %v2933_v22, %v2181_v6  ;;  %v3065_v15 = vmul.f32 %v3064_v7, %v2181_v6  ;;  %v3196_v3 = vmul.f32 %v3195_v8, %v2181_v6  ;;  %v3683_v60 = vpop.f32.mrb[42].mxu1  ;;  %v6154_v6 = vld [vmem:[#allocation25_spill] sm:$0xff] }
 0xaa4   :  { %v5335_v48 = vadd.f32 %v2936_v46, %v5113_v18  ;;  %v5338_v30 = vadd.f32 %v3067_v53, %v5115_v17  ;;  %v5341_v47 = vadd.f32 %v3198_v9, %v5117_v34  ;;  %v2937_v27 = vmul.f32 %v3683_v60, %v2933_v22  ;;  %v2184_v58 = vpop.f32.mrb[43].mxu1 }
 0xaa5   :  { %v5344_v38 = vadd.f32 %v2934_v11, %v5120_v42  ;;  %v5347_v0 = vadd.f32 %v3065_v15, %v5122_v24  ;;  %v5350_v52 = vadd.f32 %v3196_v3, %v5124_v40  ;;  %v3068_v50 = vmul.f32 %v3683_v60, %v3064_v7 }
 0xaa6   :  { %v5353_v18 = vadd.f32 %v2937_v27, %v5127_v63  ;;  %v3199_v17 = vmul.f32 %v3683_v60, %v3195_v8  ;;  %v2935_v41 = vmul.f32 %v2933_v22, %v2184_v58  ;;  %v3066_v37 = vmul.f32 %v3064_v7, %v2184_v58  ;;  %v6155_v60 = vld [vmem:[#allocation27_spill] sm:$0xff] }
 0xaa7   :  { %v5356_v34 = vadd.f32 %v3068_v50, %v5134_v26  ;;  %v3197_v33 = vmul.f32 %v3195_v8, %v2184_v58  ;;  %v748_v11 = vadd.f32 %v6154_v6, %v4390_v25  ;;  %v754_v27 = vadd.f32 %v6155_v60, %v4390_v25  ;;  %v6156_v58 = vld [vmem:[#allocation28_spill] sm:$0xff] }
 0xaa8   :  { %v5359_v42 = vadd.f32 %v3199_v17, %v5137_v32  ;;  %v5362_v24 = vadd.f32 %v2935_v41, %v5139_v16  ;;  %v5365_v40 = vadd.f32 %v3066_v37, %v5141_v56  ;;  %v758_v50 = vadd.f32 %v6156_v58, %v4390_v25  ;;  %v6157_v17 = vld [vmem:[#allocation30_spill] sm:$0xff]  ;;  %v6158_v37 = vld [vmem:[#allocation31_spill] sm:$0xff] }
 0xaa9   :  { %v5368_v57 = vadd.f32 %v3197_v33, %v5143_v21  ;;  %v5417_v41 = vadd.f32 %v6157_v17, %v4390_v25  ;;  %v5421_v33 = vadd.f32 %v6158_v37, %v4390_v25 }
 0xaad   :  { %v3686_v63 = vpop.f32.mrb[44].mxu1 }
 0xaae   :  { %v2940_v54 = vmul.f32 %v3686_v63, %v2933_v22  ;;  %v3071_v31 = vmul.f32 %v3686_v63, %v3064_v7  ;;  %v3202_v4 = vmul.f32 %v3686_v63, %v3195_v8  ;;  %v2197_v20 = vpop.f32.mrb[45].mxu1  ;;  %v6159_v63 = vld [vmem:[#allocation35_spill] sm:$0xff] }
 0xaaf   :  { %v2938_v26 = vmul.f32 %v2933_v22, %v2197_v20  ;;  %v3069_v14 = vmul.f32 %v3064_v7, %v2197_v20  ;;  %v3200_v35 = vmul.f32 %v3195_v8, %v2197_v20  ;;  %v3687_v49 = vpop.f32.mrb[46].mxu1 }
 0xab0   :  { %v5371_v32 = vadd.f32 %v2940_v54, %v5162_v45  ;;  %v5374_v16 = vadd.f32 %v3071_v31, %v5164_v23  ;;  %v5377_v56 = vadd.f32 %v3202_v4, %v5166_v10  ;;  %v2200_v21 = vpop.f32.mrb[47].mxu1  ;;  %v5426_v54 = vadd.f32 %v6159_v63, %v4390_v25  ;;  %v6160_v31 = vld [vmem:[#allocation36_spill] sm:$0xff] }
 0xab1   :  { %v5380_v1 = vadd.f32 %v2938_v26, %v5168_v44  ;;  %v5383_v2 = vadd.f32 %v3069_v14, %v5170_v36  ;;  %v5386_v55 = vadd.f32 %v3200_v35, %v5172_v39  ;;  %v2939_v19 = vmul.f32 %v2933_v22, %v2200_v21  ;;  %v6161_v26 = vld [vmem:[#allocation33_spill] sm:$0xff] }
 0xab2   :  { %v3070_v51 = vmul.f32 %v3064_v7, %v2200_v21  ;;  %v3201_v45 = vmul.f32 %v3195_v8, %v2200_v21  ;;  %v5431_v4 = vadd.f32 %v6160_v31, %v4390_v25  ;;  %v5439_v14 = vadd.f32 %v6161_v26, %v4390_v25  ;;  %v6162_v21 = vld [vmem:[#allocation37_spill] sm:$0xff] }
 0xab3   :  { %6148 = vst [vmem:[#allocation18_spill] sm:$0xff] %v5383_v2  ;;  %6149 = vst [vmem:[#allocation20_spill] sm:$0xff] %v5386_v55  ;;  %v5389_v62 = vadd.f32 %v2939_v19, %v5181_v28  ;;  %v5448_v19 = vadd.f32 %v6162_v21, %v4390_v25 }
 0xab4   :  { %v5392_v23 = vadd.f32 %v3070_v51, %v5183_v29  ;;  %v5395_v10 = vadd.f32 %v3201_v45, %v5185_v13  ;;  %v6153_v29 = vld [vmem:[#allocation24_spill] sm:$0xff]  ;;  %v6163_v51 = vld [vmem:[#allocation39_spill] sm:$0xff] }
 0xab5   :  { %6150 = vst [vmem:[#allocation21_spill] sm:$0xff] %v5389_v62  ;;  %v744_v8 = vadd.f32 %v6153_v29, %v4390_v25  ;;  %v5452_v45 = vadd.f32 %v6163_v51, %v4390_v25  ;;  %v6166_v29 = vld [vmem:[#allocation43_spill] sm:$0xff] }
 0xab6   :  { %6151 = vst [vmem:[#allocation17_spill] sm:$0xff] %v5392_v23  ;;  %6152 = vst [vmem:[#allocation19_spill] sm:$0xff] %v5395_v10  ;;  %v5467_v6 = vadd.f32 %v6166_v29, %v4390_v25 }
 0xac1   :  { %v3698_v44 = vpop.f32.mrb[48].mxu1 }
 0xac2   :  { %v2253_v46 = vpop.f32.mrb[49].mxu1  ;;  %v2289_v36 = vsel %vm1585_vm1, %v3698_v44, -inf }
 0xac3   :  { %2290 = vmax.xlane.f32.xlu0 %v2289_v36  ;;  %v3699_v53 = vpop.f32.mrb[50].mxu1  ;;  %v2283_v7 = vsel %vm1585_vm1, %v2253_v46, -inf  ;;  %v6164_v36 = vld [vmem:[#allocation40_spill] sm:$0xff] }
 0xac4   :  { %v2256_v39 = vpop.f32.mrb[51].mxu1  ;;  %v2292_v22 = vsel %vm1585_vm1, %v3699_v53, -inf }
 0xac5   :  { %2293 = vmax.xlane.f32.xlu1 %v2292_v22  ;;  %v2286_v28 = vsel %vm1585_vm1, %v2256_v39, -inf  ;;  %v5457_v22 = vadd.f32 %v6164_v36, %v4390_v25 }
 0xac7   :  { %2284 = vmax.xlane.f32.xlu0 %v2283_v7  ;;  %v6165_v7 = vld [vmem:[#allocation42_spill] sm:$0xff] }
 0xac9   :  { %2287 = vmax.xlane.f32.xlu1 %v2286_v28  ;;  %v5403_v13 = vpop.f32.mrb[52].mxu1  ;;  %v5462_v28 = vadd.f32 %v6165_v7, %v4390_v25 }
 0xaca   :  { %v5405_v9 = vpop.f32.mrb[53].mxu1  ;;  %v2301_v20 = vsel %vm1585_vm1, %v5403_v13, -inf }
 0xacb   :  { %906 = vadd.xlane.f32.xlu0 %v744_v8  ;;  %v3703_v15 = vpop.f32.mrb[54].mxu1  ;;  %v2295_v35 = vsel %vm1585_vm1, %v5405_v9, -inf }
 0xacc   :  { %v5409_v3 = vpop.f32.mrb[55].mxu1 }
 0xacd   :  { %908 = vadd.xlane.f32.xlu1 %v748_v11  ;;  %v2298_v49 = vsel %vm1585_vm1, %v5409_v3, -inf }
 0xacf   :  { %910 = vadd.xlane.f32.xlu0 %v754_v27 }
 0xad1   :  { %912 = vadd.xlane.f32.xlu1 %v758_v50 }
 0xad3   :  { %914 = vadd.xlane.f32.xlu0 %v5417_v41 }
 0xad5   :  { %916 = vadd.xlane.f32.xlu1 %v5421_v33 }
 0xad7   :  { %920 = vadd.xlane.f32.xlu0 %v5426_v54 }
 0xad9   :  { %922 = vadd.xlane.f32.xlu1 %v5431_v4 }
 0xadb   :  { %2302 = vmax.xlane.f32.xlu0 %v2301_v20 }
 0xadd   :  { %918 = vadd.xlane.f32.xlu1 %v5439_v14 }
 0xadf   :  { %2296 = vmax.xlane.f32.xlu0 %v2295_v35 }
 0xae1   :  { %2299 = vmax.xlane.f32.xlu1 %v2298_v49 }
 0xae3   :  { %924 = vadd.xlane.f32.xlu0 %v5448_v19 }
 0xae5   :  { %926 = vadd.xlane.f32.xlu1 %v5452_v45 }
 0xae7   :  { %928 = vadd.xlane.f32.xlu0 %v5457_v22 }
 0xae9   :  { %930 = vadd.xlane.f32.xlu1 %v5462_v28 }
 0xaeb   :  { %932 = vadd.xlane.f32.xlu0 %v5467_v6 }
 0xb50   :  { %v2291_v15 = vpop.xlane.xlu0 %2290 }
 0xb51   :  { %v2306_v60 = vsub.f32 %v3698_v44, %v2291_v15 }
 0xb52   :  { %v2294_v58 = vpop.xlane.xlu1 %2293 }
 0xb53   :  { %v2307_v17 = vsub.f32 %v3699_v53, %v2294_v58  ;;  %v2315_v63 = vmul.f32 1.442695, %v2306_v60 }
 0xb54   :  { %v2285_v37 = vpop.xlane.xlu0 %2284 }
 0xb55   :  { %v2304_v31 = vsub.f32 %v2253_v46, %v2285_v37  ;;  %v2317_v26 = vmul.f32 1.442695, %v2307_v17  ;;  %4074 = vpow2.f32 %v2315_v63 }
 0xb56   :  { %v2288_v20 = vpop.xlane.xlu1 %2287 }
 0xb57   :  { %v2305_v35 = vsub.f32 %v2256_v39, %v2288_v20  ;;  %v2311_v21 = vmul.f32 1.442695, %v2304_v31  ;;  %4076 = vpow2.f32 %v2317_v26 }
 0xb58   :  { %v907_v49 = vpop.xlane.xlu0 %906 }
 0xb59   :  { %v977_v51 = vmul.f32 0.0078125, %v907_v49  ;;  %v2313_v36 = vmul.f32 1.442695, %v2305_v35  ;;  %4078 = vpow2.f32 %v2311_v21 }
 0xb5a   :  { %v909_v25 = vpop.xlane.xlu1 %908 }
 0xb5b   :  { %v5471_v7 = vsub.f32 %v744_v8, %v977_v51  ;;  %v978_v29 = vmul.f32 0.0078125, %v909_v25  ;;  %4080 = vpow2.f32 %v2313_v36 }
 0xb5c   :  { %v911_v10 = vpop.xlane.xlu0 %910 }
 0xb5d   :  { %v5473_v44 = vsub.f32 %v748_v11, %v978_v29  ;;  %v979_v53 = vmul.f32 0.0078125, %v911_v10  ;;  %v1075_v46 = vmul.f32 %v5471_v7, %v5471_v7 }
 0xb5e   :  { %v913_v15 = vpop.xlane.xlu1 %912 }
 0xb5f   :  { %v5477_v39 = vsub.f32 %v754_v27, %v979_v53  ;;  %v980_v60 = vmul.f32 0.0078125, %v913_v15  ;;  %1152 = vadd.xlane.f32.xlu1 %v1075_v46  ;;  %v1076_v58 = vmul.f32 %v5473_v44, %v5473_v44  ;;  %v5485_v37 = vpop.eup %4074 }
 0xb60   :  { %v915_v8 = vpop.xlane.xlu0 %914 }
 0xb61   :  { %v5481_v17 = vsub.f32 %v758_v50, %v980_v60  ;;  %1154 = vadd.xlane.f32.xlu0 %v1076_v58  ;;  %v1077_v11 = vmul.f32 %v5477_v39, %v5477_v39  ;;  %v5489_v31 = vpop.eup %4076  ;;  %v981_v20 = vmul.f32 0.0078125, %v915_v8  ;;  %v2331_v50 = vsel %vm1585_vm1, %v5485_v37, 0.0 }
 0xb62   :  { %v917_v10 = vpop.xlane.xlu1 %916  ;;  %v2334_v51 = vsel %vm1585_vm1, %v5489_v31, 0.0 }
 0xb63   :  { %1156 = vadd.xlane.f32.xlu1 %v1077_v11  ;;  %v1078_v27 = vmul.f32 %v5481_v17, %v5481_v17  ;;  %v5493_v35 = vpop.eup %4078  ;;  %v982_v49 = vmul.f32 0.0078125, %v917_v10  ;;  %v5500_v36 = vsub.f32 %v5417_v41, %v981_v20 }
 0xb64   :  { %v921_v63 = vpop.xlane.xlu0 %920  ;;  %v2325_v46 = vsel %vm1585_vm1, %v5493_v35, 0.0 }
 0xb65   :  { %1158 = vadd.xlane.f32.xlu0 %v1078_v27  ;;  %v5497_v25 = vpop.eup %4080  ;;  %v984_v29 = vmul.f32 0.0078125, %v921_v63  ;;  %v5505_v15 = vsub.f32 %v5421_v33, %v982_v49  ;;  %v1079_v27 = vmul.f32 %v5500_v36, %v5500_v36 }
 0xb66   :  { %v923_v26 = vpop.xlane.xlu1 %922  ;;  %v2328_v8 = vsel %vm1585_vm1, %v5497_v25, 0.0 }
 0xb67   :  { %2332 = vadd.xlane.f32.xlu1 %v2331_v50  ;;  %v985_v60 = vmul.f32 0.0078125, %v923_v26  ;;  %v5510_v11 = vsub.f32 %v5426_v54, %v984_v29  ;;  %v1080_v54 = vmul.f32 %v5505_v15, %v5505_v15 }
 0xb68   :  { %v2303_v21 = vpop.xlane.xlu0 %2302 }
 0xb69   :  { %2335 = vadd.xlane.f32.xlu0 %v2334_v51  ;;  %v2310_v63 = vsub.f32 %v5403_v13, %v2303_v21  ;;  %v5517_v20 = vsub.f32 %v5431_v4, %v985_v60  ;;  %v1082_v13 = vmul.f32 %v5510_v11, %v5510_v11 }
 0xb6a   :  { %v919_v53 = vpop.xlane.xlu1 %918 }
 0xb6b   :  { %2326 = vadd.xlane.f32.xlu1 %v2325_v46  ;;  %v983_v41 = vmul.f32 0.0078125, %v919_v53  ;;  %v2323_v21 = vmul.f32 1.442695, %v2310_v63  ;;  %v1083_v46 = vmul.f32 %v5517_v20, %v5517_v20 }
 0xb6c   :  { %v2297_v58 = vpop.xlane.xlu0 %2296 }
 0xb6d   :  { %v2308_v10 = vsub.f32 %v5405_v9, %v2297_v58  ;;  %2329 = vadd.xlane.f32.xlu0 %v2328_v8  ;;  %v5523_v9 = vsub.f32 %v5439_v14, %v983_v41 }
 0xb6e   :  { %v2300_v33 = vpop.xlane.xlu1 %2299 }
 0xb6f   :  { %v2319_v26 = vmul.f32 1.442695, %v2308_v10  ;;  %v2309_v50 = vsub.f32 %v5409_v3, %v2300_v33  ;;  %1160 = vadd.xlane.f32.xlu1 %v1079_v27  ;;  %v1081_v8 = vmul.f32 %v5523_v9, %v5523_v9 }
 0xb70   :  { %v925_v49 = vpop.xlane.xlu0 %924 }
 0xb71   :  { %v2321_v51 = vmul.f32 1.442695, %v2309_v50  ;;  %v986_v29 = vmul.f32 0.0078125, %v925_v49  ;;  %1162 = vadd.xlane.f32.xlu0 %v1080_v54  ;;  %4082 = vpow2.f32 %v2319_v26 }
 0xb72   :  { %v927_v4 = vpop.xlane.xlu1 %926 }
 0xb73   :  { %4084 = vpow2.f32 %v2321_v51  ;;  %v5528_v3 = vsub.f32 %v5448_v19, %v986_v29  ;;  %v987_v53 = vmul.f32 0.0078125, %v927_v4  ;;  %1166 = vadd.xlane.f32.xlu1 %v1082_v13 }
 0xb74   :  { %v929_v14 = vpop.xlane.xlu0 %928  ;;  %4086 = vpow2.f32 %v2323_v21 }
 0xb75   :  { %v5533_v60 = vsub.f32 %v5452_v45, %v987_v53  ;;  %v988_v58 = vmul.f32 0.0078125, %v929_v14  ;;  %1168 = vadd.xlane.f32.xlu0 %v1083_v46  ;;  %v1084_v19 = vmul.f32 %v5528_v3, %v5528_v3 }
 0xb76   :  { %v931_v41 = vpop.xlane.xlu1 %930 }
 0xb77   :  { %v5538_v10 = vsub.f32 %v5457_v22, %v988_v58  ;;  %1164 = vadd.xlane.f32.xlu1 %v1081_v8  ;;  %v989_v27 = vmul.f32 0.0078125, %v931_v41  ;;  %v1085_v45 = vmul.f32 %v5533_v60, %v5533_v60 }
 0xb78   :  { %v933_v63 = vpop.xlane.xlu0 %932 }
 0xb79   :  { %1170 = vadd.xlane.f32.xlu0 %v1084_v19  ;;  %v1086_v33 = vmul.f32 %v5538_v10, %v5538_v10  ;;  %v5551_v22 = vsub.f32 %v5462_v28, %v989_v27  ;;  %v990_v54 = vmul.f32 0.0078125, %v933_v63 }
 0xb7b   :  { %1172 = vadd.xlane.f32.xlu1 %v1085_v45  ;;  %v5546_v26 = vpop.eup %4082  ;;  %v5560_v13 = vsub.f32 %v5467_v6, %v990_v54  ;;  %v1087_v21 = vmul.f32 %v5551_v22, %v5551_v22 }
 0xb7c   :  { %v2337_v51 = vsel %vm1585_vm1, %v5546_v26, 0.0 }
 0xb7d   :  { %v5548_v50 = vpop.eup %4084  ;;  %1174 = vadd.xlane.f32.xlu0 %v1086_v33  ;;  %v1088_v4 = vmul.f32 %v5560_v13, %v5560_v13 }
 0xb7e   :  { %v2340_v49 = vsel %vm1585_vm1, %v5548_v50, 0.0  ;;  %v5557_v29 = vpop.eup %4086 }
 0xb7f   :  { %2341 = vadd.xlane.f32.xlu1 %v2340_v49  ;;  %v2343_v28 = vsel %vm1585_vm1, %v5557_v29, 0.0 }
 0xb81   :  { %2338 = vadd.xlane.f32.xlu0 %v2337_v51 }
 0xb83   :  { %1176 = vadd.xlane.f32.xlu1 %v1087_v21 }
 0xb85   :  { %2344 = vadd.xlane.f32.xlu0 %v2343_v28 }
 0xb87   :  { %1178 = vadd.xlane.f32.xlu1 %v1088_v4 }
 0xbec   :  { %v1153_v53 = vpop.xlane.xlu1 %1152 }
 0xbed   :  { %v1222_v46 = vmul.f32 0.0078125, %v1153_v53 }
 0xbee   :  { %v1155_v14 = vpop.xlane.xlu0 %1154 }
 0xbef   :  { %v1271_v58 = vadd.f32 1e-05, %v1222_v46  ;;  %v1223_v8 = vmul.f32 0.0078125, %v1155_v14 }
 0xbf0   :  { %v1157_v6 = vpop.xlane.xlu1 %1156 }
 0xbf1   :  { %4088 = vrsqrt.f32 %v1271_v58  ;;  %v1272_v41 = vadd.f32 1e-05, %v1223_v8  ;;  %v1224_v19 = vmul.f32 0.0078125, %v1157_v6  ;;  %v5573_v6 = vld [vmem:[%s6091_s3] ss:$0 sm:$0xff] }
 0xbf2   :  { %v1159_v27 = vpop.xlane.xlu0 %1158 }
 0xbf3   :  { %4090 = vrsqrt.f32 %v1272_v41  ;;  %v1273_v45 = vadd.f32 1e-05, %v1224_v19  ;;  %v1225_v63 = vmul.f32 0.0078125, %v1159_v27 }
 0xbf4   :  { %v2333_v33 = vpop.xlane.xlu1 %2332 }
 0xbf5   :  { %4092 = vrsqrt.f32 %v1273_v45  ;;  %v1274_v54 = vadd.f32 1e-05, %v1225_v63 }
 0xbf6   :  { %4094 = vrcp.f32 %v2333_v33  ;;  %v2336_v49 = vpop.xlane.xlu0 %2335 }
 0xbf7   :  { %4096 = vrsqrt.f32 %v1274_v54 }
 0xbf8   :  { %4098 = vrcp.f32 %v2336_v49  ;;  %v2327_v51 = vpop.xlane.xlu1 %2326 }
 0xbf9   :  { %4100 = vrcp.f32 %v2327_v51 }
 0xbfa   :  { %v2330_v21 = vpop.xlane.xlu0 %2329 }
 0xbfb   :  { %v4089_v28 = vpop.eup %4088  ;;  %4102 = vrcp.f32 %v2330_v21 }
 0xbfc   :  { %v1161_v4 = vpop.xlane.xlu1 %1160  ;;  %v1369_v53 = vmul.f32 %v4089_v28, %v5471_v7 }
 0xbfd   :  { %v4091_v46 = vpop.eup %4090  ;;  %v1226_v14 = vmul.f32 0.0078125, %v1161_v4  ;;  %v5581_v4 = vld [vmem:[%s6092_s4] ss:$0 sm:$0xff]  ;;  %s3481_s4 = sld [smem:[#allocation8 + $0x3]] }
 0xbfe   :  { %v1163_v58 = vpop.xlane.xlu0 %1162  ;;  %v1370_v8 = vmul.f32 %v4091_v46, %v5473_v44  ;;  %v1425_v41 = vmul.f32 %v5573_v6, %v1369_v53 }
 0xbff   :  { %v4093_v19 = vpop.eup %4092  ;;  %v1275_v27 = vadd.f32 1e-05, %v1226_v14  ;;  %v1227_v45 = vmul.f32 0.0078125, %v1163_v58 }
 0xc00   :  { %v4095_v63 = vpop.eup %4094  ;;  %v1167_v33 = vpop.xlane.xlu1 %1166  ;;  %v1426_v54 = vmul.f32 %v5573_v6, %v1370_v8  ;;  %v1371_v7 = vmul.f32 %v4093_v19, %v5477_v39  ;;  %v1481_v53 = vadd.f32 %v5581_v4, %v1425_v41 }
 0xc01   :  { %v4097_v49 = vpop.eup %4096  ;;  %4104 = vrsqrt.f32 %v1275_v27  ;;  %v1276_v51 = vadd.f32 1e-05, %v1227_v45  ;;  %v1229_v44 = vmul.f32 0.0078125, %v1167_v33 }
 0xc02   :  { %v4099_v21 = vpop.eup %4098  ;;  %v1169_v28 = vpop.xlane.xlu0 %1168  ;;  %v1482_v46 = vadd.f32 %v5581_v4, %v1426_v54  ;;  %v1372_v14 = vmul.f32 %v4097_v49, %v5481_v17  ;;  %v1427_v45 = vmul.f32 %v5573_v6, %v1371_v7  ;;  %v2355_v54 = vmul.f32 %v4095_v63, %v5485_v37 }
 0xc03   :  { %v4101_v58 = vpop.eup %4100  ;;  %4106 = vrsqrt.f32 %v1276_v51  ;;  %v1278_v39 = vadd.f32 1e-05, %v1229_v44  ;;  %v1230_v8 = vmul.f32 0.0078125, %v1169_v28  ;;  %v2356_v62 = vmul.f32 %v4099_v21, %v5489_v31 }
 0xc04   :  { %v1165_v19 = vpop.xlane.xlu1 %1164  ;;  %v2443_v27 = vpack.c.bf16 %v1482_v46, %v1481_v53  ;;  %v1428_v33 = vmul.f32 %v5573_v6, %v1372_v14  ;;  %v2353_v17 = vmul.f32 %v4101_v58, %v5493_v35  ;;  %v1483_v31 = vadd.f32 %v5581_v4, %v1427_v45 }
 0xc05   :  { %v4103_v23 = vpop.eup %4102  ;;  %4108 = vrsqrt.f32 %v1278_v39  ;;  %v1279_v55 = vadd.f32 1e-05, %v1230_v8  ;;  %v1228_v41 = vmul.f32 0.0078125, %v1165_v19  ;;  %v2361_v21 = vpack.c.bf16 %v2356_v62, %v2355_v54 }
 0xc06   :  { %v1171_v2 = vpop.xlane.xlu0 %1170  ;;  %3720 = vmatprep.subr.bf16.mxu1 %v2443_v27  ;;  %v2354_v49 = vmul.f32 %v4103_v23, %v5497_v25  ;;  %v1484_v7 = vadd.f32 %v5581_v4, %v1428_v33 }
 0xc07   :  { %4110 = vrsqrt.f32 %v1279_v55  ;;  %v1277_v51 = vadd.f32 1e-05, %v1228_v41  ;;  %v1231_v44 = vmul.f32 0.0078125, %v1171_v2 }
 0xc08   :  { %v1173_v28 = vpop.xlane.xlu1 %1172  ;;  %v2360_v53 = vpack.c.bf16 %v2354_v49, %v2353_v17  ;;  %v2444_v2 = vpack.c.bf16 %v1484_v7, %v1483_v31 }
 0xc09   :  { %4112 = vrsqrt.f32 %v1277_v51  ;;  %v1280_v46 = vadd.f32 1e-05, %v1231_v44  ;;  %v1232_v14 = vmul.f32 0.0078125, %v1173_v28 }
 0xc0a   :  { %v1175_v37 = vpop.xlane.xlu0 %1174  ;;  %3712 = vmatprep.mubr.msk.bf16.mxu1 %vm1585_vm1, %v2360_v53 }
 0xc0b   :  { %v4105_v63 = vpop.eup %4104  ;;  %4114 = vrsqrt.f32 %v1280_v46  ;;  %v1281_v35 = vadd.f32 1e-05, %v1232_v14  ;;  %v1233_v23 = vmul.f32 0.0078125, %v1175_v37  ;;  %3713 = vmatmul.mubr.msk.bf16.vlgmr.msra.gmra.mrb[56].mxu1 %vm1585_vm1, %v2361_v21 }
 0xc0c   :  { %3721 = vmatpush3.bf16.xpose.msra.mxu1 %v2443_v27  ;;  %v2342_v55 = vpop.xlane.xlu1 %2341  ;;  %v1373_v25 = vmul.f32 %v4105_v63, %v5500_v36 }
 0xc0d   :  { %v4107_v58 = vpop.eup %4106  ;;  %4116 = vrsqrt.f32 %v1281_v35  ;;  %v1282_v62 = vadd.f32 1e-05, %v1233_v23  ;;  %3722 = vmatprep.subr.bf16.mxu1 %v2444_v2 }
 0xc0e   :  { %4118 = vrcp.f32 %v2342_v55  ;;  %v2339_v39 = vpop.xlane.xlu0 %2338  ;;  %v1374_v8 = vmul.f32 %v4107_v58, %v5505_v15  ;;  %v1429_v19 = vmul.f32 %v5573_v6, %v1373_v25 }
 0xc0f   :  { %v4109_v45 = vpop.eup %4108  ;;  %4120 = vrsqrt.f32 %v1282_v62 }
 0xc10   :  { %4122 = vrcp.f32 %v2339_v39  ;;  %v1177_v33 = vpop.xlane.xlu1 %1176  ;;  %v1430_v41 = vmul.f32 %v5573_v6, %v1374_v8  ;;  %v1376_v27 = vmul.f32 %v4109_v45, %v5510_v11  ;;  %v1485_v49 = vadd.f32 %v5581_v4, %v1429_v19 }
 0xc11   :  { %v4111_v54 = vpop.eup %4110  ;;  %v1234_v36 = vmul.f32 0.0078125, %v1177_v33 }
 0xc12   :  { %v2345_v17 = vpop.xlane.xlu0 %2344  ;;  %v1486_v51 = vadd.f32 %v5581_v4, %v1430_v41  ;;  %v1377_v44 = vmul.f32 %v4111_v54, %v5517_v20  ;;  %v1432_v15 = vmul.f32 %v5573_v6, %v1376_v27 }
 0xc13   :  { %v4113_v7 = vpop.eup %4112  ;;  %v1283_v28 = vadd.f32 1e-05, %v1234_v36  ;;  %4124 = vrcp.f32 %v2345_v17 }
 0xc14   :  { %3723 = vmatpush3.bf16.xpose.msra.mxu1 %v2444_v2  ;;  %v1179_v53 = vpop.xlane.xlu1 %1178  ;;  %v2445_v31 = vpack.c.bf16 %v1486_v51, %v1485_v49  ;;  %v1433_v21 = vmul.f32 %v5573_v6, %v1377_v44  ;;  %v1375_v11 = vmul.f32 %v4113_v7, %v5523_v9  ;;  %v1488_v37 = vadd.f32 %v5581_v4, %v1432_v15 }
 0xc15   :  { %v4115_v46 = vpop.eup %4114  ;;  %4126 = vrsqrt.f32 %v1283_v28  ;;  %v1235_v14 = vmul.f32 0.0078125, %v1179_v53  ;;  %v6167_v53 = vld [vmem:[#allocation26_spill] sm:$0xff] }
 0xc16   :  { %3724 = vmatprep.subr.bf16.mxu1 %v2445_v31  ;;  %v1489_v20 = vadd.f32 %v5581_v4, %v1433_v21  ;;  %v1431_v63 = vmul.f32 %v5573_v6, %v1375_v11  ;;  %v1378_v35 = vmul.f32 %v4115_v46, %v5528_v3 }
 0xc17   :  { %v4117_v23 = vpop.eup %4116  ;;  %v1284_v2 = vadd.f32 1e-05, %v1235_v14 }
 0xc18   :  { %v4119_v55 = vpop.eup %4118  ;;  %v2675_v25 = vpack.c.bf16 %v1489_v20, %v1488_v37  ;;  %v1487_v58 = vadd.f32 %v5581_v4, %v1431_v63  ;;  %v1379_v9 = vmul.f32 %v4117_v23, %v5533_v60  ;;  %v1434_v62 = vmul.f32 %v5573_v6, %v1378_v35  ;;  %v6171_v37 = vld [vmem:[#allocation38_spill] sm:$0xff] }
 0xc19   :  { %v4121_v39 = vpop.eup %4120  ;;  %4128 = vrsqrt.f32 %v1284_v2  ;;  %v2358_v33 = vmul.f32 %v4119_v55, %v5548_v50  ;;  %v2949_v20 = vstv %s3481_s4  ;;  %v3080_v63 = vstv %s3487_s25 }
 0xc1a   :  { %v4123_v8 = vpop.eup %4122  ;;  %3752 = vmatprep.subr.bf16.mxu0 %v2675_v25  ;;  %v2446_v19 = vpack.c.bf16 %v1487_v58, %v1487_v58  ;;  %v1435_v45 = vmul.f32 %v5573_v6, %v1379_v9  ;;  %v1490_v41 = vadd.f32 %v5581_v4, %v1434_v62  ;;  %v1380_v60 = vmul.f32 %v4121_v39, %v5538_v10 }
 0xc1b   :  { %3753 = vmatpush3.bf16.xpose.msra.mxu0 %v2675_v25  ;;  %v2357_v3 = vmul.f32 %v4123_v8, %v5546_v26  ;;  %v3211_v35 = vstv %s3493_s28 }
 0xc1c   :  { %3725 = vmatpush3.bf16.xpose.msra.mxu1 %v2445_v31  ;;  %v1491_v27 = vadd.f32 %v5581_v4, %v1435_v45  ;;  %v1436_v44 = vmul.f32 %v5573_v6, %v1380_v60 }
 0xc1d   :  { %v4125_v54 = vpop.eup %4124  ;;  %3726 = vmatprep.subr.bf16.mxu1 %v2446_v19  ;;  %v2362_v36 = vpack.c.bf16 %v2358_v33, %v2357_v3 }
 0xc1e   :  { %v2676_v17 = vpack.c.bf16 %v1491_v27, %v1490_v41  ;;  %v2359_v49 = vmul.f32 %v4125_v54, %v5557_v29  ;;  %v1492_v29 = vadd.f32 %v5581_v4, %v1436_v44 }
 0xc1f   :  { %v4127_v51 = vpop.eup %4126  ;;  %3716 = vmatprep.mubr.msk.bf16.mxu1 %vm1585_vm1, %v2362_v36 }
 0xc20   :  { %3754 = vmatprep.subr.bf16.mxu0 %v2676_v17  ;;  %v2363_v26 = vpack.c.bf16 %v2359_v49, %v2359_v49  ;;  %v1381_v50 = vmul.f32 %v4127_v51, %v5551_v22 }
 0xc22   :  { %3717 = vmatmul.mubr.msk.bf16.gmra.mrb[60].mxu1 %vm1585_vm1, %v2363_v26  ;;  %v1437_v15 = vmul.f32 %v5573_v6, %v1381_v50 }
 0xc23   :  { %v4129_v10 = vpop.eup %4128  ;;  %3728 = vmatprep.mubr.bf16.mxu1 %v4727_v61  ;;  %3755 = vmatpush3.bf16.xpose.msra.mxu0 %v2676_v17  ;;  %v6168_v61 = vld [vmem:[#allocation29_spill] sm:$0xff] }
 0xc24   :  { %3727 = vmatpush3.bf16.xpose.msra.mxu1 %v2446_v19  ;;  %v1493_v7 = vadd.f32 %v5581_v4, %v1437_v15  ;;  %v1382_v28 = vmul.f32 %v4129_v10, %v5560_v13  ;;  %v6169_v13 = vld [vmem:[#allocation34_spill] sm:$0xff] }
 0xc25   :  { %3736 = vmatprep.subr.bf16.mxu1 %v6167_v53  ;;  %v776_v46 = vadd.f32 %v6169_v13, %v4387_v59 }
 0xc26   :  { %v2677_v22 = vpack.c.bf16 %v1493_v7, %v1492_v29  ;;  %v1438_v31 = vmul.f32 %v5573_v6, %v1382_v28  ;;  %v6170_v6 = vld [vmem:[#allocation32_spill] sm:$0xff]  ;;  %v6172_v7 = vld [vmem:[#allocation18_spill] sm:$0xff] }
 0xc27   :  { %v2450_v14 = vpack.c.bf16 %v776_v46, %v776_v46 }
 0xc28   :  { %3756 = vmatprep.subr.bf16.mxu0 %v2677_v22  ;;  %v1494_v21 = vadd.f32 %v5581_v4, %v1438_v31 }
 0xc29   :  { %v2609_v4 = vsel %vm1679_vm0, %v2450_v14, 0 }
 0xc2a   :  { %v2678_v11 = vpack.c.bf16 %v1494_v21, %v1494_v21 }
 0xc2b   :  { %3729 = vmatmul.mubr.bf16.vlgmr.msra.gmra.mrb[64].mxu1 %v4737_v12  ;;  %3757 = vmatpush3.bf16.xpose.msra.mxu0 %v2677_v22 }
 0xc2c   :  { %3732 = vmatprep.mubr.bf16.mxu1 %v4751_v5  ;;  %3737 = vmatpush3.bf16.msra.mxu1 %v6167_v53  ;;  %v6173_v53 = vld [vmem:[#allocation20_spill] sm:$0xff] }
 0xc2d   :  { %3738 = vmatprep.subr.bf16.mxu1 %v6168_v61  ;;  %3758 = vmatprep.subr.bf16.mxu0 %v2678_v11 }
 0xc30   :  { %3739 = vmatpush3.bf16.msra.mxu1 %v6168_v61 }
 0xc31   :  { %3740 = vmatprep.subr.bf16.mxu1 %v6170_v6 }
 0xc33   :  { %3733 = vmatmul.mubr.bf16.gmra.mrb[68].mxu1 %v4758_v43  ;;  %3759 = vmatpush3.bf16.xpose.msra.mxu0 %v2678_v11  ;;  %v6174_v11 = vld [vmem:[#allocation21_spill] sm:$0xff] }
 0xc34   :  { %3741 = vmatpush3.bf16.msra.mxu1 %v6170_v6 }
 0xc35   :  { %3788 = vmatprep.subr.msk.bf16.mxu1 %vm1679_vm0, %v2450_v14 }
 0xc38   :  { %3743 = vmatpush3.bf16.msra.mxu1 %v2609_v4 }
 0xc39   :  { %3768 = vmatprep.subr.bf16.mxu1 %v6171_v37 }
 0xc3a   :  { %3761 = vmatmul.mubr.bf16.vlgmr.msra.gmra.mrb[100].mxu0 %v4737_v12 }
 0xc3b   :  { %3764 = vmatprep.mubr.bf16.mxu0 %v4751_v5 }
 0xc42   :  { %3765 = vmatmul.mubr.bf16.gmra.mrb[104].mxu0 %v4758_v43 }
 0xcde   :  { %v3714_v23 = vpop.f32.mrb[56].mxu1 }
 0xcdf   :  { %v2952_v2 = vmul.f32 %v3714_v23, %v2949_v20  ;;  %v3083_v55 = vmul.f32 %v3714_v23, %v3080_v63  ;;  %v3214_v25 = vmul.f32 %v3714_v23, %v3211_v35  ;;  %v2413_v58 = vpop.f32.mrb[57].mxu1 }
 0xce0   :  { %v2950_v9 = vmul.f32 %v2949_v20, %v2413_v58  ;;  %v3081_v62 = vmul.f32 %v3080_v63, %v2413_v58  ;;  %v3212_v39 = vmul.f32 %v3211_v35, %v2413_v58  ;;  %v3715_v8 = vpop.f32.mrb[58].mxu1 }
 0xce1   :  { %v5650_v12 = vadd.f32 %v2952_v2, %v5335_v48  ;;  %v5653_v5 = vadd.f32 %v3083_v55, %v5338_v30  ;;  %v5656_v43 = vadd.f32 %v3214_v25, %v5341_v47  ;;  %v2953_v19 = vmul.f32 %v3715_v8, %v2949_v20  ;;  %v2416_v45 = vpop.f32.mrb[59].mxu1 }
 0xce2   :  { %v5659_v3 = vadd.f32 %v2950_v9, %v5344_v38  ;;  %v5662_v33 = vadd.f32 %v3081_v62, %v5347_v0  ;;  %v5665_v41 = vadd.f32 %v3212_v39, %v5350_v52  ;;  %v3084_v27 = vmul.f32 %v3715_v8, %v3080_v63 }
 0xce3   :  { %v5668_v48 = vadd.f32 %v2953_v19, %v5353_v18  ;;  %v3215_v30 = vmul.f32 %v3715_v8, %v3211_v35  ;;  %v2951_v60 = vmul.f32 %v2949_v20, %v2416_v45  ;;  %v3082_v54 = vmul.f32 %v3080_v63, %v2416_v45 }
 0xce4   :  { %v5671_v47 = vadd.f32 %v3084_v27, %v5356_v34  ;;  %v3213_v36 = vmul.f32 %v3211_v35, %v2416_v45 }
 0xce5   :  { %v5674_v38 = vadd.f32 %v3215_v30, %v5359_v42  ;;  %v5677_v0 = vadd.f32 %v2951_v60, %v5362_v24  ;;  %v5680_v52 = vadd.f32 %v3082_v54, %v5365_v40 }
 0xce6   :  { %v5683_v17 = vadd.f32 %v3213_v36, %v5368_v57 }
 0xcf5   :  { %v3718_v18 = vpop.f32.mrb[60].mxu1 }
 0xcf6   :  { %v2956_v49 = vmul.f32 %v3718_v18, %v2949_v20  ;;  %v3087_v51 = vmul.f32 %v3718_v18, %v3080_v63  ;;  %v3218_v26 = vmul.f32 %v3718_v18, %v3211_v35  ;;  %v2429_v50 = vpop.f32.mrb[61].mxu1 }
 0xcf7   :  { %v2954_v34 = vmul.f32 %v2949_v20, %v2429_v50  ;;  %v3085_v44 = vmul.f32 %v3080_v63, %v2429_v50  ;;  %v3216_v15 = vmul.f32 %v3211_v35, %v2429_v50  ;;  %v3719_v10 = vpop.f32.mrb[62].mxu1 }
 0xcf8   :  { %v5686_v42 = vadd.f32 %v2956_v49, %v5371_v32  ;;  %v5689_v24 = vadd.f32 %v3087_v51, %v5374_v16  ;;  %v5692_v40 = vadd.f32 %v3218_v26, %v5377_v56  ;;  %v2432_v57 = vpop.f32.mrb[63].mxu1  ;;  %v6175_v16 = vld [vmem:[#allocation17_spill] sm:$0xff]  ;;  %v6176_v56 = vld [vmem:[#allocation19_spill] sm:$0xff] }
 0xcf9   :  { %v5695_v29 = vadd.f32 %v2954_v34, %v5380_v1  ;;  %v5698_v28 = vadd.f32 %v3085_v44, %v6172_v7  ;;  %v5701_v22 = vadd.f32 %v3216_v15, %v6173_v53  ;;  %v2955_v31 = vmul.f32 %v2949_v20, %v2432_v57 }
 0xcfa   :  { %v3086_v21 = vmul.f32 %v3080_v63, %v2432_v57  ;;  %v3217_v32 = vmul.f32 %v3211_v35, %v2432_v57 }
 0xcfb   :  { %v5704_v61 = vadd.f32 %v2955_v31, %v6174_v11 }
 0xcfc   :  { %v5707_v13 = vadd.f32 %v3086_v21, %v6175_v16  ;;  %v5710_v46 = vadd.f32 %v3217_v32, %v6176_v56 }
 0xcfe   :  { %v3730_v1 = vpop.f32.mrb[64].mxu1 }
 0xcff   :  { %v2485_v6 = vpop.f32.mrb[65].mxu1  ;;  %v2521_v63 = vsel %vm1585_vm1, %v3730_v1, -inf }
 0xd00   :  { %v3731_v14 = vpop.f32.mrb[66].mxu1  ;;  %v2515_v4 = vsel %vm1585_vm1, %v2485_v6, -inf }
 0xd01   :  { %2516 = vmax.xlane.f32.xlu0 %v2515_v4  ;;  %v2488_v23 = vpop.f32.mrb[67].mxu1  ;;  %v2524_v2 = vsel %vm1585_vm1, %v3731_v14, -inf }
 0xd02   :  { %v2518_v20 = vsel %vm1585_vm1, %v2488_v23, -inf }
 0xd03   :  { %2519 = vmax.xlane.f32.xlu1 %v2518_v20 }
 0xd05   :  { %2522 = vmax.xlane.f32.xlu0 %v2521_v63 }
 0xd06   :  { %v3734_v35 = vpop.f32.mrb[68].mxu1 }
 0xd07   :  { %2525 = vmax.xlane.f32.xlu1 %v2524_v2  ;;  %v2501_v55 = vpop.f32.mrb[69].mxu1  ;;  %v2533_v39 = vsel %vm1585_vm1, %v3734_v35, -inf }
 0xd08   :  { %v3735_v25 = vpop.f32.mrb[70].mxu1  ;;  %v2527_v58 = vsel %vm1585_vm1, %v2501_v55, -inf }
 0xd09   :  { %2528 = vmax.xlane.f32.xlu0 %v2527_v58  ;;  %v2504_v9 = vpop.f32.mrb[71].mxu1 }
 0xd0a   :  { %v2530_v62 = vsel %vm1585_vm1, %v2504_v9, -inf }
 0xd0b   :  { %2531 = vmax.xlane.f32.xlu1 %v2530_v62 }
 0xd0d   :  { %2534 = vmax.xlane.f32.xlu0 %v2533_v39  ;;  %v5719_v8 = vpop.f32.mrb[100].mxu0 }
 0xd0e   :  { %v2717_v19 = vpop.f32.mrb[101].mxu0  ;;  %v2753_v54 = vsel %vm1585_vm1, %v5719_v8, -inf }
 0xd0f   :  { %v5721_v45 = vpop.f32.mrb[102].mxu0  ;;  %v2747_v27 = vsel %vm1585_vm1, %v2717_v19, -inf }
 0xd10   :  { %2748 = vmax.xlane.f32.xlu1 %v2747_v27  ;;  %v2720_v30 = vpop.f32.mrb[103].mxu0  ;;  %v2756_v18 = vsel %vm1585_vm1, %v5721_v45, -inf }
 0xd11   :  { %v2750_v60 = vsel %vm1585_vm1, %v2720_v30, -inf }
 0xd12   :  { %2751 = vmax.xlane.f32.xlu0 %v2750_v60 }
 0xd14   :  { %2754 = vmax.xlane.f32.xlu1 %v2753_v54 }
 0xd15   :  { %v5727_v36 = vpop.f32.mrb[104].mxu0 }
 0xd16   :  { %2757 = vmax.xlane.f32.xlu0 %v2756_v18  ;;  %v5731_v49 = vpop.f32.mrb[105].mxu0  ;;  %v2765_v44 = vsel %vm1585_vm1, %v5727_v36, -inf }
 0xd17   :  { %v3767_v51 = vpop.f32.mrb[106].mxu0  ;;  %v2759_v26 = vsel %vm1585_vm1, %v5731_v49, -inf }
 0xd18   :  { %2760 = vmax.xlane.f32.xlu1 %v2759_v26  ;;  %v5735_v50 = vpop.f32.mrb[107].mxu0 }
 0xd19   :  { %v2762_v34 = vsel %vm1585_vm1, %v5735_v50, -inf }
 0xd1a   :  { %2763 = vmax.xlane.f32.xlu0 %v2762_v34 }
 0xd1c   :  { %2766 = vmax.xlane.f32.xlu1 %v2765_v44 }
 0xd8e   :  { %v2517_v15 = vpop.xlane.xlu0 %2516 }
 0xd8f   :  { %v2536_v10 = vsub.f32 %v2485_v6, %v2517_v15 }
 0xd90   :  { %v2520_v57 = vpop.xlane.xlu1 %2519 }
 0xd91   :  { %v2543_v7 = vmul.f32 1.442695, %v2536_v10  ;;  %v2537_v53 = vsub.f32 %v2488_v23, %v2520_v57 }
 0xd92   :  { %v2523_v31 = vpop.xlane.xlu0 %2522 }
 0xd93   :  { %4130 = vpow2.f32 %v2543_v7  ;;  %v2545_v21 = vmul.f32 1.442695, %v2537_v53  ;;  %v2538_v32 = vsub.f32 %v3730_v1, %v2523_v31 }
 0xd94   :  { %v2526_v11 = vpop.xlane.xlu1 %2525 }
 0xd95   :  { %4132 = vpow2.f32 %v2545_v21  ;;  %v2547_v16 = vmul.f32 1.442695, %v2538_v32  ;;  %v2539_v56 = vsub.f32 %v3731_v14, %v2526_v11 }
 0xd96   :  { %v2529_v4 = vpop.xlane.xlu0 %2528 }
 0xd97   :  { %4134 = vpow2.f32 %v2547_v16  ;;  %v2549_v20 = vmul.f32 1.442695, %v2539_v56  ;;  %v2540_v63 = vsub.f32 %v2501_v55, %v2529_v4 }
 0xd98   :  { %v2532_v2 = vpop.xlane.xlu1 %2531 }
 0xd99   :  { %4136 = vpow2.f32 %v2549_v20  ;;  %v2551_v25 = vmul.f32 1.442695, %v2540_v63  ;;  %v2541_v58 = vsub.f32 %v2504_v9, %v2532_v2 }
 0xd9a   :  { %v2535_v6 = vpop.xlane.xlu0 %2534 }
 0xd9b   :  { %4138 = vpow2.f32 %v2551_v25  ;;  %v2553_v62 = vmul.f32 1.442695, %v2541_v58  ;;  %v2542_v23 = vsub.f32 %v3734_v35, %v2535_v6 }
 0xd9d   :  { %v5741_v39 = vpop.eup %4130  ;;  %4140 = vpow2.f32 %v2553_v62  ;;  %v2555_v1 = vmul.f32 1.442695, %v2542_v23  ;;  %v2749_v27 = vpop.xlane.xlu1 %2748 }
 0xd9e   :  { %v2768_v60 = vsub.f32 %v2717_v19, %v2749_v27  ;;  %v2557_v14 = vsel %vm1585_vm1, %v5741_v39, 0.0 }
 0xd9f   :  { %v5745_v54 = vpop.eup %4132  ;;  %4142 = vpow2.f32 %v2555_v1  ;;  %2558 = vadd.xlane.f32.xlu0 %v2557_v14  ;;  %v2752_v55 = vpop.xlane.xlu0 %2751 }
 0xda0   :  { %v2775_v18 = vmul.f32 1.442695, %v2768_v60  ;;  %v2769_v9 = vsub.f32 %v2720_v30, %v2752_v55  ;;  %v2560_v51 = vsel %vm1585_vm1, %v5745_v54, 0.0 }
 0xda1   :  { %v5749_v35 = vpop.eup %4134  ;;  %2561 = vadd.xlane.f32.xlu1 %v2560_v51  ;;  %v2755_v26 = vpop.xlane.xlu1 %2754 }
 0xda2   :  { %4144 = vpow2.f32 %v2775_v18  ;;  %v2777_v34 = vmul.f32 1.442695, %v2769_v9  ;;  %v2770_v19 = vsub.f32 %v5719_v8, %v2755_v26  ;;  %v2563_v44 = vsel %vm1585_vm1, %v5749_v35, 0.0 }
 0xda3   :  { %v5754_v15 = vpop.eup %4136  ;;  %2564 = vadd.xlane.f32.xlu0 %v2563_v44  ;;  %v2758_v10 = vpop.xlane.xlu0 %2757 }
 0xda4   :  { %4146 = vpow2.f32 %v2777_v34  ;;  %v2779_v30 = vmul.f32 1.442695, %v2770_v19  ;;  %v2771_v57 = vsub.f32 %v5721_v45, %v2758_v10  ;;  %v2566_v7 = vsel %vm1585_vm1, %v5754_v15, 0.0 }
 0xda5   :  { %v5759_v53 = vpop.eup %4138  ;;  %2567 = vadd.xlane.f32.xlu1 %v2566_v7  ;;  %v2761_v31 = vpop.xlane.xlu1 %2760 }
 0xda6   :  { %4148 = vpow2.f32 %v2779_v30  ;;  %v2781_v8 = vmul.f32 1.442695, %v2771_v57  ;;  %v2772_v21 = vsub.f32 %v5731_v49, %v2761_v31  ;;  %v2569_v32 = vsel %vm1585_vm1, %v5759_v53, 0.0 }
 0xda7   :  { %v5764_v11 = vpop.eup %4140  ;;  %2570 = vadd.xlane.f32.xlu0 %v2569_v32  ;;  %v2764_v16 = vpop.xlane.xlu0 %2763 }
 0xda8   :  { %4150 = vpow2.f32 %v2781_v8  ;;  %v2783_v45 = vmul.f32 1.442695, %v2772_v21  ;;  %v2773_v56 = vsub.f32 %v5735_v50, %v2764_v16  ;;  %v2572_v4 = vsel %vm1585_vm1, %v5764_v11, 0.0 }
 0xda9   :  { %v5769_v20 = vpop.eup %4142  ;;  %2573 = vadd.xlane.f32.xlu1 %v2572_v4  ;;  %v2767_v63 = vpop.xlane.xlu1 %2766 }
 0xdaa   :  { %4152 = vpow2.f32 %v2783_v45  ;;  %v2785_v49 = vmul.f32 1.442695, %v2773_v56  ;;  %v2774_v2 = vsub.f32 %v5727_v36, %v2767_v63  ;;  %v2575_v25 = vsel %vm1585_vm1, %v5769_v20, 0.0 }
 0xdab   :  { %2576 = vadd.xlane.f32.xlu0 %v2575_v25 }
 0xdac   :  { %v5774_v58 = vpop.eup %4144  ;;  %4154 = vpow2.f32 %v2785_v49  ;;  %v2787_v6 = vmul.f32 1.442695, %v2774_v2 }
 0xdad   :  { %v2789_v50 = vsel %vm1585_vm1, %v5774_v58, 0.0 }
 0xdae   :  { %v5778_v62 = vpop.eup %4146  ;;  %4156 = vpow2.f32 %v2787_v6  ;;  %2790 = vadd.xlane.f32.xlu1 %v2789_v50 }
 0xdaf   :  { %v2792_v23 = vsel %vm1585_vm1, %v5778_v62, 0.0 }
 0xdb0   :  { %v5782_v1 = vpop.eup %4148  ;;  %2793 = vadd.xlane.f32.xlu0 %v2792_v23 }
 0xdb1   :  { %v2795_v36 = vsel %vm1585_vm1, %v5782_v1, 0.0 }
 0xdb2   :  { %v5786_v27 = vpop.eup %4150  ;;  %2796 = vadd.xlane.f32.xlu1 %v2795_v36 }
 0xdb3   :  { %v2798_v60 = vsel %vm1585_vm1, %v5786_v27, 0.0 }
 0xdb4   :  { %v5790_v14 = vpop.eup %4152  ;;  %2799 = vadd.xlane.f32.xlu0 %v2798_v60 }
 0xdb5   :  { %v2801_v55 = vsel %vm1585_vm1, %v5790_v14, 0.0 }
 0xdb6   :  { %v5794_v18 = vpop.eup %4154  ;;  %2802 = vadd.xlane.f32.xlu1 %v2801_v55 }
 0xdb7   :  { %v2804_v9 = vsel %vm1585_vm1, %v5794_v18, 0.0 }
 0xdb8   :  { %v5798_v51 = vpop.eup %4156  ;;  %2805 = vadd.xlane.f32.xlu0 %v2804_v9 }
 0xdb9   :  { %v2807_v26 = vsel %vm1585_vm1, %v5798_v51, 0.0 }
 0xdba   :  { %2808 = vadd.xlane.f32.xlu1 %v2807_v26 }
 0xe2c   :  { %v2559_v34 = vpop.xlane.xlu0 %2558 }
 0xe2d   :  { %4158 = vrcp.f32 %v2559_v34 }
 0xe2e   :  { %v2562_v19 = vpop.xlane.xlu1 %2561 }
 0xe2f   :  { %4160 = vrcp.f32 %v2562_v19  ;;  %v6178_v19 = vld [vmem:[#allocation44_spill] sm:$0xff] }
 0xe30   :  { %v2565_v44 = vpop.xlane.xlu0 %2564 }
 0xe31   :  { %4162 = vrcp.f32 %v2565_v44  ;;  %v810_v44 = vadd.f32 %v6178_v19, %v4387_v59 }
 0xe32   :  { %v2568_v10 = vpop.xlane.xlu1 %2567 }
 0xe33   :  { %4164 = vrcp.f32 %v2568_v10 }
 0xe34   :  { %v2571_v30 = vpop.xlane.xlu0 %2570 }
 0xe35   :  { %4166 = vrcp.f32 %v2571_v30 }
 0xe36   :  { %v2574_v57 = vpop.xlane.xlu1 %2573 }
 0xe37   :  { %v4159_v7 = vpop.eup %4158  ;;  %4168 = vrcp.f32 %v2574_v57 }
 0xe38   :  { %v2577_v31 = vpop.xlane.xlu0 %2576  ;;  %v2585_v21 = vmul.f32 %v4159_v7, %v5741_v39  ;;  %v2682_v7 = vpack.c.bf16 %v810_v44, %v810_v44 }
 0xe39   :  { %v4161_v8 = vpop.eup %4160  ;;  %4170 = vrcp.f32 %v2577_v31 }
 0xe3a   :  { %v2586_v32 = vmul.f32 %v4161_v8, %v5745_v54 }
 0xe3b   :  { %v4163_v16 = vpop.eup %4162  ;;  %v2791_v45 = vpop.xlane.xlu1 %2790 }
 0xe3c   :  { %4172 = vrcp.f32 %v2791_v45  ;;  %v2592_v56 = vpack.c.bf16 %v2586_v32, %v2585_v21  ;;  %v2587_v49 = vmul.f32 %v4163_v16, %v5749_v35 }
 0xe3d   :  { %v4165_v4 = vpop.eup %4164  ;;  %v2794_v63 = vpop.xlane.xlu0 %2793 }
 0xe3e   :  { %v2588_v2 = vmul.f32 %v4165_v4, %v5754_v15  ;;  %4174 = vrcp.f32 %v2794_v63  ;;  %3744 = vmatprep.mubr.msk.bf16.mxu1 %vm1585_vm1, %v2592_v56  ;;  %v6177_v15 = vld [vmem:[#allocation41_spill] sm:$0xff] }
 0xe3f   :  { %v4167_v25 = vpop.eup %4166  ;;  %v2797_v6 = vpop.xlane.xlu1 %2796 }
 0xe40   :  { %v2593_v50 = vpack.c.bf16 %v2588_v2, %v2587_v49  ;;  %4176 = vrcp.f32 %v2797_v6  ;;  %v2589_v54 = vmul.f32 %v4167_v25, %v5759_v53  ;;  %v2965_v2 = vstv %s3482_s29 }
 0xe41   :  { %v4169_v39 = vpop.eup %4168  ;;  %v2800_v23 = vpop.xlane.xlu0 %2799  ;;  %v3096_v25 = vstv %s3488_s1  ;;  %v3227_v6 = vstv %s3494_s30 }
 0xe42   :  { %4178 = vrcp.f32 %v2800_v23  ;;  %3745 = vmatmul.mubr.msk.bf16.vlgmr.msra.gmra.mrb[72].mxu1 %vm1585_vm1, %v2593_v50  ;;  %v2590_v36 = vmul.f32 %v4169_v39, %v5764_v11 }
 0xe43   :  { %v4171_v60 = vpop.eup %4170  ;;  %3769 = vmatpush3.bf16.msra.mxu1 %v6171_v37  ;;  %v2803_v35 = vpop.xlane.xlu1 %2802  ;;  %v6179_v37 = vld [vmem:[#allocation45_spill] sm:$0xff] }
 0xe44   :  { %3770 = vmatprep.subr.bf16.mxu1 %v6177_v15  ;;  %4180 = vrcp.f32 %v2803_v35  ;;  %v2594_v55 = vpack.c.bf16 %v2590_v36, %v2589_v54  ;;  %v2591_v9 = vmul.f32 %v4171_v60, %v5769_v20 }
 0xe45   :  { %v2806_v26 = vpop.xlane.xlu0 %2805 }
 0xe46   :  { %v4173_v34 = vpop.eup %4172  ;;  %4182 = vrcp.f32 %v2806_v26  ;;  %3748 = vmatprep.mubr.msk.bf16.mxu1 %vm1585_vm1, %v2594_v55  ;;  %v2595_v10 = vpack.c.bf16 %v2591_v9, %v2591_v9 }
 0xe47   :  { %3771 = vmatpush3.bf16.msra.mxu1 %v6177_v15  ;;  %v2809_v53 = vpop.xlane.xlu1 %2808  ;;  %v2817_v30 = vmul.f32 %v4173_v34, %v5774_v58  ;;  %v2841_v58 = vsel %vm1679_vm0, %v2682_v7, 0 }
 0xe48   :  { %v4175_v11 = vpop.eup %4174  ;;  %3772 = vmatprep.subr.bf16.mxu1 %v6179_v37  ;;  %4184 = vrcp.f32 %v2809_v53 }
 0xe49   :  { %v2818_v20 = vmul.f32 %v4175_v11, %v5778_v62 }
 0xe4a   :  { %v4177_v57 = vpop.eup %4176  ;;  %3749 = vmatmul.mubr.msk.bf16.gmra.mrb[76].mxu1 %vm1585_vm1, %v2595_v10 }
 0xe4b   :  { %3773 = vmatpush3.bf16.msra.mxu1 %v6179_v37  ;;  %v2824_v31 = vpack.c.bf16 %v2818_v20, %v2817_v30  ;;  %v2819_v21 = vmul.f32 %v4177_v57, %v5782_v1 }
 0xe4c   :  { %v4179_v8 = vpop.eup %4178  ;;  %3789 = vmatprep.subr.msk.bf16.mxu1 %vm1679_vm0, %v2682_v7 }
 0xe4d   :  { %v2820_v32 = vmul.f32 %v4179_v8, %v5786_v27  ;;  %3776 = vmatprep.mubr.msk.bf16.mxu1 %vm1585_vm1, %v2824_v31 }
 0xe4e   :  { %v4181_v16 = vpop.eup %4180 }
 0xe4f   :  { %v2825_v62 = vpack.c.bf16 %v2820_v32, %v2819_v21  ;;  %3775 = vmatpush3.bf16.msra.mxu1 %v2841_v58  ;;  %v2821_v56 = vmul.f32 %v4181_v16, %v5790_v14 }
 0xe50   :  { %v4183_v45 = vpop.eup %4182 }
 0xe51   :  { %v2822_v4 = vmul.f32 %v4183_v45, %v5794_v18 }
 0xe52   :  { %v4185_v63 = vpop.eup %4184  ;;  %3777 = vmatmul.mubr.msk.bf16.vlgmr.msra.gmra.mrb[80].mxu1 %vm1585_vm1, %v2825_v62 }
 0xe53   :  { %v2826_v49 = vpack.c.bf16 %v2822_v4, %v2821_v56  ;;  %v2823_v1 = vmul.f32 %v4185_v63, %v5798_v51  ;;  %v5870_v63 = vstv %s3495_s9 }
 0xe55   :  { %3780 = vmatprep.mubr.msk.bf16.mxu1 %vm1585_vm1, %v2826_v49  ;;  %v2827_v27 = vpack.c.bf16 %v2823_v1, %v2823_v1  ;;  %v6181_v1 = vld [vmem:[#allocation47_spill] sm:$0xff] }
 0xe5a   :  { %3781 = vmatmul.mubr.msk.bf16.gmra.mrb[84].mxu1 %vm1585_vm1, %v2827_v27  ;;  %v6182_v27 = vld [vmem:[#allocation48_spill] sm:$0xff] }
 0xf15   :  { %v3746_v14 = vpop.f32.mrb[72].mxu1 }
 0xf16   :  { %v2968_v50 = vmul.f32 %v3746_v14, %v2965_v2  ;;  %v3099_v18 = vmul.f32 %v3746_v14, %v3096_v25  ;;  %v3230_v39 = vmul.f32 %v3746_v14, %v3227_v6  ;;  %v2645_v23 = vpop.f32.mrb[73].mxu1 }
 0xf17   :  { %v2966_v54 = vmul.f32 %v2965_v2, %v2645_v23  ;;  %v3097_v36 = vmul.f32 %v3096_v25, %v2645_v23  ;;  %v3228_v60 = vmul.f32 %v3227_v6, %v2645_v23  ;;  %v3747_v51 = vpop.f32.mrb[74].mxu1 }
 0xf18   :  { %v2975_v35 = vadd.f32 %v2968_v50, %v5650_v12  ;;  %v3106_v15 = vadd.f32 %v3099_v18, %v5653_v5  ;;  %v3237_v55 = vadd.f32 %v3230_v39, %v5656_v43  ;;  %v2969_v9 = vmul.f32 %v3747_v51, %v2965_v2  ;;  %v2648_v26 = vpop.f32.mrb[75].mxu1  ;;  %v6184_v39 = vld [vmem:[#allocation51_spill] sm:$0xff] }
 0xf19   :  { %v2973_v34 = vadd.f32 %v2966_v54, %v5659_v3  ;;  %v3104_v19 = vadd.f32 %v3097_v36, %v5662_v33  ;;  %v3235_v44 = vadd.f32 %v3228_v60, %v5665_v41  ;;  %v3100_v53 = vmul.f32 %v3747_v51, %v3096_v25 }
 0xf1a   :  { %v2976_v11 = vadd.f32 %v2969_v9, %v5668_v48  ;;  %v3231_v37 = vmul.f32 %v3747_v51, %v3227_v6  ;;  %v2967_v10 = vmul.f32 %v2965_v2, %v2648_v26  ;;  %v3098_v30 = vmul.f32 %v3096_v25, %v2648_v26 }
 0xf1b   :  { %v3107_v12 = vadd.f32 %v3100_v53, %v5671_v47  ;;  %v3229_v5 = vmul.f32 %v3227_v6, %v2648_v26  ;;  %v5897_v23 = vadd.f32 %v6184_v39, %v4387_v59 }
 0xf1c   :  { %v3238_v43 = vadd.f32 %v3231_v37, %v5674_v38  ;;  %v2974_v3 = vadd.f32 %v2967_v10, %v5677_v0  ;;  %v3105_v33 = vadd.f32 %v3098_v30, %v5680_v52 }
 0xf1d   :  { %v3236_v41 = vadd.f32 %v3229_v5, %v5683_v17  ;;  %v3750_v20 = vpop.f32.mrb[76].mxu1 }
 0xf1e   :  { %v2972_v57 = vmul.f32 %v3750_v20, %v2965_v2  ;;  %v3103_v48 = vmul.f32 %v3750_v20, %v3096_v25  ;;  %v3234_v7 = vmul.f32 %v3750_v20, %v3227_v6  ;;  %v2661_v31 = vpop.f32.mrb[77].mxu1 }
 0xf1f   :  { %v2970_v8 = vmul.f32 %v2965_v2, %v2661_v31  ;;  %v3101_v21 = vmul.f32 %v3096_v25, %v2661_v31  ;;  %v3232_v32 = vmul.f32 %v3227_v6, %v2661_v31  ;;  %v3751_v47 = vpop.f32.mrb[78].mxu1 }
 0xf20   :  { %v5846_v16 = vadd.f32 %v2972_v57, %v5686_v42  ;;  %v5849_v38 = vadd.f32 %v3103_v48, %v5689_v24  ;;  %v5852_v0 = vadd.f32 %v3234_v7, %v5692_v40  ;;  %v2664_v52 = vpop.f32.mrb[79].mxu1  ;;  %v5866_v24 = vstv %s3483_s2 }
 0xf21   :  { %v5855_v17 = vadd.f32 %v2970_v8, %v5695_v29  ;;  %v5858_v58 = vadd.f32 %v3101_v21, %v5698_v28  ;;  %v5861_v62 = vadd.f32 %v3232_v32, %v5701_v22  ;;  %v2971_v45 = vmul.f32 %v2965_v2, %v2664_v52  ;;  %v6180_v22 = vld [vmem:[#allocation46_spill] sm:$0xff] }
 0xf22   :  { %v3102_v56 = vmul.f32 %v3096_v25, %v2664_v52  ;;  %v3233_v42 = vmul.f32 %v3227_v6, %v2664_v52  ;;  %v5868_v40 = vstv %s3489_s8  ;;  %v5880_v49 = vadd.f32 %v6180_v22, %v4387_v59  ;;  %v6183_v6 = vld [vmem:[#allocation49_spill] sm:$0xff] }
 0xf23   :  { %v5864_v4 = vadd.f32 %v2971_v45, %v5704_v61  ;;  %v5884_v61 = vadd.f32 %v6181_v1, %v4387_v59  ;;  %v826_v2 = vadd.f32 %v6182_v27, %v4387_v59  ;;  %v5890_v14 = vadd.f32 %v6183_v6, %v4387_v59 }
 0xf24   :  { %v5873_v29 = vadd.f32 %v3102_v56, %v5707_v13  ;;  %v5876_v28 = vadd.f32 %v3233_v42, %v5710_v46 }
 0xf25   :  { %v3778_v25 = vpop.f32.mrb[80].mxu1 }
 0xf26   :  { %v2984_v13 = vmul.f32 %v3778_v25, %v5866_v24  ;;  %v3115_v46 = vmul.f32 %v3778_v25, %v5868_v40  ;;  %v3246_v50 = vmul.f32 %v3778_v25, %v5870_v63  ;;  %v2877_v18 = vpop.f32.mrb[81].mxu1 }
 0xf27   :  { %v2982_v54 = vmul.f32 %v5866_v24, %v2877_v18  ;;  %v3113_v36 = vmul.f32 %v5868_v40, %v2877_v18  ;;  %v3244_v60 = vmul.f32 %v5870_v63, %v2877_v18  ;;  %v3779_v51 = vpop.f32.mrb[82].mxu1 }
 0xf28   :  { %v2991_v9 = vadd.f32 %v2984_v13, %v2975_v35  ;;  %v3122_v26 = vadd.f32 %v3115_v46, %v3106_v15  ;;  %v3253_v53 = vadd.f32 %v3246_v50, %v3237_v55  ;;  %v2985_v37 = vmul.f32 %v3779_v51, %v5866_v24  ;;  %v2880_v10 = vpop.f32.mrb[83].mxu1 }
 0xf29   :  { %v2989_v30 = vadd.f32 %v2982_v54, %v2973_v34  ;;  %v3120_v5 = vadd.f32 %v3113_v36, %v3104_v19  ;;  %v3251_v20 = vadd.f32 %v3244_v60, %v3235_v44  ;;  %v3116_v57 = vmul.f32 %v3779_v51, %v5868_v40 }
 0xf2a   :  { %v2992_v48 = vadd.f32 %v2985_v37, %v2976_v11  ;;  %v3247_v7 = vmul.f32 %v3779_v51, %v5870_v63  ;;  %v2983_v31 = vmul.f32 %v5866_v24, %v2880_v10  ;;  %v3114_v8 = vmul.f32 %v5868_v40, %v2880_v10 }
 0xf2b   :  { %v3123_v21 = vadd.f32 %v3116_v57, %v3107_v12  ;;  %v3245_v35 = vmul.f32 %v5870_v63, %v2880_v10  ;;  %v5908_v15 = vsub.f32 %v826_v2, %v3122_v26  ;;  %v5910_v55 = vsub.f32 %v826_v2, %v2991_v9 }
 0xf2c   :  { %v3254_v32 = vadd.f32 %v3247_v7, %v3238_v43  ;;  %v2990_v34 = vadd.f32 %v2983_v31, %v2974_v3  ;;  %v3121_v19 = vadd.f32 %v3114_v8, %v3105_v33  ;;  %v5912_v44 = vsub.f32 %v826_v2, %v3253_v53 }
 0xf2d   :  { %v3252_v47 = vadd.f32 %v3245_v35, %v3236_v41  ;;  %v3782_v11 = vpop.f32.mrb[84].mxu1  ;;  %v3136_v52 = vmul.f32 %v5908_v15, %v5908_v15  ;;  %v3005_v45 = vmul.f32 %v5910_v55, %v5910_v55  ;;  %v5919_v12 = vsub.f32 %v5890_v14, %v3123_v21 }
 0xf2e   :  { %v2988_v56 = vmul.f32 %v3782_v11, %v5866_v24  ;;  %v3119_v42 = vmul.f32 %v3782_v11, %v5868_v40  ;;  %v3250_v43 = vmul.f32 %v3782_v11, %v5870_v63  ;;  %v2893_v3 = vpop.f32.mrb[85].mxu1  ;;  %v3267_v33 = vmul.f32 %v5912_v44, %v5912_v44 }
 0xf2f   :  { %3145 = vadd.xlane.f32.xlu1 %v3136_v52  ;;  %3014 = vadd.xlane.f32.xlu0 %v3005_v45  ;;  %v2986_v41 = vmul.f32 %v5866_v24, %v2893_v3  ;;  %v3117_v22 = vmul.f32 %v5868_v40, %v2893_v3  ;;  %v3248_v1 = vmul.f32 %v5870_v63, %v2893_v3  ;;  %v3783_v27 = vpop.f32.mrb[86].mxu1 }
 0xf30   :  { %v2995_v2 = vadd.f32 %v2988_v56, %v5846_v16  ;;  %v3126_v25 = vadd.f32 %v3119_v42, %v5849_v38  ;;  %v3257_v6 = vadd.f32 %v3250_v43, %v5852_v0  ;;  %v2896_v13 = vpop.f32.mrb[87].mxu1  ;;  %v3137_v46 = vmul.f32 %v5919_v12, %v5919_v12 }
 0xf31   :  { %v2993_v50 = vadd.f32 %v2986_v41, %v5855_v17  ;;  %v3124_v18 = vadd.f32 %v3117_v22, %v5858_v58  ;;  %v3255_v39 = vadd.f32 %v3248_v1, %v5861_v62  ;;  %v2987_v54 = vmul.f32 %v5866_v24, %v2896_v13  ;;  %v6185_v62 = vld [vmem:[#allocation50_spill] sm:$0xff] }
 0xf32   :  { %v3118_v36 = vmul.f32 %v5868_v40, %v2896_v13  ;;  %v3249_v16 = vmul.f32 %v5870_v63, %v2896_v13  ;;  %v5941_v38 = vsub.f32 %v5880_v49, %v2989_v30  ;;  %v5944_v0 = vsub.f32 %v5890_v14, %v3254_v32  ;;  %v6186_v40 = vld [vmem:[#allocation52_spill] sm:$0xff] }
 0xf33   :  { %v2994_v60 = vadd.f32 %v2987_v54, %v5864_v4  ;;  %3276 = vadd.xlane.f32.xlu0 %v3267_v33  ;;  %3147 = vadd.xlane.f32.xlu1 %v3137_v46  ;;  %v5948_v17 = vsub.f32 %v5880_v49, %v3120_v5  ;;  %v5951_v58 = vsub.f32 %v5884_v61, %v2990_v34 }
 0xf34   :  { %v836_v24 = vadd.f32 %v6185_v62, %v4387_v59  ;;  %v846_v63 = vadd.f32 %v6186_v40, %v4387_v59  ;;  %v3125_v51 = vadd.f32 %v3118_v36, %v5873_v29  ;;  %v3256_v9 = vadd.f32 %v3249_v16, %v5876_v28 }
 0xf35   :  { %v5960_v4 = vsub.f32 %v5897_v23, %v2994_v60  ;;  %v3003_v26 = vmul.f32 %v5941_v38, %v5941_v38  ;;  %v3268_v53 = vmul.f32 %v5944_v0, %v5944_v0  ;;  %v5967_v37 = vsub.f32 %v5880_v49, %v3251_v20 }
 0xf36   :  { %v5970_v10 = vsub.f32 %v5897_v23, %v3125_v51  ;;  %v5973_v59 = vsub.f32 %v5897_v23, %v3256_v9  ;;  %v5976_v29 = vsub.f32 %v5884_v61, %v3121_v19  ;;  %v5979_v28 = vsub.f32 %v5890_v14, %v2992_v48 }
 0xf37   :  { %3010 = vadd.xlane.f32.xlu0 %v3003_v26  ;;  %3278 = vadd.xlane.f32.xlu1 %v3268_v53  ;;  %v5982_v30 = vsub.f32 %v5884_v61, %v3252_v47  ;;  %v5984_v5 = vsub.f32 %v846_v63, %v3126_v25  ;;  %v5986_v49 = vsub.f32 %v846_v63, %v2995_v2 }
 0xf38   :  { %v5988_v20 = vsub.f32 %v836_v24, %v3124_v18  ;;  %v3134_v23 = vmul.f32 %v5948_v17, %v5948_v17  ;;  %v3004_v57 = vmul.f32 %v5951_v58, %v5951_v58  ;;  %v5994_v7 = vsub.f32 %v836_v24, %v2993_v50 }
 0xf39   :  { %v5996_v14 = vsub.f32 %v836_v24, %v3255_v39  ;;  %v5998_v61 = vsub.f32 %v846_v63, %v3257_v6  ;;  %v3265_v48 = vmul.f32 %v5967_v37, %v5967_v37  ;;  %v3135_v31 = vmul.f32 %v5976_v29, %v5976_v29 }
 0xf3a   :  { %v3006_v8 = vmul.f32 %v5979_v28, %v5979_v28  ;;  %v3266_v21 = vmul.f32 %v5982_v30, %v5982_v30  ;;  %v3140_v35 = vmul.f32 %v5984_v5, %v5984_v5  ;;  %v3009_v32 = vmul.f32 %v5986_v49, %v5986_v49 }
 0xf3b   :  { %3141 = vadd.xlane.f32.xlu0 %v3134_v23  ;;  %3012 = vadd.xlane.f32.xlu1 %v3004_v57  ;;  %v3138_v34 = vmul.f32 %v5988_v20, %v5988_v20  ;;  %v3007_v19 = vmul.f32 %v5994_v7, %v5994_v7  ;;  %v3269_v47 = vmul.f32 %v5996_v14, %v5996_v14 }
 0xf3c   :  { %v3139_v11 = vmul.f32 %v5970_v10, %v5970_v10  ;;  %v3270_v52 = vmul.f32 %v5973_v59, %v5973_v59  ;;  %v3008_v45 = vmul.f32 %v5960_v4, %v5960_v4  ;;  %v3271_v56 = vmul.f32 %v5998_v61, %v5998_v61 }
 0xf3f   :  { %3272 = vadd.xlane.f32.xlu0 %v3265_v48  ;;  %3143 = vadd.xlane.f32.xlu1 %v3135_v31 }
 0xf43   :  { %3016 = vadd.xlane.f32.xlu0 %v3006_v8  ;;  %3274 = vadd.xlane.f32.xlu1 %v3266_v21 }
 0xf47   :  { %3153 = vadd.xlane.f32.xlu0 %v3140_v35  ;;  %3022 = vadd.xlane.f32.xlu1 %v3009_v32 }
 0xf4b   :  { %3149 = vadd.xlane.f32.xlu0 %v3138_v34  ;;  %3018 = vadd.xlane.f32.xlu1 %v3007_v19 }
 0xf4f   :  { %3280 = vadd.xlane.f32.xlu0 %v3269_v47  ;;  %3151 = vadd.xlane.f32.xlu1 %v3139_v11 }
 0xf53   :  { %3282 = vadd.xlane.f32.xlu1 %v3270_v52  ;;  %3020 = vadd.xlane.f32.xlu0 %v3008_v45 }
 0xf57   :  { %3284 = vadd.xlane.f32.xlu0 %v3271_v56 }
 0xfbc   :  { %v3015_v42 = vpop.xlane.xlu0 %3014  ;;  %v3146_v43 = vpop.xlane.xlu1 %3145 }
 0xfc0   :  { %v3277_v3 = vpop.xlane.xlu0 %3276  ;;  %v3148_v33 = vpop.xlane.xlu1 %3147 }
 0xfc4   :  { %v3011_v41 = vpop.xlane.xlu0 %3010  ;;  %v3279_v22 = vpop.xlane.xlu1 %3278 }
 0xfc8   :  { %v3142_v1 = vpop.xlane.xlu0 %3141  ;;  %v3013_v27 = vpop.xlane.xlu1 %3012 }
 0xfc9   :  { %v3024_v54 = vadd.f32 %v3013_v27, %v3011_v41 }
 0xfcb   :  { %v3025_v24 = vadd.f32 %v3024_v54, %v3015_v42 }
 0xfcc   :  { %v3273_v2 = vpop.xlane.xlu0 %3272  ;;  %v3144_v25 = vpop.xlane.xlu1 %3143 }
 0xfcd   :  { %v3155_v46 = vadd.f32 %v3144_v25, %v3142_v1 }
 0xfcf   :  { %v3156_v39 = vadd.f32 %v3155_v46, %v3146_v43 }
 0xfd0   :  { %v3017_v6 = vpop.xlane.xlu0 %3016  ;;  %v3275_v13 = vpop.xlane.xlu1 %3274 }
 0xfd1   :  { %v3286_v36 = vadd.f32 %v3275_v13, %v3273_v2  ;;  %v3157_v62 = vadd.f32 %v3156_v39, %v3148_v33  ;;  %v3026_v26 = vadd.f32 %v3025_v24, %v3017_v6 }
 0xfd3   :  { %v3287_v40 = vadd.f32 %v3286_v36, %v3277_v3 }
 0xfd4   :  { %v3154_v50 = vpop.xlane.xlu0 %3153  ;;  %v3023_v18 = vpop.xlane.xlu1 %3022 }
 0xfd5   :  { %v3288_v57 = vadd.f32 %v3287_v40, %v3279_v22  ;;  %v4306_v40 = vmov 0  }
 0xfd8   :  { %v3150_v16 = vpop.xlane.xlu0 %3149  ;;  %v3019_v60 = vpop.xlane.xlu1 %3018 }
 0xfd9   :  { %v3158_v63 = vadd.f32 %v3157_v62, %v3150_v16  ;;  %v3027_v23 = vadd.f32 %v3026_v26, %v3019_v60 }
 0xfdc   :  { %v3281_v51 = vpop.xlane.xlu0 %3280  ;;  %v3152_v9 = vpop.xlane.xlu1 %3151 }
 0xfdd   :  { %v3159_v53 = vadd.f32 %v3158_v63, %v3152_v9  ;;  %v3289_v21 = vadd.f32 %v3288_v57, %v3281_v51 }
 0xfdf   :  { %v3160_v48 = vadd.f32 %v3159_v53, %v3154_v50 }
 0xfe0   :  { %v3021_v31 = vpop.xlane.xlu0 %3020  ;;  %v3283_v8 = vpop.xlane.xlu1 %3282 }
 0xfe1   :  { %v3161_v35 = vrot.slane %v3160_v48, 4  ;;  %v3028_v32 = vadd.f32 %v3027_v23, %v3021_v31  ;;  %v3290_v47 = vadd.f32 %v3289_v21, %v3283_v8 }
 0xfe3   :  { %v3162_v34 = vadd.f32 %v3161_v35, %v3160_v48  ;;  %v3029_v19 = vadd.f32 %v3028_v32, %v3023_v18 }
 0xfe4   :  { %v3285_v11 = vpop.xlane.xlu0 %3284 }
 0xfe5   :  { %v3163_v52 = vrot.slane %v3162_v34, 2  ;;  %v3030_v45 = vrot.slane %v3029_v19, 4  ;;  %v3291_v56 = vadd.f32 %v3290_v47, %v3285_v11 }
 0xfe7   :  { %v3164_v42 = vadd.f32 %v3163_v52, %v3162_v34  ;;  %v3031_v43 = vadd.f32 %v3030_v45, %v3029_v19  ;;  %v3292_v3 = vrot.slane %v3291_v56, 4 }
 0xfe9   :  { %v3165_v33 = vrot.slane %v3164_v42, 1  ;;  %v3032_v41 = vrot.slane %v3031_v43, 2  ;;  %v3293_v1 = vadd.f32 %v3292_v3, %v3291_v56 }
 0xfeb   :  { %v3166_v22 = vadd.f32 %v3165_v33, %v3164_v42  ;;  %v3033_v27 = vadd.f32 %v3032_v41, %v3031_v43  ;;  %v3294_v2 = vrot.slane %v3293_v1, 2 }
 0xfed   :  { %v3034_v25 = vrot.slane %v3033_v27, 1  ;;  %v3295_v6 = vadd.f32 %v3294_v2, %v3293_v1  ;;  %v3167_v50 = vsub.f32 0.0, %v3166_v22 }
 0xfef   :  { %v3035_v13 = vadd.f32 %v3034_v25, %v3033_v27  ;;  %v3296_v46 = vrot.slane %v3295_v6, 1  ;;  %v3168_v36 = vmul.f32 0.017857144, %v3167_v50 }
 0xff1   :  { %v3297_v18 = vadd.f32 %v3296_v46, %v3295_v6  ;;  %v3036_v39 = vsub.f32 0.0, %v3035_v13 }
 0xff3   :  { %v3037_v54 = vmul.f32 0.017857144, %v3036_v39  ;;  %v3298_v16 = vsub.f32 0.0, %v3297_v18 }
 0xff5   :  { %v3299_v60 = vmul.f32 0.017857144, %v3298_v16  ;;  %v3301_v62 = vsel %vm3300_vm2, %v3037_v54, %v3168_v36  ;;  %vm3306_vm5 = vcmp.gt.f32.partialorder %v3168_v36, %v3037_v54 }
 0xff6   :  { %v3307_v24 = vsel %vm3306_vm5, %v3168_v36, %v3037_v54  ;;  %v3308_v63 = vsel %vm3306_vm5, 1, %v4306_v40 }
 0xff7   :  { %v3303_v51 = vsel %vm3302_vm3, %v3301_v62, %v3299_v60  ;;  %vm3309_vm6 = vcmp.gt.f32.partialorder %v3299_v60, %v3307_v24 }
 0xff8   :  { %3305 = vst.msk [vmem:[#allocation9] sm:$0x1] %vm3304_vm4, %v3303_v51  ;;  %v3310_v9 = vsel %vm3309_vm6, 2, %v3308_v63 }
 0xff9   :  { %vm3311_vm7 = vcmp.eq.s32.totalorder %v3310_v9, 1  ;;  %vm3321_vm8 = vcmp.eq.s32.totalorder %v3310_v9, 2 }
 0xffa   :  { %4257 = shalt.err (!%p4254_p11)
}
 0xffb   :  { %s4258_s20 = scalar_lea.hbm %s6094_s6, 16 }
 0xffc   :  { %p4259_p12 = scmp.ne.s32.totalorder %s6094_s6, %s4258_s20  ;;  %p4262_p13 = scmp.lt.u32.totalorder %s4258_s20, %s6094_s6 }
 0xffe   :  { %p4264_p0 = pnand %p4262_p13, %p4259_p12 }
0x1000   :  { %4267 = shalt.err (!%p4264_p0)
}
0x1001   :  { %3347 = dma.vmem_to_hbm [thread:$0]  %s3345_s13, 16, %s6094_s6, [#allocation4]   ;;  %v3314_v26 = vsel %vm3311_vm7, %v5948_v17, %v5941_v38  ;;  %v3315_v53 = vsel %vm3311_vm7, %v5976_v29, %v5951_v58  ;;  %v3316_v23 = vsel %vm3311_vm7, %v5908_v15, %v5910_v55  ;;  %v3317_v57 = vsel %vm3311_vm7, %v5919_v12, %v5979_v28 }
0x1002   :  { %v3318_v48 = vsel %vm3311_vm7, %v5988_v20, %v5994_v7  ;;  %v3319_v38 = vsel %vm3311_vm7, %v5970_v10, %v5960_v4  ;;  %v3320_v17 = vsel %vm3311_vm7, %v5984_v5, %v5986_v49  ;;  %v3324_v58 = vsel %vm3321_vm8, %v5967_v37, %v3314_v26  ;;  %s4268_s6 = scalar_lea.vmem %s3354_s15, 896  ;;  %p4273_p2 = scmp.lt.s32.totalorder %s3354_s15, %s3354_s15 }
0x1003   :  { %v3325_v15 = vsel %vm3321_vm8, %v5982_v30, %v3315_v53  ;;  %v3326_v55 = vsel %vm3321_vm8, %v5912_v44, %v3316_v23  ;;  %v3327_v12 = vsel %vm3321_vm8, %v5944_v0, %v3317_v57  ;;  %v3328_v29 = vsel %vm3321_vm8, %v5996_v14, %v3318_v48  ;;  %3331 = vst [vmem:[#allocation10] sm:$0xff] %v3324_v58  ;;  %p4269_p1 = scmp.ne.s32.totalorder %s3354_s15, %s4268_s6  ;;  %p4274_p3 = scmp.lt.s32.totalorder %s4268_s6, %s4268_s6 }
0x1004   :  { %v3329_v4 = vsel %vm3321_vm8, %v5973_v59, %v3319_v38  ;;  %v3330_v37 = vsel %vm3321_vm8, %v5998_v61, %v3320_v17  ;;  %3332 = vst [vmem:[#allocation10 + $0x8] sm:$0xff] %v3325_v15  ;;  %3333 = vst [vmem:[#allocation10 + $0x10] sm:$0xff] %v3326_v55 }
0x1005   :  { %3334 = vst [vmem:[#allocation10 + $0x18] sm:$0xff] %v3327_v12  ;;  %3335 = vst [vmem:[#allocation10 + $0x20] sm:$0xff] %v3328_v29  ;;  %p4275_p4 = por %p4274_p3, %p4273_p2 }
0x1006   :  { %3336 = vst [vmem:[#allocation10 + $0x28] sm:$0xff] %v3329_v4  ;;  %3337 = vst [vmem:[#allocation10 + $0x30] sm:$0xff] %v3330_v37 }
0x1007   :  { %p4276_p5 = pnand %p4275_p4, %p4269_p1 }
0x1009   :  { %4279 = shalt.err (!%p4276_p5)
}
0x100a   :  { %s4280_s3 = scalar_lea.hbm %s6095_s7, 896 }
0x100b   :  { %p4281_p6 = scmp.ne.s32.totalorder %s6095_s7, %s4280_s3  ;;  %p4284_p7 = scmp.lt.u32.totalorder %s4280_s3, %s6095_s7 }
0x100d   :  { %p4286_p8 = pnand %p4284_p7, %p4281_p6 }
0x100f   :  { %4289 = shalt.err (!%p4286_p8)
}
0x1010   :  { %3359 = dma.vmem_to_hbm [thread:$0]  %s3354_s15, 896, %s6095_s7, [#allocation11], %s4301_s11, %s4301_s11, %s4302_s12  }
0x1011   :  { %4296 = dma.done.wait [#allocation4], 16  }
0x1012   :  { %4297 = vsyncadd [#allocation4], 4294967280 }
0x1013   :  { %4298 = dma.done.wait [#allocation11], 896  }
0x1014   :  { %4299 = vsyncadd [#allocation11], 4294966400 }
0x1015   :  { %3366 = vsyncpa [#allocation3], 1 }
0x1016   :  { %3367 = vsyncpa [#allocation7], 1 }
0x1017   :  { %3368 = vsyncpa [#allocation4], 1 }
0x1018   :  { %3369 = vsyncpa [#allocation11], 1 }
0x1019   :  { %3370 = vsyncpa [#allocation5], 1 }

</bundles_post_ra>
